<compile_context>
chip_gen: v6e
topology: v6e:2x2x1
jax: 0.10.0
libtpu: 0.0.40
codegen_flags: <defaults>
</compile_context>

<pallas_src>
import functools

import jax
import jax.numpy as jnp
from jax import lax
from jax.experimental import pallas as pl
from jax.experimental.pallas import tpu as pltpu


# ----------------------------- fused InterBlock kernel -----------------------------

def _interblock_kernel(xa_ref, xs_ref, w_s2a_ref, w_a2s_ref, w_ang_t_ref,
                       w_ang_b_ref, w_spa_ref, out_a_ref, out_s_ref, pad_ref,
                       *, r2, h, w, C):
    HW = h * w
    OFF = 2 * w                      # interior block-row offset inside the padded scratch
    f32 = jnp.float32
    bf16 = jnp.bfloat16

    xa = xa_ref[0]                   # (HW, C)  angular features, f32
    xa_b = xa.astype(bf16)
    xs_q_list = [xs_ref[0, q] for q in range(r2)]   # r2 x (HW, C) spatial sub-pixel slices

    # ---- Spa2Ang (k=r, s=r conv): per-sub-pixel channel matmuls, accumulated in f32 ----
    # Also fill the xs half of the SpaConv padded input and zero its halo rows
    # (halos re-zeroed every step: scratch is per-core under core-parallel grids).
    halo = jnp.zeros((OFF, 2 * C), dtype=pad_ref.dtype)
    ang2_acc = jnp.zeros((HW, C), f32)
    for q in range(r2):
        xs_q = xs_q_list[q]
        ang2_acc = ang2_acc + jnp.dot(xs_q.astype(bf16), w_s2a_ref[q],
                                      preferred_element_type=f32)
        pad_ref[q, :OFF, :] = halo
        pad_ref[q, OFF + HW:, :] = halo
        pad_ref[q, OFF:OFF + HW, 0:C] = xs_q
    buf_ang2 = jnp.maximum(ang2_acc, 0.0)

    # ---- AngConv: 1x1 conv on concat(xa, buf_ang2) == two accumulated matmuls ----
    ya = (jnp.dot(xa_b, w_ang_t_ref[...], preferred_element_type=f32)
          + jnp.dot(buf_ang2.astype(bf16), w_ang_b_ref[...], preferred_element_type=f32))
    out_a_ref[0] = (jnp.maximum(ya, 0.0) + xa).astype(out_a_ref.dtype)

    # ---- Ang2Spa: 1x1 conv; PixelShuffle folded into the per-sub-pixel weight split ----
    for q in range(r2):
        spa2_q = jnp.dot(xa_b, w_a2s_ref[q], preferred_element_type=f32)     # (HW, C)
        pad_ref[q, OFF:OFF + HW, C:2 * C] = spa2_q

    # dx = +/-1 validity masks, generated in-kernel (no HBM inputs / extra DMAs).
    j_idx = lax.broadcasted_iota(jnp.int32, (HW, 1), 0) % w
    mask_l = (j_idx >= 1).astype(f32)           # valid output columns for dx = -1
    mask_r = (j_idx <= w - 2).astype(f32)       # valid output columns for dx = +1

    # ---- SpaConv: 3x3 conv, dilation=r, padding=r.  A +/-r pixel shift is a +/-1 block
    # shift at the SAME sub-pixel, so per sub-pixel it is 9 shifted-window matmuls that
    # contract only the 2C channel axis (no block-diagonal / kron weights). ----
    # NOTE: dx=+/-1 window starts are sublane-unaligned (perf nit, not correctness); a
    # pltpu.roll-based pre-shift with zeroed boundary columns would make them aligned.
    for q in range(r2):
        acc = [jnp.zeros((HW, C), f32) for _ in range(3)]    # contributions grouped by dx
        for ky in range(3):
            for kx in range(3):
                dy, dx = ky - 1, kx - 1
                start = OFF + dy * w + dx
                win = pad_ref[q, start:start + HW, :]        # (HW, 2C) f32
                acc[dx + 1] = acc[dx + 1] + jnp.dot(
                    win.astype(bf16), w_spa_ref[ky * 3 + kx],
                    preferred_element_type=f32)
        y = acc[1] + mask_l * acc[0] + mask_r * acc[2]
        out_s_ref[0, q] = (jnp.maximum(y, 0.0) + xs_q_list[q]).astype(out_s_ref.dtype)


def _interblock_fused(xa_i, xs_i, wts, *, r, h, w, C):
    N = xa_i.shape[0]
    HW = h * w
    r2 = r * r
    w_s2a, w_a2s, w_ang_t, w_ang_b, w_spa = wts

    # Cost estimate (advisory): channel-only contractions after the kron removal.
    flops = N * (2 * r2 * HW * C * C          # Spa2Ang
                 + 2 * r2 * HW * C * C        # Ang2Spa
                 + 4 * HW * C * C             # AngConv
                 + 36 * r2 * HW * C * C)      # SpaConv (9 taps x 2C->C)
    wt_bytes = 2 * (2 * r2 * C * C + 2 * C * C + 18 * C * C)          # bf16 weights
    act_bytes = 4 * 2 * N * HW * C * (1 + r2)                         # f32 acts in + out
    cost = pl.CostEstimate(flops=int(flops), transcendentals=0,
                           bytes_accessed=int(act_bytes + wt_bytes))

    # Explicit VMEM budget: double-buffered activation blocks + weights + pad scratch.
    dbuf_act = 2 * 2 * 4 * HW * C * (1 + r2)            # (in+out) x f32 x double-buffer
    dbuf_wts = 2 * wt_bytes                             # weights double-buffered (default)
    pad_bytes = 4 * r2 * (h + 4) * w * 2 * C            # f32 pad scratch
    vmem_limit = int(min(max(2 * (dbuf_act + dbuf_wts + pad_bytes), 16 * 2**20),
                         64 * 2**20))
    # NOTE: weights/masks could be single-buffered with pipeline_mode=pl.Buffered(1);
    # left at the default here for portability.

    kernel = functools.partial(_interblock_kernel, r2=r2, h=h, w=w, C=C)

    return pl.pallas_call(
        kernel,
        out_shape=(jax.ShapeDtypeStruct((N, HW, C), xa_i.dtype),
                   jax.ShapeDtypeStruct((N, r2, HW, C), xs_i.dtype)),
        grid=(N,),
        in_specs=[
            pl.BlockSpec((1, HW, C), lambda n: (n, 0, 0)),            # xa
            pl.BlockSpec((1, r2, HW, C), lambda n: (n, 0, 0, 0)),     # xs (sub-pixel major)
            pl.BlockSpec((r2, C, C), lambda n: (0, 0, 0)),            # Spa2Ang weights
            pl.BlockSpec((r2, C, C), lambda n: (0, 0, 0)),            # Ang2Spa(+shuffle) w.
            pl.BlockSpec((C, C), lambda n: (0, 0)),                   # AngConv (xa half)
            pl.BlockSpec((C, C), lambda n: (0, 0)),                   # AngConv (ang2 half)
            pl.BlockSpec((9, 2 * C, C), lambda n: (0, 0, 0)),         # SpaConv per-tap w.
        ],
        out_specs=(
            pl.BlockSpec((1, HW, C), lambda n: (n, 0, 0)),
            pl.BlockSpec((1, r2, HW, C), lambda n: (n, 0, 0, 0)),
        ),
        scratch_shapes=[pltpu.VMEM((r2, (h + 4) * w, 2 * C), jnp.float32)],
        compiler_params=pltpu.CompilerParams(
            dimension_semantics=("parallel",),                        # batch across TCs
            vmem_limit_bytes=vmem_limit),
        cost_estimate=cost,
    )(xa_i, xs_i, w_s2a, w_a2s, w_ang_t, w_ang_b, w_spa)


# ----------------------------- weight / layout preparation -----------------------------

def _prep_block_weights(p, r, C):
    """Reshape PyTorch-style OIHW conv weights into the per-sub-pixel / per-tap matmul forms."""
    r2 = r * r
    bf16 = jnp.bfloat16
    # Spa2Ang (C, C, r, r): per sub-pixel q = py*r+px, a (C_in, C_out) weight.
    w_s2a = p["spa2ang"].transpose(2, 3, 1, 0).reshape(r2, C, C).astype(bf16)
    # Ang2Spa (r*r*C, C, 1, 1) + PixelShuffle: out channel o = c*r*r + q ->
    # per target sub-pixel q, a (C_in, C_out) weight (the shuffle is folded into the split).
    w_a2s = (p["ang2spa"][:, :, 0, 0].reshape(C, r2, C)
             .transpose(1, 2, 0).astype(bf16))
    # AngConv (C, 2C, 1, 1): split the channel concat into two accumulated matmuls.
    wang = p["angconv"][:, :, 0, 0]
    w_ang_t = wang[:, :C].T.astype(bf16)          # applied to xa
    w_ang_b = wang[:, C:].T.astype(bf16)          # applied to buffer_ang2
    # SpaConv (C, 2C, 3, 3): per tap, a plain (2C_in, C_out) channel-contraction weight
    # (rows 0:C pair with the xs half, rows C:2C with the Ang2Spa half of the pad buffer).
    w_spa = jnp.stack([p["spaconv"][:, :, ky, kx].T
                       for ky in range(3) for kx in range(3)], axis=0).astype(bf16)
    return (w_s2a, w_a2s, w_ang_t, w_ang_b, w_spa)


def intergroup_forward(xa_nchw, xs_nchw, params_list, angRes):
    r = angRes
    r2 = r * r
    N, C, h, w = xa_nchw.shape
    # NCHW -> internal layouts (once per group; the blocks chain internally):
    #   xa_i[n, i*w+j, c]            = xa[n, c, i, j]
    #   xs_i[n, py*r+px, i*w+j, c]   = xs[n, c, i*r+py, j*r+px]
    # TODO(synk): pad C up to a multiple of 128 for lane-dense stores at production sizes.
    xa_i = jnp.transpose(xa_nchw, (0, 2, 3, 1)).reshape(N, h * w, C)
    xs_i = (xs_nchw.reshape(N, C, h, r, w, r)
            .transpose(0, 3, 5, 2, 4, 1)
            .reshape(N, r2, h * w, C))

    for p in params_list:
        wts = _prep_block_weights(p, r, C)
        xa_i, xs_i = _interblock_fused(xa_i, xs_i, wts, r=r, h=h, w=w, C=C)

    out_a = jnp.transpose(xa_i.reshape(N, h, w, C), (0, 3, 1, 2))
    out_s = (xs_i.reshape(N, r, r, h, w, C)
             .transpose(0, 5, 3, 1, 4, 2)
             .reshape(N, C, h * r, w * r))
    return out_a, out_s


# ----------------------------- params + pure-JAX reference (NCHW) -----------------------------

def init_interblock_params(key, angRes, channels):
    r, C = angRes, channels
    k1, k2, k3, k4 = jax.random.split(key, 4)

    def wgt(k, shape):  # deterministic kaiming-ish init (OIHW like PyTorch)
        fan_in = shape[1] * shape[2] * shape[3]
        return jax.random.normal(k, shape, jnp.float32) / jnp.sqrt(float(fan_in))

    return {
        "spa2ang": wgt(k1, (C, C, r, r)),                # Conv2d(C, C, k=r, s=r)
        "ang2spa": wgt(k2, (r * r * C, C, 1, 1)),        # Conv2d(C, r*r*C, k=1)
        "angconv": wgt(k3, (C, 2 * C, 1, 1)),            # Conv2d(2C, C, k=1)
        "spaconv": wgt(k4, (C, 2 * C, 3, 3)),            # Conv2d(2C, C, k=3, dil=r, pad=r)
    }


def interblock_ref(xa, xs, p, r):
    dn = ("NCHW", "OIHW", "NCHW")
    buf_ang2 = jax.nn.relu(lax.conv_general_dilated(
        xs, p["spa2ang"], (r, r), "VALID", dimension_numbers=dn))
    y = lax.conv_general_dilated(xa, p["ang2spa"], (1, 1), "VALID", dimension_numbers=dn)
    N, Cr2, h, w = y.shape
    C = Cr2 // (r * r)
    buf_spa2 = (y.reshape(N, C, r, r, h, w)
                  .transpose(0, 1, 4, 2, 5, 3)
                  .reshape(N, C, h * r, w * r))
    buf_a = jnp.concatenate([xa, buf_ang2], axis=1)
    buf_s = jnp.concatenate([xs, buf_spa2], axis=1)
    out_a = jax.nn.relu(lax.conv_general_dilated(
        buf_a, p["angconv"], (1, 1), "VALID", dimension_numbers=dn)) + xa
    out_s = jax.nn.relu(lax.conv_general_dilated(
        buf_s, p["spaconv"], (1, 1), [(r, r), (r, r)],
        rhs_dilation=(r, r), dimension_numbers=dn)) + xs
    return out_a, out_s


# ----------------------------- main -----------------------------

if __name__ == "__main__":
    angRes, n_block, channels = 2, 2, 4
    batch, h, w = 2, 8, 8
    H, W = angRes * h, angRes * w

    key = jax.random.PRNGKey(0)
    kxa, kxs, kp = jax.random.split(key, 3)
    xa = jax.random.normal(kxa, (batch, channels, h, w), jnp.float32)   # angular feats (NCHW)
    xs = jax.random.normal(kxs, (batch, channels, H, W), jnp.float32)   # spatial feats (NCHW)
    params_list = [init_interblock_params(k, angRes, channels)
                   for k in jax.random.split(kp, n_block)]

    fwd = jax.jit(functools.partial(intergroup_forward, angRes=angRes))
    out_a, out_s = fwd(xa, xs, params_list)
    jax.block_until_ready((out_a, out_s))

    # correctness check against pure-JAX (XLA conv, f32) reference
    ra, rs = xa, xs
    for p in params_list:
        ra, rs = interblock_ref(ra, rs, p, angRes)
    assert out_a.shape == (batch, channels, h, w)
    assert out_s.shape == (batch, channels, H, W)
    # tolerance relaxed for bf16 matmul operands (f32 accumulation, f32 elementwise tail)
    assert jnp.allclose(out_a, ra, atol=6e-2, rtol=6e-2)
    assert jnp.allclose(out_s, rs, atol=6e-2, rtol=6e-2)

    print("KERNEL_OK")
</pallas_src>

<mosaic_0001>
module attributes {stable_mosaic.version = 11 : i64} {
  func.func @_interblock_kernel(%arg0: i32, %arg1: memref<1x64x4xf32, #tpu.memory_space<vmem>>, %arg2: memref<1x4x64x4xf32, #tpu.memory_space<vmem>>, %arg3: memref<4x4x4xbf16, #tpu.memory_space<vmem>>, %arg4: memref<4x4x4xbf16, #tpu.memory_space<vmem>>, %arg5: memref<4x4xbf16, #tpu.memory_space<vmem>>, %arg6: memref<4x4xbf16, #tpu.memory_space<vmem>>, %arg7: memref<9x8x4xbf16, #tpu.memory_space<vmem>>, %arg8: memref<1x64x4xf32, #tpu.memory_space<vmem>>, %arg9: memref<1x4x64x4xf32, #tpu.memory_space<vmem>>, %arg10: memref<4x96x8xf32, #tpu.memory_space<vmem>>) attributes {dimension_semantics = [#tpu.dimension_semantics<parallel>], iteration_bounds = array<i64: 2>, scalar_prefetch = 0 : i64, scratch_operands = 1 : i64, tpu.core_type = #tpu.core_type<tc>, window_params = [{transform_indices = @transform_0, window_bounds = array<i64: 1, 64, 4>}, {transform_indices = @transform_1, window_bounds = array<i64: 1, 4, 64, 4>}, {pipeline_mode = #tpu.pipeline_mode<synchronous>, transform_indices = @transform_2, window_bounds = array<i64: 4, 4, 4>}, {pipeline_mode = #tpu.pipeline_mode<synchronous>, transform_indices = @transform_3, window_bounds = array<i64: 4, 4, 4>}, {pipeline_mode = #tpu.pipeline_mode<synchronous>, transform_indices = @transform_4, window_bounds = array<i64: 4, 4>}, {pipeline_mode = #tpu.pipeline_mode<synchronous>, transform_indices = @transform_5, window_bounds = array<i64: 4, 4>}, {pipeline_mode = #tpu.pipeline_mode<synchronous>, transform_indices = @transform_6, window_bounds = array<i64: 9, 8, 4>}, {transform_indices = @transform_7, window_bounds = array<i64: 1, 64, 4>}, {transform_indices = @transform_8, window_bounds = array<i64: 1, 4, 64, 4>}]} {
    %c0 = arith.constant 0 : index
    %c0_0 = arith.constant 0 : index
    %c0_1 = arith.constant 0 : index
    %0 = vector.load %arg1[%c0, %c0_0, %c0_1] : memref<1x64x4xf32, #tpu.memory_space<vmem>>, vector<1x64x4xf32>
    %1 = vector.shape_cast %0 : vector<1x64x4xf32> to vector<64x4xf32>
    %2 = arith.truncf %1 : vector<64x4xf32> to vector<64x4xbf16>
    %c0_2 = arith.constant 0 : index
    %c0_3 = arith.constant 0 : index
    %c0_4 = arith.constant 0 : index
    %c0_5 = arith.constant 0 : index
    %3 = vector.load %arg2[%c0_2, %c0_3, %c0_4, %c0_5] : memref<1x4x64x4xf32, #tpu.memory_space<vmem>>, vector<1x1x64x4xf32>
    %4 = vector.shape_cast %3 : vector<1x1x64x4xf32> to vector<64x4xf32>
    %c0_6 = arith.constant 0 : index
    %c1 = arith.constant 1 : index
    %c0_7 = arith.constant 0 : index
    %c0_8 = arith.constant 0 : index
    %5 = vector.load %arg2[%c0_6, %c1, %c0_7, %c0_8] : memref<1x4x64x4xf32, #tpu.memory_space<vmem>>, vector<1x1x64x4xf32>
    %6 = vector.shape_cast %5 : vector<1x1x64x4xf32> to vector<64x4xf32>
    %c0_9 = arith.constant 0 : index
    %c2 = arith.constant 2 : index
    %c0_10 = arith.constant 0 : index
    %c0_11 = arith.constant 0 : index
    %7 = vector.load %arg2[%c0_9, %c2, %c0_10, %c0_11] : memref<1x4x64x4xf32, #tpu.memory_space<vmem>>, vector<1x1x64x4xf32>
    %8 = vector.shape_cast %7 : vector<1x1x64x4xf32> to vector<64x4xf32>
    %c0_12 = arith.constant 0 : index
    %c3 = arith.constant 3 : index
    %c0_13 = arith.constant 0 : index
    %c0_14 = arith.constant 0 : index
    %9 = vector.load %arg2[%c0_12, %c3, %c0_13, %c0_14] : memref<1x4x64x4xf32, #tpu.memory_space<vmem>>, vector<1x1x64x4xf32>
    %10 = vector.shape_cast %9 : vector<1x1x64x4xf32> to vector<64x4xf32>
    %cst = arith.constant 0.000000e+00 : f32
    %11 = vector.broadcast %cst : f32 to vector<16x8xf32>
    %cst_15 = arith.constant 0.000000e+00 : f32
    %12 = vector.broadcast %cst_15 : f32 to vector<64x4xf32>
    %13 = arith.truncf %4 : vector<64x4xf32> to vector<64x4xbf16>
    %c0_16 = arith.constant 0 : index
    %c0_17 = arith.constant 0 : index
    %c0_18 = arith.constant 0 : index
    %14 = vector.load %arg3[%c0_16, %c0_17, %c0_18] : memref<4x4x4xbf16, #tpu.memory_space<vmem>>, vector<1x4x4xbf16>
    %15 = vector.shape_cast %14 : vector<1x4x4xbf16> to vector<4x4xbf16>
    %cst_19 = arith.constant dense<0.000000e+00> : vector<64x4xf32>
    %16 = tpu.matmul %13, %15, %cst_19 {dimension_numbers = #tpu.dot_dimension_numbers<[1], [0], [0], [1], [0, 0, 1, 1], [], []>} : vector<64x4xbf16>, vector<4x4xbf16>, vector<64x4xf32> -> vector<64x4xf32>
    %17 = arith.addf %12, %16 : vector<64x4xf32>
    %c0_20 = arith.constant 0 : index
    %c0_21 = arith.constant 0 : index
    %c0_22 = arith.constant 0 : index
    %18 = vector.load %arg10[%c0_20, %c0_21, %c0_22] : memref<4x96x8xf32, #tpu.memory_space<vmem>>, vector<1x16x8xf32>
    %19 = vector.shape_cast %18 : vector<1x16x8xf32> to vector<16x8xf32>
    %20 = vector.shape_cast %11 : vector<16x8xf32> to vector<1x16x8xf32>
    tpu.vector_store %arg10[%c0_20, %c0_21, %c0_22], %20 {strides = array<i32>} : memref<4x96x8xf32, #tpu.memory_space<vmem>>, vector<1x16x8xf32>,
    %c0_23 = arith.constant 0 : index
    %c80 = arith.constant 80 : index
    %c0_24 = arith.constant 0 : index
    %21 = vector.load %arg10[%c0_23, %c80, %c0_24] : memref<4x96x8xf32, #tpu.memory_space<vmem>>, vector<1x16x8xf32>
    %22 = vector.shape_cast %21 : vector<1x16x8xf32> to vector<16x8xf32>
    %23 = vector.shape_cast %11 : vector<16x8xf32> to vector<1x16x8xf32>
    tpu.vector_store %arg10[%c0_23, %c80, %c0_24], %23 {strides = array<i32>} : memref<4x96x8xf32, #tpu.memory_space<vmem>>, vector<1x16x8xf32>,
    %c0_25 = arith.constant 0 : index
    %c16 = arith.constant 16 : index
    %c0_26 = arith.constant 0 : index
    %24 = vector.load %arg10[%c0_25, %c16, %c0_26] : memref<4x96x8xf32, #tpu.memory_space<vmem>>, vector<1x64x4xf32>
    %25 = vector.shape_cast %24 : vector<1x64x4xf32> to vector<64x4xf32>
    %26 = vector.shape_cast %4 : vector<64x4xf32> to vector<1x64x4xf32>
    tpu.vector_store %arg10[%c0_25, %c16, %c0_26], %26 {strides = array<i32>} : memref<4x96x8xf32, #tpu.memory_space<vmem>>, vector<1x64x4xf32>,
    %27 = arith.truncf %6 : vector<64x4xf32> to vector<64x4xbf16>
    %c1_27 = arith.constant 1 : index
    %c0_28 = arith.constant 0 : index
    %c0_29 = arith.constant 0 : index
    %28 = vector.load %arg3[%c1_27, %c0_28, %c0_29] : memref<4x4x4xbf16, #tpu.memory_space<vmem>>, vector<1x4x4xbf16>
    %29 = vector.shape_cast %28 : vector<1x4x4xbf16> to vector<4x4xbf16>
    %cst_30 = arith.constant dense<0.000000e+00> : vector<64x4xf32>
    %30 = tpu.matmul %27, %29, %cst_30 {dimension_numbers = #tpu.dot_dimension_numbers<[1], [0], [0], [1], [0, 0, 1, 1], [], []>} : vector<64x4xbf16>, vector<4x4xbf16>, vector<64x4xf32> -> vector<64x4xf32>
    %31 = arith.addf %17, %30 : vector<64x4xf32>
    %c1_31 = arith.constant 1 : index
    %c0_32 = arith.constant 0 : index
    %c0_33 = arith.constant 0 : index
    %32 = vector.load %arg10[%c1_31, %c0_32, %c0_33] : memref<4x96x8xf32, #tpu.memory_space<vmem>>, vector<1x16x8xf32>
    %33 = vector.shape_cast %32 : vector<1x16x8xf32> to vector<16x8xf32>
    %34 = vector.shape_cast %11 : vector<16x8xf32> to vector<1x16x8xf32>
    tpu.vector_store %arg10[%c1_31, %c0_32, %c0_33], %34 {strides = array<i32>} : memref<4x96x8xf32, #tpu.memory_space<vmem>>, vector<1x16x8xf32>,
    %c1_34 = arith.constant 1 : index
    %c80_35 = arith.constant 80 : index
    %c0_36 = arith.constant 0 : index
    %35 = vector.load %arg10[%c1_34, %c80_35, %c0_36] : memref<4x96x8xf32, #tpu.memory_space<vmem>>, vector<1x16x8xf32>
    %36 = vector.shape_cast %35 : vector<1x16x8xf32> to vector<16x8xf32>
    %37 = vector.shape_cast %11 : vector<16x8xf32> to vector<1x16x8xf32>
    tpu.vector_store %arg10[%c1_34, %c80_35, %c0_36], %37 {strides = array<i32>} : memref<4x96x8xf32, #tpu.memory_space<vmem>>, vector<1x16x8xf32>,
    %c1_37 = arith.constant 1 : index
    %c16_38 = arith.constant 16 : index
    %c0_39 = arith.constant 0 : index
    %38 = vector.load %arg10[%c1_37, %c16_38, %c0_39] : memref<4x96x8xf32, #tpu.memory_space<vmem>>, vector<1x64x4xf32>
    %39 = vector.shape_cast %38 : vector<1x64x4xf32> to vector<64x4xf32>
    %40 = vector.shape_cast %6 : vector<64x4xf32> to vector<1x64x4xf32>
    tpu.vector_store %arg10[%c1_37, %c16_38, %c0_39], %40 {strides = array<i32>} : memref<4x96x8xf32, #tpu.memory_space<vmem>>, vector<1x64x4xf32>,
    %41 = arith.truncf %8 : vector<64x4xf32> to vector<64x4xbf16>
    %c2_40 = arith.constant 2 : index
    %c0_41 = arith.constant 0 : index
    %c0_42 = arith.constant 0 : index
    %42 = vector.load %arg3[%c2_40, %c0_41, %c0_42] : memref<4x4x4xbf16, #tpu.memory_space<vmem>>, vector<1x4x4xbf16>
    %43 = vector.shape_cast %42 : vector<1x4x4xbf16> to vector<4x4xbf16>
    %cst_43 = arith.constant dense<0.000000e+00> : vector<64x4xf32>
    %44 = tpu.matmul %41, %43, %cst_43 {dimension_numbers = #tpu.dot_dimension_numbers<[1], [0], [0], [1], [0, 0, 1, 1], [], []>} : vector<64x4xbf16>, vector<4x4xbf16>, vector<64x4xf32> -> vector<64x4xf32>
    %45 = arith.addf %31, %44 : vector<64x4xf32>
    %c2_44 = arith.constant 2 : index
    %c0_45 = arith.constant 0 : index
    %c0_46 = arith.constant 0 : index
    %46 = vector.load %arg10[%c2_44, %c0_45, %c0_46] : memref<4x96x8xf32, #tpu.memory_space<vmem>>, vector<1x16x8xf32>
    %47 = vector.shape_cast %46 : vector<1x16x8xf32> to vector<16x8xf32>
    %48 = vector.shape_cast %11 : vector<16x8xf32> to vector<1x16x8xf32>
    tpu.vector_store %arg10[%c2_44, %c0_45, %c0_46], %48 {strides = array<i32>} : memref<4x96x8xf32, #tpu.memory_space<vmem>>, vector<1x16x8xf32>,
    %c2_47 = arith.constant 2 : index
    %c80_48 = arith.constant 80 : index
    %c0_49 = arith.constant 0 : index
    %49 = vector.load %arg10[%c2_47, %c80_48, %c0_49] : memref<4x96x8xf32, #tpu.memory_space<vmem>>, vector<1x16x8xf32>
    %50 = vector.shape_cast %49 : vector<1x16x8xf32> to vector<16x8xf32>
    %51 = vector.shape_cast %11 : vector<16x8xf32> to vector<1x16x8xf32>
    tpu.vector_store %arg10[%c2_47, %c80_48, %c0_49], %51 {strides = array<i32>} : memref<4x96x8xf32, #tpu.memory_space<vmem>>, vector<1x16x8xf32>,
    %c2_50 = arith.constant 2 : index
    %c16_51 = arith.constant 16 : index
    %c0_52 = arith.constant 0 : index
    %52 = vector.load %arg10[%c2_50, %c16_51, %c0_52] : memref<4x96x8xf32, #tpu.memory_space<vmem>>, vector<1x64x4xf32>
    %53 = vector.shape_cast %52 : vector<1x64x4xf32> to vector<64x4xf32>
    %54 = vector.shape_cast %8 : vector<64x4xf32> to vector<1x64x4xf32>
    tpu.vector_store %arg10[%c2_50, %c16_51, %c0_52], %54 {strides = array<i32>} : memref<4x96x8xf32, #tpu.memory_space<vmem>>, vector<1x64x4xf32>,
    %55 = arith.truncf %10 : vector<64x4xf32> to vector<64x4xbf16>
    %c3_53 = arith.constant 3 : index
    %c0_54 = arith.constant 0 : index
    %c0_55 = arith.constant 0 : index
    %56 = vector.load %arg3[%c3_53, %c0_54, %c0_55] : memref<4x4x4xbf16, #tpu.memory_space<vmem>>, vector<1x4x4xbf16>
    %57 = vector.shape_cast %56 : vector<1x4x4xbf16> to vector<4x4xbf16>
    %cst_56 = arith.constant dense<0.000000e+00> : vector<64x4xf32>
    %58 = tpu.matmul %55, %57, %cst_56 {dimension_numbers = #tpu.dot_dimension_numbers<[1], [0], [0], [1], [0, 0, 1, 1], [], []>} : vector<64x4xbf16>, vector<4x4xbf16>, vector<64x4xf32> -> vector<64x4xf32>
    %59 = arith.addf %45, %58 : vector<64x4xf32>
    %c3_57 = arith.constant 3 : index
    %c0_58 = arith.constant 0 : index
    %c0_59 = arith.constant 0 : index
    %60 = vector.load %arg10[%c3_57, %c0_58, %c0_59] : memref<4x96x8xf32, #tpu.memory_space<vmem>>, vector<1x16x8xf32>
    %61 = vector.shape_cast %60 : vector<1x16x8xf32> to vector<16x8xf32>
    %62 = vector.shape_cast %11 : vector<16x8xf32> to vector<1x16x8xf32>
    tpu.vector_store %arg10[%c3_57, %c0_58, %c0_59], %62 {strides = array<i32>} : memref<4x96x8xf32, #tpu.memory_space<vmem>>, vector<1x16x8xf32>,
    %c3_60 = arith.constant 3 : index
    %c80_61 = arith.constant 80 : index
    %c0_62 = arith.constant 0 : index
    %63 = vector.load %arg10[%c3_60, %c80_61, %c0_62] : memref<4x96x8xf32, #tpu.memory_space<vmem>>, vector<1x16x8xf32>
    %64 = vector.shape_cast %63 : vector<1x16x8xf32> to vector<16x8xf32>
    %65 = vector.shape_cast %11 : vector<16x8xf32> to vector<1x16x8xf32>
    tpu.vector_store %arg10[%c3_60, %c80_61, %c0_62], %65 {strides = array<i32>} : memref<4x96x8xf32, #tpu.memory_space<vmem>>, vector<1x16x8xf32>,
    %c3_63 = arith.constant 3 : index
    %c16_64 = arith.constant 16 : index
    %c0_65 = arith.constant 0 : index
    %66 = vector.load %arg10[%c3_63, %c16_64, %c0_65] : memref<4x96x8xf32, #tpu.memory_space<vmem>>, vector<1x64x4xf32>
    %67 = vector.shape_cast %66 : vector<1x64x4xf32> to vector<64x4xf32>
    %68 = vector.shape_cast %10 : vector<64x4xf32> to vector<1x64x4xf32>
    tpu.vector_store %arg10[%c3_63, %c16_64, %c0_65], %68 {strides = array<i32>} : memref<4x96x8xf32, #tpu.memory_space<vmem>>, vector<1x64x4xf32>,
    %cst_66 = arith.constant 0.000000e+00 : f32
    %69 = vector.broadcast %cst_66 : f32 to vector<64x4xf32>
    %70 = arith.maximumf %59, %69 : vector<64x4xf32>
    %c0_67 = arith.constant 0 : index
    %c0_68 = arith.constant 0 : index
    %71 = vector.load %arg5[%c0_67, %c0_68] : memref<4x4xbf16, #tpu.memory_space<vmem>>, vector<4x4xbf16>
    %cst_69 = arith.constant dense<0.000000e+00> : vector<64x4xf32>
    %72 = tpu.matmul %2, %71, %cst_69 {dimension_numbers = #tpu.dot_dimension_numbers<[1], [0], [0], [1], [0, 0, 1, 1], [], []>} : vector<64x4xbf16>, vector<4x4xbf16>, vector<64x4xf32> -> vector<64x4xf32>
    %73 = arith.truncf %70 : vector<64x4xf32> to vector<64x4xbf16>
    %c0_70 = arith.constant 0 : index
    %c0_71 = arith.constant 0 : index
    %74 = vector.load %arg6[%c0_70, %c0_71] : memref<4x4xbf16, #tpu.memory_space<vmem>>, vector<4x4xbf16>
    %cst_72 = arith.constant dense<0.000000e+00> : vector<64x4xf32>
    %75 = tpu.matmul %73, %74, %cst_72 {dimension_numbers = #tpu.dot_dimension_numbers<[1], [0], [0], [1], [0, 0, 1, 1], [], []>} : vector<64x4xbf16>, vector<4x4xbf16>, vector<64x4xf32> -> vector<64x4xf32>
    %76 = arith.addf %72, %75 : vector<64x4xf32>
    %cst_73 = arith.constant 0.000000e+00 : f32
    %77 = vector.broadcast %cst_73 : f32 to vector<64x4xf32>
    %78 = arith.maximumf %76, %77 : vector<64x4xf32>
    %79 = arith.addf %78, %1 : vector<64x4xf32>
    %c0_74 = arith.constant 0 : index
    %c0_75 = arith.constant 0 : index
    %c0_76 = arith.constant 0 : index
    %80 = vector.load %arg8[%c0_74, %c0_75, %c0_76] : memref<1x64x4xf32, #tpu.memory_space<vmem>>, vector<1x64x4xf32>
    %81 = vector.shape_cast %80 : vector<1x64x4xf32> to vector<64x4xf32>
    %82 = vector.shape_cast %79 : vector<64x4xf32> to vector<1x64x4xf32>
    tpu.vector_store %arg8[%c0_74, %c0_75, %c0_76], %82 {strides = array<i32>} : memref<1x64x4xf32, #tpu.memory_space<vmem>>, vector<1x64x4xf32>,
    %c0_77 = arith.constant 0 : index
    %c0_78 = arith.constant 0 : index
    %c0_79 = arith.constant 0 : index
    %83 = vector.load %arg4[%c0_77, %c0_78, %c0_79] : memref<4x4x4xbf16, #tpu.memory_space<vmem>>, vector<1x4x4xbf16>
    %84 = vector.shape_cast %83 : vector<1x4x4xbf16> to vector<4x4xbf16>
    %cst_80 = arith.constant dense<0.000000e+00> : vector<64x4xf32>
    %85 = tpu.matmul %2, %84, %cst_80 {dimension_numbers = #tpu.dot_dimension_numbers<[1], [0], [0], [1], [0, 0, 1, 1], [], []>} : vector<64x4xbf16>, vector<4x4xbf16>, vector<64x4xf32> -> vector<64x4xf32>
    %c0_81 = arith.constant 0 : index
    %c16_82 = arith.constant 16 : index
    %c4 = arith.constant 4 : index
    %86 = vector.load %arg10[%c0_81, %c16_82, %c4] : memref<4x96x8xf32, #tpu.memory_space<vmem>>, vector<1x64x4xf32>
    %87 = vector.shape_cast %86 : vector<1x64x4xf32> to vector<64x4xf32>
    %88 = vector.shape_cast %85 : vector<64x4xf32> to vector<1x64x4xf32>
    tpu.vector_store %arg10[%c0_81, %c16_82, %c4], %88 {strides = array<i32>} : memref<4x96x8xf32, #tpu.memory_space<vmem>>, vector<1x64x4xf32>,
    %c1_83 = arith.constant 1 : index
    %c0_84 = arith.constant 0 : index
    %c0_85 = arith.constant 0 : index
    %89 = vector.load %arg4[%c1_83, %c0_84, %c0_85] : memref<4x4x4xbf16, #tpu.memory_space<vmem>>, vector<1x4x4xbf16>
    %90 = vector.shape_cast %89 : vector<1x4x4xbf16> to vector<4x4xbf16>
    %cst_86 = arith.constant dense<0.000000e+00> : vector<64x4xf32>
    %91 = tpu.matmul %2, %90, %cst_86 {dimension_numbers = #tpu.dot_dimension_numbers<[1], [0], [0], [1], [0, 0, 1, 1], [], []>} : vector<64x4xbf16>, vector<4x4xbf16>, vector<64x4xf32> -> vector<64x4xf32>
    %c1_87 = arith.constant 1 : index
    %c16_88 = arith.constant 16 : index
    %c4_89 = arith.constant 4 : index
    %92 = vector.load %arg10[%c1_87, %c16_88, %c4_89] : memref<4x96x8xf32, #tpu.memory_space<vmem>>, vector<1x64x4xf32>
    %93 = vector.shape_cast %92 : vector<1x64x4xf32> to vector<64x4xf32>
    %94 = vector.shape_cast %91 : vector<64x4xf32> to vector<1x64x4xf32>
    tpu.vector_store %arg10[%c1_87, %c16_88, %c4_89], %94 {strides = array<i32>} : memref<4x96x8xf32, #tpu.memory_space<vmem>>, vector<1x64x4xf32>,
    %c2_90 = arith.constant 2 : index
    %c0_91 = arith.constant 0 : index
    %c0_92 = arith.constant 0 : index
    %95 = vector.load %arg4[%c2_90, %c0_91, %c0_92] : memref<4x4x4xbf16, #tpu.memory_space<vmem>>, vector<1x4x4xbf16>
    %96 = vector.shape_cast %95 : vector<1x4x4xbf16> to vector<4x4xbf16>
    %cst_93 = arith.constant dense<0.000000e+00> : vector<64x4xf32>
    %97 = tpu.matmul %2, %96, %cst_93 {dimension_numbers = #tpu.dot_dimension_numbers<[1], [0], [0], [1], [0, 0, 1, 1], [], []>} : vector<64x4xbf16>, vector<4x4xbf16>, vector<64x4xf32> -> vector<64x4xf32>
    %c2_94 = arith.constant 2 : index
    %c16_95 = arith.constant 16 : index
    %c4_96 = arith.constant 4 : index
    %98 = vector.load %arg10[%c2_94, %c16_95, %c4_96] : memref<4x96x8xf32, #tpu.memory_space<vmem>>, vector<1x64x4xf32>
    %99 = vector.shape_cast %98 : vector<1x64x4xf32> to vector<64x4xf32>
    %100 = vector.shape_cast %97 : vector<64x4xf32> to vector<1x64x4xf32>
    tpu.vector_store %arg10[%c2_94, %c16_95, %c4_96], %100 {strides = array<i32>} : memref<4x96x8xf32, #tpu.memory_space<vmem>>, vector<1x64x4xf32>,
    %c3_97 = arith.constant 3 : index
    %c0_98 = arith.constant 0 : index
    %c0_99 = arith.constant 0 : index
    %101 = vector.load %arg4[%c3_97, %c0_98, %c0_99] : memref<4x4x4xbf16, #tpu.memory_space<vmem>>, vector<1x4x4xbf16>
    %102 = vector.shape_cast %101 : vector<1x4x4xbf16> to vector<4x4xbf16>
    %cst_100 = arith.constant dense<0.000000e+00> : vector<64x4xf32>
    %103 = tpu.matmul %2, %102, %cst_100 {dimension_numbers = #tpu.dot_dimension_numbers<[1], [0], [0], [1], [0, 0, 1, 1], [], []>} : vector<64x4xbf16>, vector<4x4xbf16>, vector<64x4xf32> -> vector<64x4xf32>
    %c3_101 = arith.constant 3 : index
    %c16_102 = arith.constant 16 : index
    %c4_103 = arith.constant 4 : index
    %104 = vector.load %arg10[%c3_101, %c16_102, %c4_103] : memref<4x96x8xf32, #tpu.memory_space<vmem>>, vector<1x64x4xf32>
    %105 = vector.shape_cast %104 : vector<1x64x4xf32> to vector<64x4xf32>
    %106 = vector.shape_cast %103 : vector<64x4xf32> to vector<1x64x4xf32>
    tpu.vector_store %arg10[%c3_101, %c16_102, %c4_103], %106 {strides = array<i32>} : memref<4x96x8xf32, #tpu.memory_space<vmem>>, vector<1x64x4xf32>,
    %107 = tpu.iota {dimensions = array<i32: 0>} : vector<64x1xi32>
    %c8_i32 = arith.constant 8 : i32
    %c0_i32 = arith.constant 0 : i32
    %108 = arith.cmpi eq, %c8_i32, %c0_i32 : i32
    %c1_i32 = arith.constant 1 : i32
    %109 = arith.select %108, %c1_i32, %c8_i32 : i32
    %110 = vector.broadcast %109 : i32 to vector<64x1xi32>
    %111 = arith.remsi %107, %110 : vector<64x1xi32>
    %c0_i32_104 = arith.constant 0 : i32
    %112 = vector.broadcast %c0_i32_104 : i32 to vector<64x1xi32>
    %113 = arith.cmpi ne, %111, %112 : vector<64x1xi32>
    %c0_i32_105 = arith.constant 0 : i32
    %114 = vector.broadcast %c0_i32_105 : i32 to vector<64x1xi32>
    %115 = arith.cmpi slt, %111, %114 : vector<64x1xi32>
    %c0_i32_106 = arith.constant 0 : i32
    %116 = arith.cmpi slt, %109, %c0_i32_106 : i32
    %117 = vector.broadcast %116 : i1 to vector<64x1xi1>
    %118 = vector.broadcast %117 : vector<64x1xi1> to vector<64x1xi1>
    %119 = arith.xori %115, %118 : vector<64x1xi1>
    %120 = arith.andi %119, %113 : vector<64x1xi1>
    %121 = vector.broadcast %109 : i32 to vector<64x1xi32>
    %122 = arith.addi %111, %121 : vector<64x1xi32>
    %123 = arith.select %120, %122, %111 : vector<64x1xi1>, vector<64x1xi32>
    %c1_i32_107 = arith.constant 1 : i32
    %124 = vector.broadcast %c1_i32_107 : i32 to vector<64x1xi32>
    %125 = arith.cmpi sge, %123, %124 : vector<64x1xi32>
    %126 = arith.extui %125 : vector<64x1xi1> to vector<64x1xi32>
    %127 = arith.sitofp %126 : vector<64x1xi32> to vector<64x1xf32>
    %c6_i32 = arith.constant 6 : i32
    %128 = vector.broadcast %c6_i32 : i32 to vector<64x1xi32>
    %129 = arith.cmpi sle, %123, %128 : vector<64x1xi32>
    %130 = arith.extui %129 : vector<64x1xi1> to vector<64x1xi32>
    %131 = arith.sitofp %130 : vector<64x1xi32> to vector<64x1xf32>
    %cst_108 = arith.constant 0.000000e+00 : f32
    %132 = vector.broadcast %cst_108 : f32 to vector<64x4xf32>
    %cst_109 = arith.constant 0.000000e+00 : f32
    %133 = vector.broadcast %cst_109 : f32 to vector<64x4xf32>
    %cst_110 = arith.constant 0.000000e+00 : f32
    %134 = vector.broadcast %cst_110 : f32 to vector<64x4xf32>
    %c0_111 = arith.constant 0 : index
    %c7 = arith.constant 7 : index
    %c0_112 = arith.constant 0 : index
    %135 = vector.load %arg10[%c0_111, %c7, %c0_112] : memref<4x96x8xf32, #tpu.memory_space<vmem>>, vector<1x64x8xf32>
    %136 = vector.shape_cast %135 : vector<1x64x8xf32> to vector<64x8xf32>
    %137 = arith.truncf %136 : vector<64x8xf32> to vector<64x8xbf16>
    %c0_113 = arith.constant 0 : index
    %c0_114 = arith.constant 0 : index
    %c0_115 = arith.constant 0 : index
    %138 = vector.load %arg7[%c0_113, %c0_114, %c0_115] : memref<9x8x4xbf16, #tpu.memory_space<vmem>>, vector<1x8x4xbf16>
    %139 = vector.shape_cast %138 : vector<1x8x4xbf16> to vector<8x4xbf16>
    %cst_116 = arith.constant dense<0.000000e+00> : vector<64x4xf32>
    %140 = tpu.matmul %137, %139, %cst_116 {dimension_numbers = #tpu.dot_dimension_numbers<[1], [0], [0], [1], [0, 0, 1, 1], [], []>} : vector<64x8xbf16>, vector<8x4xbf16>, vector<64x4xf32> -> vector<64x4xf32>
    %141 = arith.addf %132, %140 : vector<64x4xf32>
    %c0_117 = arith.constant 0 : index
    %c8 = arith.constant 8 : index
    %c0_118 = arith.constant 0 : index
    %142 = vector.load %arg10[%c0_117, %c8, %c0_118] : memref<4x96x8xf32, #tpu.memory_space<vmem>>, vector<1x64x8xf32>
    %143 = vector.shape_cast %142 : vector<1x64x8xf32> to vector<64x8xf32>
    %144 = arith.truncf %143 : vector<64x8xf32> to vector<64x8xbf16>
    %c1_119 = arith.constant 1 : index
    %c0_120 = arith.constant 0 : index
    %c0_121 = arith.constant 0 : index
    %145 = vector.load %arg7[%c1_119, %c0_120, %c0_121] : memref<9x8x4xbf16, #tpu.memory_space<vmem>>, vector<1x8x4xbf16>
    %146 = vector.shape_cast %145 : vector<1x8x4xbf16> to vector<8x4xbf16>
    %cst_122 = arith.constant dense<0.000000e+00> : vector<64x4xf32>
    %147 = tpu.matmul %144, %146, %cst_122 {dimension_numbers = #tpu.dot_dimension_numbers<[1], [0], [0], [1], [0, 0, 1, 1], [], []>} : vector<64x8xbf16>, vector<8x4xbf16>, vector<64x4xf32> -> vector<64x4xf32>
    %148 = arith.addf %133, %147 : vector<64x4xf32>
    %c0_123 = arith.constant 0 : index
    %c9 = arith.constant 9 : index
    %c0_124 = arith.constant 0 : index
    %149 = vector.load %arg10[%c0_123, %c9, %c0_124] : memref<4x96x8xf32, #tpu.memory_space<vmem>>, vector<1x64x8xf32>
    %150 = vector.shape_cast %149 : vector<1x64x8xf32> to vector<64x8xf32>
    %151 = arith.truncf %150 : vector<64x8xf32> to vector<64x8xbf16>
    %c2_125 = arith.constant 2 : index
    %c0_126 = arith.constant 0 : index
    %c0_127 = arith.constant 0 : index
    %152 = vector.load %arg7[%c2_125, %c0_126, %c0_127] : memref<9x8x4xbf16, #tpu.memory_space<vmem>>, vector<1x8x4xbf16>
    %153 = vector.shape_cast %152 : vector<1x8x4xbf16> to vector<8x4xbf16>
    %cst_128 = arith.constant dense<0.000000e+00> : vector<64x4xf32>
    %154 = tpu.matmul %151, %153, %cst_128 {dimension_numbers = #tpu.dot_dimension_numbers<[1], [0], [0], [1], [0, 0, 1, 1], [], []>} : vector<64x8xbf16>, vector<8x4xbf16>, vector<64x4xf32> -> vector<64x4xf32>
    %155 = arith.addf %134, %154 : vector<64x4xf32>
    %c0_129 = arith.constant 0 : index
    %c15 = arith.constant 15 : index
    %c0_130 = arith.constant 0 : index
    %156 = vector.load %arg10[%c0_129, %c15, %c0_130] : memref<4x96x8xf32, #tpu.memory_space<vmem>>, vector<1x64x8xf32>
    %157 = vector.shape_cast %156 : vector<1x64x8xf32> to vector<64x8xf32>
    %158 = arith.truncf %157 : vector<64x8xf32> to vector<64x8xbf16>
    %c3_131 = arith.constant 3 : index
    %c0_132 = arith.constant 0 : index
    %c0_133 = arith.constant 0 : index
    %159 = vector.load %arg7[%c3_131, %c0_132, %c0_133] : memref<9x8x4xbf16, #tpu.memory_space<vmem>>, vector<1x8x4xbf16>
    %160 = vector.shape_cast %159 : vector<1x8x4xbf16> to vector<8x4xbf16>
    %cst_134 = arith.constant dense<0.000000e+00> : vector<64x4xf32>
    %161 = tpu.matmul %158, %160, %cst_134 {dimension_numbers = #tpu.dot_dimension_numbers<[1], [0], [0], [1], [0, 0, 1, 1], [], []>} : vector<64x8xbf16>, vector<8x4xbf16>, vector<64x4xf32> -> vector<64x4xf32>
    %162 = arith.addf %141, %161 : vector<64x4xf32>
    %c0_135 = arith.constant 0 : index
    %c16_136 = arith.constant 16 : index
    %c0_137 = arith.constant 0 : index
    %163 = vector.load %arg10[%c0_135, %c16_136, %c0_137] : memref<4x96x8xf32, #tpu.memory_space<vmem>>, vector<1x64x8xf32>
    %164 = vector.shape_cast %163 : vector<1x64x8xf32> to vector<64x8xf32>
    %165 = arith.truncf %164 : vector<64x8xf32> to vector<64x8xbf16>
    %c4_138 = arith.constant 4 : index
    %c0_139 = arith.constant 0 : index
    %c0_140 = arith.constant 0 : index
    %166 = vector.load %arg7[%c4_138, %c0_139, %c0_140] : memref<9x8x4xbf16, #tpu.memory_space<vmem>>, vector<1x8x4xbf16>
    %167 = vector.shape_cast %166 : vector<1x8x4xbf16> to vector<8x4xbf16>
    %cst_141 = arith.constant dense<0.000000e+00> : vector<64x4xf32>
    %168 = tpu.matmul %165, %167, %cst_141 {dimension_numbers = #tpu.dot_dimension_numbers<[1], [0], [0], [1], [0, 0, 1, 1], [], []>} : vector<64x8xbf16>, vector<8x4xbf16>, vector<64x4xf32> -> vector<64x4xf32>
    %169 = arith.addf %148, %168 : vector<64x4xf32>
    %c0_142 = arith.constant 0 : index
    %c17 = arith.constant 17 : index
    %c0_143 = arith.constant 0 : index
    %170 = vector.load %arg10[%c0_142, %c17, %c0_143] : memref<4x96x8xf32, #tpu.memory_space<vmem>>, vector<1x64x8xf32>
    %171 = vector.shape_cast %170 : vector<1x64x8xf32> to vector<64x8xf32>
    %172 = arith.truncf %171 : vector<64x8xf32> to vector<64x8xbf16>
    %c5 = arith.constant 5 : index
    %c0_144 = arith.constant 0 : index
    %c0_145 = arith.constant 0 : index
    %173 = vector.load %arg7[%c5, %c0_144, %c0_145] : memref<9x8x4xbf16, #tpu.memory_space<vmem>>, vector<1x8x4xbf16>
    %174 = vector.shape_cast %173 : vector<1x8x4xbf16> to vector<8x4xbf16>
    %cst_146 = arith.constant dense<0.000000e+00> : vector<64x4xf32>
    %175 = tpu.matmul %172, %174, %cst_146 {dimension_numbers = #tpu.dot_dimension_numbers<[1], [0], [0], [1], [0, 0, 1, 1], [], []>} : vector<64x8xbf16>, vector<8x4xbf16>, vector<64x4xf32> -> vector<64x4xf32>
    %176 = arith.addf %155, %175 : vector<64x4xf32>
    %c0_147 = arith.constant 0 : index
    %c23 = arith.constant 23 : index
    %c0_148 = arith.constant 0 : index
    %177 = vector.load %arg10[%c0_147, %c23, %c0_148] : memref<4x96x8xf32, #tpu.memory_space<vmem>>, vector<1x64x8xf32>
    %178 = vector.shape_cast %177 : vector<1x64x8xf32> to vector<64x8xf32>
    %179 = arith.truncf %178 : vector<64x8xf32> to vector<64x8xbf16>
    %c6 = arith.constant 6 : index
    %c0_149 = arith.constant 0 : index
    %c0_150 = arith.constant 0 : index
    %180 = vector.load %arg7[%c6, %c0_149, %c0_150] : memref<9x8x4xbf16, #tpu.memory_space<vmem>>, vector<1x8x4xbf16>
    %181 = vector.shape_cast %180 : vector<1x8x4xbf16> to vector<8x4xbf16>
    %cst_151 = arith.constant dense<0.000000e+00> : vector<64x4xf32>
    %182 = tpu.matmul %179, %181, %cst_151 {dimension_numbers = #tpu.dot_dimension_numbers<[1], [0], [0], [1], [0, 0, 1, 1], [], []>} : vector<64x8xbf16>, vector<8x4xbf16>, vector<64x4xf32> -> vector<64x4xf32>
    %183 = arith.addf %162, %182 : vector<64x4xf32>
    %c0_152 = arith.constant 0 : index
    %c24 = arith.constant 24 : index
    %c0_153 = arith.constant 0 : index
    %184 = vector.load %arg10[%c0_152, %c24, %c0_153] : memref<4x96x8xf32, #tpu.memory_space<vmem>>, vector<1x64x8xf32>
    %185 = vector.shape_cast %184 : vector<1x64x8xf32> to vector<64x8xf32>
    %186 = arith.truncf %185 : vector<64x8xf32> to vector<64x8xbf16>
    %c7_154 = arith.constant 7 : index
    %c0_155 = arith.constant 0 : index
    %c0_156 = arith.constant 0 : index
    %187 = vector.load %arg7[%c7_154, %c0_155, %c0_156] : memref<9x8x4xbf16, #tpu.memory_space<vmem>>, vector<1x8x4xbf16>
    %188 = vector.shape_cast %187 : vector<1x8x4xbf16> to vector<8x4xbf16>
    %cst_157 = arith.constant dense<0.000000e+00> : vector<64x4xf32>
    %189 = tpu.matmul %186, %188, %cst_157 {dimension_numbers = #tpu.dot_dimension_numbers<[1], [0], [0], [1], [0, 0, 1, 1], [], []>} : vector<64x8xbf16>, vector<8x4xbf16>, vector<64x4xf32> -> vector<64x4xf32>
    %190 = arith.addf %169, %189 : vector<64x4xf32>
    %c0_158 = arith.constant 0 : index
    %c25 = arith.constant 25 : index
    %c0_159 = arith.constant 0 : index
    %191 = vector.load %arg10[%c0_158, %c25, %c0_159] : memref<4x96x8xf32, #tpu.memory_space<vmem>>, vector<1x64x8xf32>
    %192 = vector.shape_cast %191 : vector<1x64x8xf32> to vector<64x8xf32>
    %193 = arith.truncf %192 : vector<64x8xf32> to vector<64x8xbf16>
    %c8_160 = arith.constant 8 : index
    %c0_161 = arith.constant 0 : index
    %c0_162 = arith.constant 0 : index
    %194 = vector.load %arg7[%c8_160, %c0_161, %c0_162] : memref<9x8x4xbf16, #tpu.memory_space<vmem>>, vector<1x8x4xbf16>
    %195 = vector.shape_cast %194 : vector<1x8x4xbf16> to vector<8x4xbf16>
    %cst_163 = arith.constant dense<0.000000e+00> : vector<64x4xf32>
    %196 = tpu.matmul %193, %195, %cst_163 {dimension_numbers = #tpu.dot_dimension_numbers<[1], [0], [0], [1], [0, 0, 1, 1], [], []>} : vector<64x8xbf16>, vector<8x4xbf16>, vector<64x4xf32> -> vector<64x4xf32>
    %197 = arith.addf %176, %196 : vector<64x4xf32>
    %198 = vector.broadcast %127 : vector<64x1xf32> to vector<64x4xf32>
    %199 = arith.mulf %198, %183 : vector<64x4xf32>
    %200 = arith.addf %190, %199 : vector<64x4xf32>
    %201 = vector.broadcast %131 : vector<64x1xf32> to vector<64x4xf32>
    %202 = arith.mulf %201, %197 : vector<64x4xf32>
    %203 = arith.addf %200, %202 : vector<64x4xf32>
    %cst_164 = arith.constant 0.000000e+00 : f32
    %204 = vector.broadcast %cst_164 : f32 to vector<64x4xf32>
    %205 = arith.maximumf %203, %204 : vector<64x4xf32>
    %206 = arith.addf %205, %4 : vector<64x4xf32>
    %c0_165 = arith.constant 0 : index
    %c0_166 = arith.constant 0 : index
    %c0_167 = arith.constant 0 : index
    %c0_168 = arith.constant 0 : index
    %207 = vector.load %arg9[%c0_165, %c0_166, %c0_167, %c0_168] : memref<1x4x64x4xf32, #tpu.memory_space<vmem>>, vector<1x1x64x4xf32>
    %208 = vector.shape_cast %207 : vector<1x1x64x4xf32> to vector<64x4xf32>
    %209 = vector.shape_cast %206 : vector<64x4xf32> to vector<1x1x64x4xf32>
    tpu.vector_store %arg9[%c0_165, %c0_166, %c0_167, %c0_168], %209 {strides = array<i32>} : memref<1x4x64x4xf32, #tpu.memory_space<vmem>>, vector<1x1x64x4xf32>,
    %cst_169 = arith.constant 0.000000e+00 : f32
    %210 = vector.broadcast %cst_169 : f32 to vector<64x4xf32>
    %cst_170 = arith.constant 0.000000e+00 : f32
    %211 = vector.broadcast %cst_170 : f32 to vector<64x4xf32>
    %cst_171 = arith.constant 0.000000e+00 : f32
    %212 = vector.broadcast %cst_171 : f32 to vector<64x4xf32>
    %c1_172 = arith.constant 1 : index
    %c7_173 = arith.constant 7 : index
    %c0_174 = arith.constant 0 : index
    %213 = vector.load %arg10[%c1_172, %c7_173, %c0_174] : memref<4x96x8xf32, #tpu.memory_space<vmem>>, vector<1x64x8xf32>
    %214 = vector.shape_cast %213 : vector<1x64x8xf32> to vector<64x8xf32>
    %215 = arith.truncf %214 : vector<64x8xf32> to vector<64x8xbf16>
    %c0_175 = arith.constant 0 : index
    %c0_176 = arith.constant 0 : index
    %c0_177 = arith.constant 0 : index
    %216 = vector.load %arg7[%c0_175, %c0_176, %c0_177] : memref<9x8x4xbf16, #tpu.memory_space<vmem>>, vector<1x8x4xbf16>
    %217 = vector.shape_cast %216 : vector<1x8x4xbf16> to vector<8x4xbf16>
    %cst_178 = arith.constant dense<0.000000e+00> : vector<64x4xf32>
    %218 = tpu.matmul %215, %217, %cst_178 {dimension_numbers = #tpu.dot_dimension_numbers<[1], [0], [0], [1], [0, 0, 1, 1], [], []>} : vector<64x8xbf16>, vector<8x4xbf16>, vector<64x4xf32> -> vector<64x4xf32>
    %219 = arith.addf %210, %218 : vector<64x4xf32>
    %c1_179 = arith.constant 1 : index
    %c8_180 = arith.constant 8 : index
    %c0_181 = arith.constant 0 : index
    %220 = vector.load %arg10[%c1_179, %c8_180, %c0_181] : memref<4x96x8xf32, #tpu.memory_space<vmem>>, vector<1x64x8xf32>
    %221 = vector.shape_cast %220 : vector<1x64x8xf32> to vector<64x8xf32>
    %222 = arith.truncf %221 : vector<64x8xf32> to vector<64x8xbf16>
    %c1_182 = arith.constant 1 : index
    %c0_183 = arith.constant 0 : index
    %c0_184 = arith.constant 0 : index
    %223 = vector.load %arg7[%c1_182, %c0_183, %c0_184] : memref<9x8x4xbf16, #tpu.memory_space<vmem>>, vector<1x8x4xbf16>
    %224 = vector.shape_cast %223 : vector<1x8x4xbf16> to vector<8x4xbf16>
    %cst_185 = arith.constant dense<0.000000e+00> : vector<64x4xf32>
    %225 = tpu.matmul %222, %224, %cst_185 {dimension_numbers = #tpu.dot_dimension_numbers<[1], [0], [0], [1], [0, 0, 1, 1], [], []>} : vector<64x8xbf16>, vector<8x4xbf16>, vector<64x4xf32> -> vector<64x4xf32>
    %226 = arith.addf %211, %225 : vector<64x4xf32>
    %c1_186 = arith.constant 1 : index
    %c9_187 = arith.constant 9 : index
    %c0_188 = arith.constant 0 : index
    %227 = vector.load %arg10[%c1_186, %c9_187, %c0_188] : memref<4x96x8xf32, #tpu.memory_space<vmem>>, vector<1x64x8xf32>
    %228 = vector.shape_cast %227 : vector<1x64x8xf32> to vector<64x8xf32>
    %229 = arith.truncf %228 : vector<64x8xf32> to vector<64x8xbf16>
    %c2_189 = arith.constant 2 : index
    %c0_190 = arith.constant 0 : index
    %c0_191 = arith.constant 0 : index
    %230 = vector.load %arg7[%c2_189, %c0_190, %c0_191] : memref<9x8x4xbf16, #tpu.memory_space<vmem>>, vector<1x8x4xbf16>
    %231 = vector.shape_cast %230 : vector<1x8x4xbf16> to vector<8x4xbf16>
    %cst_192 = arith.constant dense<0.000000e+00> : vector<64x4xf32>
    %232 = tpu.matmul %229, %231, %cst_192 {dimension_numbers = #tpu.dot_dimension_numbers<[1], [0], [0], [1], [0, 0, 1, 1], [], []>} : vector<64x8xbf16>, vector<8x4xbf16>, vector<64x4xf32> -> vector<64x4xf32>
    %233 = arith.addf %212, %232 : vector<64x4xf32>
    %c1_193 = arith.constant 1 : index
    %c15_194 = arith.constant 15 : index
    %c0_195 = arith.constant 0 : index
    %234 = vector.load %arg10[%c1_193, %c15_194, %c0_195] : memref<4x96x8xf32, #tpu.memory_space<vmem>>, vector<1x64x8xf32>
    %235 = vector.shape_cast %234 : vector<1x64x8xf32> to vector<64x8xf32>
    %236 = arith.truncf %235 : vector<64x8xf32> to vector<64x8xbf16>
    %c3_196 = arith.constant 3 : index
    %c0_197 = arith.constant 0 : index
    %c0_198 = arith.constant 0 : index
    %237 = vector.load %arg7[%c3_196, %c0_197, %c0_198] : memref<9x8x4xbf16, #tpu.memory_space<vmem>>, vector<1x8x4xbf16>
    %238 = vector.shape_cast %237 : vector<1x8x4xbf16> to vector<8x4xbf16>
    %cst_199 = arith.constant dense<0.000000e+00> : vector<64x4xf32>
    %239 = tpu.matmul %236, %238, %cst_199 {dimension_numbers = #tpu.dot_dimension_numbers<[1], [0], [0], [1], [0, 0, 1, 1], [], []>} : vector<64x8xbf16>, vector<8x4xbf16>, vector<64x4xf32> -> vector<64x4xf32>
    %240 = arith.addf %219, %239 : vector<64x4xf32>
    %c1_200 = arith.constant 1 : index
    %c16_201 = arith.constant 16 : index
    %c0_202 = arith.constant 0 : index
    %241 = vector.load %arg10[%c1_200, %c16_201, %c0_202] : memref<4x96x8xf32, #tpu.memory_space<vmem>>, vector<1x64x8xf32>
    %242 = vector.shape_cast %241 : vector<1x64x8xf32> to vector<64x8xf32>
    %243 = arith.truncf %242 : vector<64x8xf32> to vector<64x8xbf16>
    %c4_203 = arith.constant 4 : index
    %c0_204 = arith.constant 0 : index
    %c0_205 = arith.constant 0 : index
    %244 = vector.load %arg7[%c4_203, %c0_204, %c0_205] : memref<9x8x4xbf16, #tpu.memory_space<vmem>>, vector<1x8x4xbf16>
    %245 = vector.shape_cast %244 : vector<1x8x4xbf16> to vector<8x4xbf16>
    %cst_206 = arith.constant dense<0.000000e+00> : vector<64x4xf32>
    %246 = tpu.matmul %243, %245, %cst_206 {dimension_numbers = #tpu.dot_dimension_numbers<[1], [0], [0], [1], [0, 0, 1, 1], [], []>} : vector<64x8xbf16>, vector<8x4xbf16>, vector<64x4xf32> -> vector<64x4xf32>
    %247 = arith.addf %226, %246 : vector<64x4xf32>
    %c1_207 = arith.constant 1 : index
    %c17_208 = arith.constant 17 : index
    %c0_209 = arith.constant 0 : index
    %248 = vector.load %arg10[%c1_207, %c17_208, %c0_209] : memref<4x96x8xf32, #tpu.memory_space<vmem>>, vector<1x64x8xf32>
    %249 = vector.shape_cast %248 : vector<1x64x8xf32> to vector<64x8xf32>
    %250 = arith.truncf %249 : vector<64x8xf32> to vector<64x8xbf16>
    %c5_210 = arith.constant 5 : index
    %c0_211 = arith.constant 0 : index
    %c0_212 = arith.constant 0 : index
    %251 = vector.load %arg7[%c5_210, %c0_211, %c0_212] : memref<9x8x4xbf16, #tpu.memory_space<vmem>>, vector<1x8x4xbf16>
    %252 = vector.shape_cast %251 : vector<1x8x4xbf16> to vector<8x4xbf16>
    %cst_213 = arith.constant dense<0.000000e+00> : vector<64x4xf32>
    %253 = tpu.matmul %250, %252, %cst_213 {dimension_numbers = #tpu.dot_dimension_numbers<[1], [0], [0], [1], [0, 0, 1, 1], [], []>} : vector<64x8xbf16>, vector<8x4xbf16>, vector<64x4xf32> -> vector<64x4xf32>
    %254 = arith.addf %233, %253 : vector<64x4xf32>
    %c1_214 = arith.constant 1 : index
    %c23_215 = arith.constant 23 : index
    %c0_216 = arith.constant 0 : index
    %255 = vector.load %arg10[%c1_214, %c23_215, %c0_216] : memref<4x96x8xf32, #tpu.memory_space<vmem>>, vector<1x64x8xf32>
    %256 = vector.shape_cast %255 : vector<1x64x8xf32> to vector<64x8xf32>
    %257 = arith.truncf %256 : vector<64x8xf32> to vector<64x8xbf16>
    %c6_217 = arith.constant 6 : index
    %c0_218 = arith.constant 0 : index
    %c0_219 = arith.constant 0 : index
    %258 = vector.load %arg7[%c6_217, %c0_218, %c0_219] : memref<9x8x4xbf16, #tpu.memory_space<vmem>>, vector<1x8x4xbf16>
    %259 = vector.shape_cast %258 : vector<1x8x4xbf16> to vector<8x4xbf16>
    %cst_220 = arith.constant dense<0.000000e+00> : vector<64x4xf32>
    %260 = tpu.matmul %257, %259, %cst_220 {dimension_numbers = #tpu.dot_dimension_numbers<[1], [0], [0], [1], [0, 0, 1, 1], [], []>} : vector<64x8xbf16>, vector<8x4xbf16>, vector<64x4xf32> -> vector<64x4xf32>
    %261 = arith.addf %240, %260 : vector<64x4xf32>
    %c1_221 = arith.constant 1 : index
    %c24_222 = arith.constant 24 : index
    %c0_223 = arith.constant 0 : index
    %262 = vector.load %arg10[%c1_221, %c24_222, %c0_223] : memref<4x96x8xf32, #tpu.memory_space<vmem>>, vector<1x64x8xf32>
    %263 = vector.shape_cast %262 : vector<1x64x8xf32> to vector<64x8xf32>
    %264 = arith.truncf %263 : vector<64x8xf32> to vector<64x8xbf16>
    %c7_224 = arith.constant 7 : index
    %c0_225 = arith.constant 0 : index
    %c0_226 = arith.constant 0 : index
    %265 = vector.load %arg7[%c7_224, %c0_225, %c0_226] : memref<9x8x4xbf16, #tpu.memory_space<vmem>>, vector<1x8x4xbf16>
    %266 = vector.shape_cast %265 : vector<1x8x4xbf16> to vector<8x4xbf16>
    %cst_227 = arith.constant dense<0.000000e+00> : vector<64x4xf32>
    %267 = tpu.matmul %264, %266, %cst_227 {dimension_numbers = #tpu.dot_dimension_numbers<[1], [0], [0], [1], [0, 0, 1, 1], [], []>} : vector<64x8xbf16>, vector<8x4xbf16>, vector<64x4xf32> -> vector<64x4xf32>
    %268 = arith.addf %247, %267 : vector<64x4xf32>
    %c1_228 = arith.constant 1 : index
    %c25_229 = arith.constant 25 : index
    %c0_230 = arith.constant 0 : index
    %269 = vector.load %arg10[%c1_228, %c25_229, %c0_230] : memref<4x96x8xf32, #tpu.memory_space<vmem>>, vector<1x64x8xf32>
    %270 = vector.shape_cast %269 : vector<1x64x8xf32> to vector<64x8xf32>
    %271 = arith.truncf %270 : vector<64x8xf32> to vector<64x8xbf16>
    %c8_231 = arith.constant 8 : index
    %c0_232 = arith.constant 0 : index
    %c0_233 = arith.constant 0 : index
    %272 = vector.load %arg7[%c8_231, %c0_232, %c0_233] : memref<9x8x4xbf16, #tpu.memory_space<vmem>>, vector<1x8x4xbf16>
    %273 = vector.shape_cast %272 : vector<1x8x4xbf16> to vector<8x4xbf16>
    %cst_234 = arith.constant dense<0.000000e+00> : vector<64x4xf32>
    %274 = tpu.matmul %271, %273, %cst_234 {dimension_numbers = #tpu.dot_dimension_numbers<[1], [0], [0], [1], [0, 0, 1, 1], [], []>} : vector<64x8xbf16>, vector<8x4xbf16>, vector<64x4xf32> -> vector<64x4xf32>
    %275 = arith.addf %254, %274 : vector<64x4xf32>
    %276 = vector.broadcast %127 : vector<64x1xf32> to vector<64x4xf32>
    %277 = arith.mulf %276, %261 : vector<64x4xf32>
    %278 = arith.addf %268, %277 : vector<64x4xf32>
    %279 = vector.broadcast %131 : vector<64x1xf32> to vector<64x4xf32>
    %280 = arith.mulf %279, %275 : vector<64x4xf32>
    %281 = arith.addf %278, %280 : vector<64x4xf32>
    %cst_235 = arith.constant 0.000000e+00 : f32
    %282 = vector.broadcast %cst_235 : f32 to vector<64x4xf32>
    %283 = arith.maximumf %281, %282 : vector<64x4xf32>
    %284 = arith.addf %283, %6 : vector<64x4xf32>
    %c0_236 = arith.constant 0 : index
    %c1_237 = arith.constant 1 : index
    %c0_238 = arith.constant 0 : index
    %c0_239 = arith.constant 0 : index
    %285 = vector.load %arg9[%c0_236, %c1_237, %c0_238, %c0_239] : memref<1x4x64x4xf32, #tpu.memory_space<vmem>>, vector<1x1x64x4xf32>
    %286 = vector.shape_cast %285 : vector<1x1x64x4xf32> to vector<64x4xf32>
    %287 = vector.shape_cast %284 : vector<64x4xf32> to vector<1x1x64x4xf32>
    tpu.vector_store %arg9[%c0_236, %c1_237, %c0_238, %c0_239], %287 {strides = array<i32>} : memref<1x4x64x4xf32, #tpu.memory_space<vmem>>, vector<1x1x64x4xf32>,
    %cst_240 = arith.constant 0.000000e+00 : f32
    %288 = vector.broadcast %cst_240 : f32 to vector<64x4xf32>
    %cst_241 = arith.constant 0.000000e+00 : f32
    %289 = vector.broadcast %cst_241 : f32 to vector<64x4xf32>
    %cst_242 = arith.constant 0.000000e+00 : f32
    %290 = vector.broadcast %cst_242 : f32 to vector<64x4xf32>
    %c2_243 = arith.constant 2 : index
    %c7_244 = arith.constant 7 : index
    %c0_245 = arith.constant 0 : index
    %291 = vector.load %arg10[%c2_243, %c7_244, %c0_245] : memref<4x96x8xf32, #tpu.memory_space<vmem>>, vector<1x64x8xf32>
    %292 = vector.shape_cast %291 : vector<1x64x8xf32> to vector<64x8xf32>
    %293 = arith.truncf %292 : vector<64x8xf32> to vector<64x8xbf16>
    %c0_246 = arith.constant 0 : index
    %c0_247 = arith.constant 0 : index
    %c0_248 = arith.constant 0 : index
    %294 = vector.load %arg7[%c0_246, %c0_247, %c0_248] : memref<9x8x4xbf16, #tpu.memory_space<vmem>>, vector<1x8x4xbf16>
    %295 = vector.shape_cast %294 : vector<1x8x4xbf16> to vector<8x4xbf16>
    %cst_249 = arith.constant dense<0.000000e+00> : vector<64x4xf32>
    %296 = tpu.matmul %293, %295, %cst_249 {dimension_numbers = #tpu.dot_dimension_numbers<[1], [0], [0], [1], [0, 0, 1, 1], [], []>} : vector<64x8xbf16>, vector<8x4xbf16>, vector<64x4xf32> -> vector<64x4xf32>
    %297 = arith.addf %288, %296 : vector<64x4xf32>
    %c2_250 = arith.constant 2 : index
    %c8_251 = arith.constant 8 : index
    %c0_252 = arith.constant 0 : index
    %298 = vector.load %arg10[%c2_250, %c8_251, %c0_252] : memref<4x96x8xf32, #tpu.memory_space<vmem>>, vector<1x64x8xf32>
    %299 = vector.shape_cast %298 : vector<1x64x8xf32> to vector<64x8xf32>
    %300 = arith.truncf %299 : vector<64x8xf32> to vector<64x8xbf16>
    %c1_253 = arith.constant 1 : index
    %c0_254 = arith.constant 0 : index
    %c0_255 = arith.constant 0 : index
    %301 = vector.load %arg7[%c1_253, %c0_254, %c0_255] : memref<9x8x4xbf16, #tpu.memory_space<vmem>>, vector<1x8x4xbf16>
    %302 = vector.shape_cast %301 : vector<1x8x4xbf16> to vector<8x4xbf16>
    %cst_256 = arith.constant dense<0.000000e+00> : vector<64x4xf32>
    %303 = tpu.matmul %300, %302, %cst_256 {dimension_numbers = #tpu.dot_dimension_numbers<[1], [0], [0], [1], [0, 0, 1, 1], [], []>} : vector<64x8xbf16>, vector<8x4xbf16>, vector<64x4xf32> -> vector<64x4xf32>
    %304 = arith.addf %289, %303 : vector<64x4xf32>
    %c2_257 = arith.constant 2 : index
    %c9_258 = arith.constant 9 : index
    %c0_259 = arith.constant 0 : index
    %305 = vector.load %arg10[%c2_257, %c9_258, %c0_259] : memref<4x96x8xf32, #tpu.memory_space<vmem>>, vector<1x64x8xf32>
    %306 = vector.shape_cast %305 : vector<1x64x8xf32> to vector<64x8xf32>
    %307 = arith.truncf %306 : vector<64x8xf32> to vector<64x8xbf16>
    %c2_260 = arith.constant 2 : index
    %c0_261 = arith.constant 0 : index
    %c0_262 = arith.constant 0 : index
    %308 = vector.load %arg7[%c2_260, %c0_261, %c0_262] : memref<9x8x4xbf16, #tpu.memory_space<vmem>>, vector<1x8x4xbf16>
    %309 = vector.shape_cast %308 : vector<1x8x4xbf16> to vector<8x4xbf16>
    %cst_263 = arith.constant dense<0.000000e+00> : vector<64x4xf32>
    %310 = tpu.matmul %307, %309, %cst_263 {dimension_numbers = #tpu.dot_dimension_numbers<[1], [0], [0], [1], [0, 0, 1, 1], [], []>} : vector<64x8xbf16>, vector<8x4xbf16>, vector<64x4xf32> -> vector<64x4xf32>
    %311 = arith.addf %290, %310 : vector<64x4xf32>
    %c2_264 = arith.constant 2 : index
    %c15_265 = arith.constant 15 : index
    %c0_266 = arith.constant 0 : index
    %312 = vector.load %arg10[%c2_264, %c15_265, %c0_266] : memref<4x96x8xf32, #tpu.memory_space<vmem>>, vector<1x64x8xf32>
    %313 = vector.shape_cast %312 : vector<1x64x8xf32> to vector<64x8xf32>
    %314 = arith.truncf %313 : vector<64x8xf32> to vector<64x8xbf16>
    %c3_267 = arith.constant 3 : index
    %c0_268 = arith.constant 0 : index
    %c0_269 = arith.constant 0 : index
    %315 = vector.load %arg7[%c3_267, %c0_268, %c0_269] : memref<9x8x4xbf16, #tpu.memory_space<vmem>>, vector<1x8x4xbf16>
    %316 = vector.shape_cast %315 : vector<1x8x4xbf16> to vector<8x4xbf16>
    %cst_270 = arith.constant dense<0.000000e+00> : vector<64x4xf32>
    %317 = tpu.matmul %314, %316, %cst_270 {dimension_numbers = #tpu.dot_dimension_numbers<[1], [0], [0], [1], [0, 0, 1, 1], [], []>} : vector<64x8xbf16>, vector<8x4xbf16>, vector<64x4xf32> -> vector<64x4xf32>
    %318 = arith.addf %297, %317 : vector<64x4xf32>
    %c2_271 = arith.constant 2 : index
    %c16_272 = arith.constant 16 : index
    %c0_273 = arith.constant 0 : index
    %319 = vector.load %arg10[%c2_271, %c16_272, %c0_273] : memref<4x96x8xf32, #tpu.memory_space<vmem>>, vector<1x64x8xf32>
    %320 = vector.shape_cast %319 : vector<1x64x8xf32> to vector<64x8xf32>
    %321 = arith.truncf %320 : vector<64x8xf32> to vector<64x8xbf16>
    %c4_274 = arith.constant 4 : index
    %c0_275 = arith.constant 0 : index
    %c0_276 = arith.constant 0 : index
    %322 = vector.load %arg7[%c4_274, %c0_275, %c0_276] : memref<9x8x4xbf16, #tpu.memory_space<vmem>>, vector<1x8x4xbf16>
    %323 = vector.shape_cast %322 : vector<1x8x4xbf16> to vector<8x4xbf16>
    %cst_277 = arith.constant dense<0.000000e+00> : vector<64x4xf32>
    %324 = tpu.matmul %321, %323, %cst_277 {dimension_numbers = #tpu.dot_dimension_numbers<[1], [0], [0], [1], [0, 0, 1, 1], [], []>} : vector<64x8xbf16>, vector<8x4xbf16>, vector<64x4xf32> -> vector<64x4xf32>
    %325 = arith.addf %304, %324 : vector<64x4xf32>
    %c2_278 = arith.constant 2 : index
    %c17_279 = arith.constant 17 : index
    %c0_280 = arith.constant 0 : index
    %326 = vector.load %arg10[%c2_278, %c17_279, %c0_280] : memref<4x96x8xf32, #tpu.memory_space<vmem>>, vector<1x64x8xf32>
    %327 = vector.shape_cast %326 : vector<1x64x8xf32> to vector<64x8xf32>
    %328 = arith.truncf %327 : vector<64x8xf32> to vector<64x8xbf16>
    %c5_281 = arith.constant 5 : index
    %c0_282 = arith.constant 0 : index
    %c0_283 = arith.constant 0 : index
    %329 = vector.load %arg7[%c5_281, %c0_282, %c0_283] : memref<9x8x4xbf16, #tpu.memory_space<vmem>>, vector<1x8x4xbf16>
    %330 = vector.shape_cast %329 : vector<1x8x4xbf16> to vector<8x4xbf16>
    %cst_284 = arith.constant dense<0.000000e+00> : vector<64x4xf32>
    %331 = tpu.matmul %328, %330, %cst_284 {dimension_numbers = #tpu.dot_dimension_numbers<[1], [0], [0], [1], [0, 0, 1, 1], [], []>} : vector<64x8xbf16>, vector<8x4xbf16>, vector<64x4xf32> -> vector<64x4xf32>
    %332 = arith.addf %311, %331 : vector<64x4xf32>
    %c2_285 = arith.constant 2 : index
    %c23_286 = arith.constant 23 : index
    %c0_287 = arith.constant 0 : index
    %333 = vector.load %arg10[%c2_285, %c23_286, %c0_287] : memref<4x96x8xf32, #tpu.memory_space<vmem>>, vector<1x64x8xf32>
    %334 = vector.shape_cast %333 : vector<1x64x8xf32> to vector<64x8xf32>
    %335 = arith.truncf %334 : vector<64x8xf32> to vector<64x8xbf16>
    %c6_288 = arith.constant 6 : index
    %c0_289 = arith.constant 0 : index
    %c0_290 = arith.constant 0 : index
    %336 = vector.load %arg7[%c6_288, %c0_289, %c0_290] : memref<9x8x4xbf16, #tpu.memory_space<vmem>>, vector<1x8x4xbf16>
    %337 = vector.shape_cast %336 : vector<1x8x4xbf16> to vector<8x4xbf16>
    %cst_291 = arith.constant dense<0.000000e+00> : vector<64x4xf32>
    %338 = tpu.matmul %335, %337, %cst_291 {dimension_numbers = #tpu.dot_dimension_numbers<[1], [0], [0], [1], [0, 0, 1, 1], [], []>} : vector<64x8xbf16>, vector<8x4xbf16>, vector<64x4xf32> -> vector<64x4xf32>
    %339 = arith.addf %318, %338 : vector<64x4xf32>
    %c2_292 = arith.constant 2 : index
    %c24_293 = arith.constant 24 : index
    %c0_294 = arith.constant 0 : index
    %340 = vector.load %arg10[%c2_292, %c24_293, %c0_294] : memref<4x96x8xf32, #tpu.memory_space<vmem>>, vector<1x64x8xf32>
    %341 = vector.shape_cast %340 : vector<1x64x8xf32> to vector<64x8xf32>
    %342 = arith.truncf %341 : vector<64x8xf32> to vector<64x8xbf16>
    %c7_295 = arith.constant 7 : index
    %c0_296 = arith.constant 0 : index
    %c0_297 = arith.constant 0 : index
    %343 = vector.load %arg7[%c7_295, %c0_296, %c0_297] : memref<9x8x4xbf16, #tpu.memory_space<vmem>>, vector<1x8x4xbf16>
    %344 = vector.shape_cast %343 : vector<1x8x4xbf16> to vector<8x4xbf16>
    %cst_298 = arith.constant dense<0.000000e+00> : vector<64x4xf32>
    %345 = tpu.matmul %342, %344, %cst_298 {dimension_numbers = #tpu.dot_dimension_numbers<[1], [0], [0], [1], [0, 0, 1, 1], [], []>} : vector<64x8xbf16>, vector<8x4xbf16>, vector<64x4xf32> -> vector<64x4xf32>
    %346 = arith.addf %325, %345 : vector<64x4xf32>
    %c2_299 = arith.constant 2 : index
    %c25_300 = arith.constant 25 : index
    %c0_301 = arith.constant 0 : index
    %347 = vector.load %arg10[%c2_299, %c25_300, %c0_301] : memref<4x96x8xf32, #tpu.memory_space<vmem>>, vector<1x64x8xf32>
    %348 = vector.shape_cast %347 : vector<1x64x8xf32> to vector<64x8xf32>
    %349 = arith.truncf %348 : vector<64x8xf32> to vector<64x8xbf16>
    %c8_302 = arith.constant 8 : index
    %c0_303 = arith.constant 0 : index
    %c0_304 = arith.constant 0 : index
    %350 = vector.load %arg7[%c8_302, %c0_303, %c0_304] : memref<9x8x4xbf16, #tpu.memory_space<vmem>>, vector<1x8x4xbf16>
    %351 = vector.shape_cast %350 : vector<1x8x4xbf16> to vector<8x4xbf16>
    %cst_305 = arith.constant dense<0.000000e+00> : vector<64x4xf32>
    %352 = tpu.matmul %349, %351, %cst_305 {dimension_numbers = #tpu.dot_dimension_numbers<[1], [0], [0], [1], [0, 0, 1, 1], [], []>} : vector<64x8xbf16>, vector<8x4xbf16>, vector<64x4xf32> -> vector<64x4xf32>
    %353 = arith.addf %332, %352 : vector<64x4xf32>
    %354 = vector.broadcast %127 : vector<64x1xf32> to vector<64x4xf32>
    %355 = arith.mulf %354, %339 : vector<64x4xf32>
    %356 = arith.addf %346, %355 : vector<64x4xf32>
    %357 = vector.broadcast %131 : vector<64x1xf32> to vector<64x4xf32>
    %358 = arith.mulf %357, %353 : vector<64x4xf32>
    %359 = arith.addf %356, %358 : vector<64x4xf32>
    %cst_306 = arith.constant 0.000000e+00 : f32
    %360 = vector.broadcast %cst_306 : f32 to vector<64x4xf32>
    %361 = arith.maximumf %359, %360 : vector<64x4xf32>
    %362 = arith.addf %361, %8 : vector<64x4xf32>
    %c0_307 = arith.constant 0 : index
    %c2_308 = arith.constant 2 : index
    %c0_309 = arith.constant 0 : index
    %c0_310 = arith.constant 0 : index
    %363 = vector.load %arg9[%c0_307, %c2_308, %c0_309, %c0_310] : memref<1x4x64x4xf32, #tpu.memory_space<vmem>>, vector<1x1x64x4xf32>
    %364 = vector.shape_cast %363 : vector<1x1x64x4xf32> to vector<64x4xf32>
    %365 = vector.shape_cast %362 : vector<64x4xf32> to vector<1x1x64x4xf32>
    tpu.vector_store %arg9[%c0_307, %c2_308, %c0_309, %c0_310], %365 {strides = array<i32>} : memref<1x4x64x4xf32, #tpu.memory_space<vmem>>, vector<1x1x64x4xf32>,
    %cst_311 = arith.constant 0.000000e+00 : f32
    %366 = vector.broadcast %cst_311 : f32 to vector<64x4xf32>
    %cst_312 = arith.constant 0.000000e+00 : f32
    %367 = vector.broadcast %cst_312 : f32 to vector<64x4xf32>
    %cst_313 = arith.constant 0.000000e+00 : f32
    %368 = vector.broadcast %cst_313 : f32 to vector<64x4xf32>
    %c3_314 = arith.constant 3 : index
    %c7_315 = arith.constant 7 : index
    %c0_316 = arith.constant 0 : index
    %369 = vector.load %arg10[%c3_314, %c7_315, %c0_316] : memref<4x96x8xf32, #tpu.memory_space<vmem>>, vector<1x64x8xf32>
    %370 = vector.shape_cast %369 : vector<1x64x8xf32> to vector<64x8xf32>
    %371 = arith.truncf %370 : vector<64x8xf32> to vector<64x8xbf16>
    %c0_317 = arith.constant 0 : index
    %c0_318 = arith.constant 0 : index
    %c0_319 = arith.constant 0 : index
    %372 = vector.load %arg7[%c0_317, %c0_318, %c0_319] : memref<9x8x4xbf16, #tpu.memory_space<vmem>>, vector<1x8x4xbf16>
    %373 = vector.shape_cast %372 : vector<1x8x4xbf16> to vector<8x4xbf16>
    %cst_320 = arith.constant dense<0.000000e+00> : vector<64x4xf32>
    %374 = tpu.matmul %371, %373, %cst_320 {dimension_numbers = #tpu.dot_dimension_numbers<[1], [0], [0], [1], [0, 0, 1, 1], [], []>} : vector<64x8xbf16>, vector<8x4xbf16>, vector<64x4xf32> -> vector<64x4xf32>
    %375 = arith.addf %366, %374 : vector<64x4xf32>
    %c3_321 = arith.constant 3 : index
    %c8_322 = arith.constant 8 : index
    %c0_323 = arith.constant 0 : index
    %376 = vector.load %arg10[%c3_321, %c8_322, %c0_323] : memref<4x96x8xf32, #tpu.memory_space<vmem>>, vector<1x64x8xf32>
    %377 = vector.shape_cast %376 : vector<1x64x8xf32> to vector<64x8xf32>
    %378 = arith.truncf %377 : vector<64x8xf32> to vector<64x8xbf16>
    %c1_324 = arith.constant 1 : index
    %c0_325 = arith.constant 0 : index
    %c0_326 = arith.constant 0 : index
    %379 = vector.load %arg7[%c1_324, %c0_325, %c0_326] : memref<9x8x4xbf16, #tpu.memory_space<vmem>>, vector<1x8x4xbf16>
    %380 = vector.shape_cast %379 : vector<1x8x4xbf16> to vector<8x4xbf16>
    %cst_327 = arith.constant dense<0.000000e+00> : vector<64x4xf32>
    %381 = tpu.matmul %378, %380, %cst_327 {dimension_numbers = #tpu.dot_dimension_numbers<[1], [0], [0], [1], [0, 0, 1, 1], [], []>} : vector<64x8xbf16>, vector<8x4xbf16>, vector<64x4xf32> -> vector<64x4xf32>
    %382 = arith.addf %367, %381 : vector<64x4xf32>
    %c3_328 = arith.constant 3 : index
    %c9_329 = arith.constant 9 : index
    %c0_330 = arith.constant 0 : index
    %383 = vector.load %arg10[%c3_328, %c9_329, %c0_330] : memref<4x96x8xf32, #tpu.memory_space<vmem>>, vector<1x64x8xf32>
    %384 = vector.shape_cast %383 : vector<1x64x8xf32> to vector<64x8xf32>
    %385 = arith.truncf %384 : vector<64x8xf32> to vector<64x8xbf16>
    %c2_331 = arith.constant 2 : index
    %c0_332 = arith.constant 0 : index
    %c0_333 = arith.constant 0 : index
    %386 = vector.load %arg7[%c2_331, %c0_332, %c0_333] : memref<9x8x4xbf16, #tpu.memory_space<vmem>>, vector<1x8x4xbf16>
    %387 = vector.shape_cast %386 : vector<1x8x4xbf16> to vector<8x4xbf16>
    %cst_334 = arith.constant dense<0.000000e+00> : vector<64x4xf32>
    %388 = tpu.matmul %385, %387, %cst_334 {dimension_numbers = #tpu.dot_dimension_numbers<[1], [0], [0], [1], [0, 0, 1, 1], [], []>} : vector<64x8xbf16>, vector<8x4xbf16>, vector<64x4xf32> -> vector<64x4xf32>
    %389 = arith.addf %368, %388 : vector<64x4xf32>
    %c3_335 = arith.constant 3 : index
    %c15_336 = arith.constant 15 : index
    %c0_337 = arith.constant 0 : index
    %390 = vector.load %arg10[%c3_335, %c15_336, %c0_337] : memref<4x96x8xf32, #tpu.memory_space<vmem>>, vector<1x64x8xf32>
    %391 = vector.shape_cast %390 : vector<1x64x8xf32> to vector<64x8xf32>
    %392 = arith.truncf %391 : vector<64x8xf32> to vector<64x8xbf16>
    %c3_338 = arith.constant 3 : index
    %c0_339 = arith.constant 0 : index
    %c0_340 = arith.constant 0 : index
    %393 = vector.load %arg7[%c3_338, %c0_339, %c0_340] : memref<9x8x4xbf16, #tpu.memory_space<vmem>>, vector<1x8x4xbf16>
    %394 = vector.shape_cast %393 : vector<1x8x4xbf16> to vector<8x4xbf16>
    %cst_341 = arith.constant dense<0.000000e+00> : vector<64x4xf32>
    %395 = tpu.matmul %392, %394, %cst_341 {dimension_numbers = #tpu.dot_dimension_numbers<[1], [0], [0], [1], [0, 0, 1, 1], [], []>} : vector<64x8xbf16>, vector<8x4xbf16>, vector<64x4xf32> -> vector<64x4xf32>
    %396 = arith.addf %375, %395 : vector<64x4xf32>
    %c3_342 = arith.constant 3 : index
    %c16_343 = arith.constant 16 : index
    %c0_344 = arith.constant 0 : index
    %397 = vector.load %arg10[%c3_342, %c16_343, %c0_344] : memref<4x96x8xf32, #tpu.memory_space<vmem>>, vector<1x64x8xf32>
    %398 = vector.shape_cast %397 : vector<1x64x8xf32> to vector<64x8xf32>
    %399 = arith.truncf %398 : vector<64x8xf32> to vector<64x8xbf16>
    %c4_345 = arith.constant 4 : index
    %c0_346 = arith.constant 0 : index
    %c0_347 = arith.constant 0 : index
    %400 = vector.load %arg7[%c4_345, %c0_346, %c0_347] : memref<9x8x4xbf16, #tpu.memory_space<vmem>>, vector<1x8x4xbf16>
    %401 = vector.shape_cast %400 : vector<1x8x4xbf16> to vector<8x4xbf16>
    %cst_348 = arith.constant dense<0.000000e+00> : vector<64x4xf32>
    %402 = tpu.matmul %399, %401, %cst_348 {dimension_numbers = #tpu.dot_dimension_numbers<[1], [0], [0], [1], [0, 0, 1, 1], [], []>} : vector<64x8xbf16>, vector<8x4xbf16>, vector<64x4xf32> -> vector<64x4xf32>
    %403 = arith.addf %382, %402 : vector<64x4xf32>
    %c3_349 = arith.constant 3 : index
    %c17_350 = arith.constant 17 : index
    %c0_351 = arith.constant 0 : index
    %404 = vector.load %arg10[%c3_349, %c17_350, %c0_351] : memref<4x96x8xf32, #tpu.memory_space<vmem>>, vector<1x64x8xf32>
    %405 = vector.shape_cast %404 : vector<1x64x8xf32> to vector<64x8xf32>
    %406 = arith.truncf %405 : vector<64x8xf32> to vector<64x8xbf16>
    %c5_352 = arith.constant 5 : index
    %c0_353 = arith.constant 0 : index
    %c0_354 = arith.constant 0 : index
    %407 = vector.load %arg7[%c5_352, %c0_353, %c0_354] : memref<9x8x4xbf16, #tpu.memory_space<vmem>>, vector<1x8x4xbf16>
    %408 = vector.shape_cast %407 : vector<1x8x4xbf16> to vector<8x4xbf16>
    %cst_355 = arith.constant dense<0.000000e+00> : vector<64x4xf32>
    %409 = tpu.matmul %406, %408, %cst_355 {dimension_numbers = #tpu.dot_dimension_numbers<[1], [0], [0], [1], [0, 0, 1, 1], [], []>} : vector<64x8xbf16>, vector<8x4xbf16>, vector<64x4xf32> -> vector<64x4xf32>
    %410 = arith.addf %389, %409 : vector<64x4xf32>
    %c3_356 = arith.constant 3 : index
    %c23_357 = arith.constant 23 : index
    %c0_358 = arith.constant 0 : index
    %411 = vector.load %arg10[%c3_356, %c23_357, %c0_358] : memref<4x96x8xf32, #tpu.memory_space<vmem>>, vector<1x64x8xf32>
    %412 = vector.shape_cast %411 : vector<1x64x8xf32> to vector<64x8xf32>
    %413 = arith.truncf %412 : vector<64x8xf32> to vector<64x8xbf16>
    %c6_359 = arith.constant 6 : index
    %c0_360 = arith.constant 0 : index
    %c0_361 = arith.constant 0 : index
    %414 = vector.load %arg7[%c6_359, %c0_360, %c0_361] : memref<9x8x4xbf16, #tpu.memory_space<vmem>>, vector<1x8x4xbf16>
    %415 = vector.shape_cast %414 : vector<1x8x4xbf16> to vector<8x4xbf16>
    %cst_362 = arith.constant dense<0.000000e+00> : vector<64x4xf32>
    %416 = tpu.matmul %413, %415, %cst_362 {dimension_numbers = #tpu.dot_dimension_numbers<[1], [0], [0], [1], [0, 0, 1, 1], [], []>} : vector<64x8xbf16>, vector<8x4xbf16>, vector<64x4xf32> -> vector<64x4xf32>
    %417 = arith.addf %396, %416 : vector<64x4xf32>
    %c3_363 = arith.constant 3 : index
    %c24_364 = arith.constant 24 : index
    %c0_365 = arith.constant 0 : index
    %418 = vector.load %arg10[%c3_363, %c24_364, %c0_365] : memref<4x96x8xf32, #tpu.memory_space<vmem>>, vector<1x64x8xf32>
    %419 = vector.shape_cast %418 : vector<1x64x8xf32> to vector<64x8xf32>
    %420 = arith.truncf %419 : vector<64x8xf32> to vector<64x8xbf16>
    %c7_366 = arith.constant 7 : index
    %c0_367 = arith.constant 0 : index
    %c0_368 = arith.constant 0 : index
    %421 = vector.load %arg7[%c7_366, %c0_367, %c0_368] : memref<9x8x4xbf16, #tpu.memory_space<vmem>>, vector<1x8x4xbf16>
    %422 = vector.shape_cast %421 : vector<1x8x4xbf16> to vector<8x4xbf16>
    %cst_369 = arith.constant dense<0.000000e+00> : vector<64x4xf32>
    %423 = tpu.matmul %420, %422, %cst_369 {dimension_numbers = #tpu.dot_dimension_numbers<[1], [0], [0], [1], [0, 0, 1, 1], [], []>} : vector<64x8xbf16>, vector<8x4xbf16>, vector<64x4xf32> -> vector<64x4xf32>
    %424 = arith.addf %403, %423 : vector<64x4xf32>
    %c3_370 = arith.constant 3 : index
    %c25_371 = arith.constant 25 : index
    %c0_372 = arith.constant 0 : index
    %425 = vector.load %arg10[%c3_370, %c25_371, %c0_372] : memref<4x96x8xf32, #tpu.memory_space<vmem>>, vector<1x64x8xf32>
    %426 = vector.shape_cast %425 : vector<1x64x8xf32> to vector<64x8xf32>
    %427 = arith.truncf %426 : vector<64x8xf32> to vector<64x8xbf16>
    %c8_373 = arith.constant 8 : index
    %c0_374 = arith.constant 0 : index
    %c0_375 = arith.constant 0 : index
    %428 = vector.load %arg7[%c8_373, %c0_374, %c0_375] : memref<9x8x4xbf16, #tpu.memory_space<vmem>>, vector<1x8x4xbf16>
    %429 = vector.shape_cast %428 : vector<1x8x4xbf16> to vector<8x4xbf16>
    %cst_376 = arith.constant dense<0.000000e+00> : vector<64x4xf32>
    %430 = tpu.matmul %427, %429, %cst_376 {dimension_numbers = #tpu.dot_dimension_numbers<[1], [0], [0], [1], [0, 0, 1, 1], [], []>} : vector<64x8xbf16>, vector<8x4xbf16>, vector<64x4xf32> -> vector<64x4xf32>
    %431 = arith.addf %410, %430 : vector<64x4xf32>
    %432 = vector.broadcast %127 : vector<64x1xf32> to vector<64x4xf32>
    %433 = arith.mulf %432, %417 : vector<64x4xf32>
    %434 = arith.addf %424, %433 : vector<64x4xf32>
    %435 = vector.broadcast %131 : vector<64x1xf32> to vector<64x4xf32>
    %436 = arith.mulf %435, %431 : vector<64x4xf32>
    %437 = arith.addf %434, %436 : vector<64x4xf32>
    %cst_377 = arith.constant 0.000000e+00 : f32
    %438 = vector.broadcast %cst_377 : f32 to vector<64x4xf32>
    %439 = arith.maximumf %437, %438 : vector<64x4xf32>
    %440 = arith.addf %439, %10 : vector<64x4xf32>
    %c0_378 = arith.constant 0 : index
    %c3_379 = arith.constant 3 : index
    %c0_380 = arith.constant 0 : index
    %c0_381 = arith.constant 0 : index
    %441 = vector.load %arg9[%c0_378, %c3_379, %c0_380, %c0_381] : memref<1x4x64x4xf32, #tpu.memory_space<vmem>>, vector<1x1x64x4xf32>
    %442 = vector.shape_cast %441 : vector<1x1x64x4xf32> to vector<64x4xf32>
    %443 = vector.shape_cast %440 : vector<64x4xf32> to vector<1x1x64x4xf32>
    tpu.vector_store %arg9[%c0_378, %c3_379, %c0_380, %c0_381], %443 {strides = array<i32>} : memref<1x4x64x4xf32, #tpu.memory_space<vmem>>, vector<1x1x64x4xf32>,
    return
  }
  func.func @transform_0(%arg0: i32) -> (i32, i32, i32) {
    %c0_i32 = arith.constant 0 : i32
    %c0_i32_0 = arith.constant 0 : i32
    %c0_i32_1 = arith.constant 0 : i32
    return %arg0, %c0_i32, %c0_i32_0 : i32, i32, i32
  }
  func.func @transform_1(%arg0: i32) -> (i32, i32, i32, i32) {
    %c0_i32 = arith.constant 0 : i32
    %c0_i32_0 = arith.constant 0 : i32
    %c0_i32_1 = arith.constant 0 : i32
    %c0_i32_2 = arith.constant 0 : i32
    return %arg0, %c0_i32, %c0_i32_0, %c0_i32_1 : i32, i32, i32, i32
  }
  func.func @transform_2(%arg0: i32) -> (i32, i32, i32) {
    %c0_i32 = arith.constant 0 : i32
    %c0_i32_0 = arith.constant 0 : i32
    %c0_i32_1 = arith.constant 0 : i32
    %c0_i32_2 = arith.constant 0 : i32
    return %c0_i32, %c0_i32_0, %c0_i32_1 : i32, i32, i32
  }
  func.func @transform_3(%arg0: i32) -> (i32, i32, i32) {
    %c0_i32 = arith.constant 0 : i32
    %c0_i32_0 = arith.constant 0 : i32
    %c0_i32_1 = arith.constant 0 : i32
    %c0_i32_2 = arith.constant 0 : i32
    return %c0_i32, %c0_i32_0, %c0_i32_1 : i32, i32, i32
  }
  func.func @transform_4(%arg0: i32) -> (i32, i32) {
    %c0_i32 = arith.constant 0 : i32
    %c0_i32_0 = arith.constant 0 : i32
    %c0_i32_1 = arith.constant 0 : i32
    return %c0_i32, %c0_i32_0 : i32, i32
  }
  func.func @transform_5(%arg0: i32) -> (i32, i32) {
    %c0_i32 = arith.constant 0 : i32
    %c0_i32_0 = arith.constant 0 : i32
    %c0_i32_1 = arith.constant 0 : i32
    return %c0_i32, %c0_i32_0 : i32, i32
  }
  func.func @transform_6(%arg0: i32) -> (i32, i32, i32) {
    %c0_i32 = arith.constant 0 : i32
    %c0_i32_0 = arith.constant 0 : i32
    %c0_i32_1 = arith.constant 0 : i32
    %c0_i32_2 = arith.constant 0 : i32
    return %c0_i32, %c0_i32_0, %c0_i32_1 : i32, i32, i32
  }
  func.func @transform_7(%arg0: i32) -> (i32, i32, i32) {
    %c0_i32 = arith.constant 0 : i32
    %c0_i32_0 = arith.constant 0 : i32
    %c0_i32_1 = arith.constant 0 : i32
    return %arg0, %c0_i32, %c0_i32_0 : i32, i32, i32
  }
  func.func @transform_8(%arg0: i32) -> (i32, i32, i32, i32) {
    %c0_i32 = arith.constant 0 : i32
    %c0_i32_0 = arith.constant 0 : i32
    %c0_i32_1 = arith.constant 0 : i32
    %c0_i32_2 = arith.constant 0 : i32
    return %arg0, %c0_i32, %c0_i32_0, %c0_i32_1 : i32, i32, i32, i32
  }
}

</mosaic_0001>

<bundles_post_ra>
// kernel: intergroup_forward.2
= control target key start
LH: loop header
LB: loop body
LE: loop exit
PB: predicated region body
PF: predicated region fallthrough
CT: control target
= control target key end

     0   :  { %s6449_s27 = smov 0   ;;  %s8202_s0 = inlined_call_operand.vmem [shape: f32[2,64,4], index: 0, kind: input, shape index: {}]   ;;  %s8203_s1 = inlined_call_operand.vmem [shape: f32[2,4,64,4], index: 1, kind: input, shape index: {}]   ;;  %s8204_s2 = inlined_call_operand.vmem [shape: bf16[4,4,4], index: 2, kind: input, shape index: {}]   ;;  %s8205_s3 = inlined_call_operand.vmem [shape: bf16[4,4,4], index: 3, kind: input, shape index: {}]   ;;  %s8206_s4 = inlined_call_operand.vmem [shape: bf16[4,4], index: 4, kind: input, shape index: {}]   ;;  %s8207_s5 = inlined_call_operand.vmem [shape: bf16[4,4], index: 5, kind: input, shape index: {}]   ;;  %s8208_s6 = inlined_call_operand.vmem [shape: bf16[9,8,4], index: 6, kind: input, shape index: {}]   ;;  %s8209_s7 = inlined_call_operand.vmem [shape: f32[2,64,4], index: 7, kind: output, shape index: {0}]   ;;  %s8210_s8 = inlined_call_operand.vmem [shape: f32[2,4,64,4], index: 8, kind: output, shape index: {1}]  }
   0x1 LB: > { %s5343_s28 = sadd.s32 4294967295, %s6400_s27   ;;  %p5347_p0 = scmp.ge.s32.totalorder %s6400_s27, 1  ;;  %s6400_s27 = sphi %s6449_s27, %s19_s27  }
   0x2   : > { %p275_p1 = scmp.lt.s32.totalorder %s6400_s27, 3 }
   0x4   : > { %p276_p2 = pnand %p5347_p0, %p275_p1 }
   0x6   : > { %279 = sbr.rel (%p276_p2) target bundleno = 1079 (0x437), region = 48 }
   0xb   : > { %v5380_v0 = vld [vmem:[%s8204_s2 + $0x2] sm:$0x3]  ;;  %vm424_vm0 = vcmask 1041408   ;;  %v391_v1 = vld [vmem:[%s8204_s2] sm:$0x3]  ;;  %p319_p3 = scmp.lt.s32.totalorder %s5343_s28, 1 }
   0xc   : > { %6338 = vmatprep.subr.msk.bf16.mxu0 %vm424_vm0, %v5380_v0  ;;  %v426_v2 = vsel %vm424_vm0, %v5380_v0, 0  ;;  %6339 = vmatprep.subr.msk.bf16.mxu1 %vm424_vm0, %v391_v1  ;;  %v506_v3 = vsel %vm424_vm0, %v391_v1, 0  ;;  %v5389_v4 = vld [vmem:[%s8204_s2 + $0x4] sm:$0x3]  ;;  %v5394_v5 = vld [vmem:[%s8204_s2 + $0x6] sm:$0x3] }
   0xd   : > { %5879 = vmatpush3.bf16.msra.mxu0 %v426_v2  ;;  %5889 = vmatpush3.bf16.msra.mxu1 %v506_v3  ;;  %s8533_s28 = smov (!%p319_p3, %s5343_s28), 1  ;;  %vm397_vm1 = vcmask 31744   ;;  %v605_v17 = vsel %vm424_vm0, %v5389_v4, 0  ;;  %v712_v20 = vsel %vm424_vm0, %v5394_v5, 0  ;;  %v813_v56 = vld [vmem:[%s8207_s5] sm:$0x3] }
   0xe   : > { %6340 = vmatprep.subr.msk.bf16.mxu0 %vm424_vm0, %v5389_v4  ;;  %6341 = vmatprep.subr.msk.bf16.mxu1 %vm424_vm0, %v5394_v5  ;;  %s5645_s15 = sshll.u32 %s8533_s28, 8  ;;  %v827_v57 = vsel %vm424_vm0, %v813_v56, 0  ;;  %s5644_s21 = sshll.u32 %s8533_s28, 6  ;;  %v808_v58 = vld [vmem:[%s8206_s4] sm:$0x3]  ;;  %vm1651_vm2 = vcmask 1043456  }
   0xf   : > { %s6483_s18 = scalar_lea.vmem %s8203_s1, %s5645_s15  ;;  %s323_s26 = scalar_lea.vmem %s8202_s0, %s5644_s21  ;;  %v907_v59 = vsel %vm424_vm0, %v808_v58, 0  ;;  %v6734_v2 = vld [vmem:[%s8205_s3] sm:$0x3]  ;;  %vm392_vm3 = vcmask 64512   ;;  %vm1099_vm4 = vcmask 64544  }
  0x10   : > { %v6486_v6 = vld [vmem:[%s6483_s18 + $0x40] sm:$0xff]  ;;  %v6489_v7 = vld [vmem:[%s6483_s18 + $0x48] sm:$0xff]  ;;  %v6506_v11 = vld [vmem:[%s6483_s18 + $0x50] sm:$0xff]  ;;  %s6403_s23 = smov 4  }
  0x11   : > { %8281 = vst [vmem:[#allocation3_spill] sm:$0xff] %v6486_v6  ;;  %8282 = vst [vmem:[#allocation4_spill] sm:$0xff] %v6489_v7  ;;  %v6492_v8 = vld [vmem:[%s6483_s18] sm:$0xff]  ;;  %v406_v9 = vpack.c.bf16 %v6489_v7, %v6486_v6  ;;  %v6501_v10 = vld [vmem:[%s6483_s18 + $0x8] sm:$0xff] }
  0x12   : > { %8283 = vst [vmem:[#allocation5_spill] sm:$0xff] %v6492_v8  ;;  %578 = vst.msk [vmem:[#allocation2 + $0x70] sm:$0xff] %vm397_vm1, %v6486_v6  ;;  %v6509_v12 = vld [vmem:[%s6483_s18 + $0x58] sm:$0xff]  ;;  %v387_v13 = vpack.c.bf16 %v6501_v10, %v6492_v8  ;;  %v6522_v15 = vld [vmem:[%s6483_s18 + $0x10] sm:$0xff] }
  0x13   : > { %579 = vst.msk [vmem:[#allocation2 + $0x78] sm:$0xff] %vm397_vm1, %v6489_v7  ;;  %8284 = vst [vmem:[#allocation6_spill] sm:$0xff] %v6501_v10  ;;  %v407_v14 = vpack.c.bf16 %v6509_v12, %v6506_v11  ;;  %v6525_v16 = vld [vmem:[%s6483_s18 + $0x18] sm:$0xff]  ;;  %v6529_v18 = vld [vmem:[%s6483_s18 + $0x60] sm:$0xff]  ;;  %5880 = vmatprep.mubr.msk.bf16.mxu0 %vm397_vm1, %v406_v9 }
  0x14   : > { %398 = vst.msk [vmem:[#allocation2 + $0x10] sm:$0xff] %vm397_vm1, %v6492_v8  ;;  %8285 = vst [vmem:[#allocation7_spill] sm:$0xff] %v6506_v11  ;;  %v388_v19 = vpack.c.bf16 %v6525_v16, %v6522_v15  ;;  %v6540_v21 = vld [vmem:[%s6483_s18 + $0x68] sm:$0xff]  ;;  %v6545_v22 = vld [vmem:[%s6483_s18 + $0x20] sm:$0xff]  ;;  %5890 = vmatprep.mubr.msk.bf16.mxu1 %vm397_vm1, %v387_v13 }
  0x15   : > { %8286 = vst [vmem:[#allocation8_spill] sm:$0xff] %v6509_v12  ;;  %399 = vst.msk [vmem:[#allocation2 + $0x18] sm:$0xff] %vm397_vm1, %v6501_v10  ;;  %v6548_v23 = vld [vmem:[%s6483_s18 + $0x28] sm:$0xff]  ;;  %5881 = vmatmul.mubr.msk.bf16.vlgmr.msra.gmra.mxu0 %vm397_vm1, %v407_v14  ;;  %v408_v24 = vpack.c.bf16 %v6540_v21, %v6529_v18  ;;  %v6563_v26 = vld [vmem:[%s6483_s18 + $0x70] sm:$0xff] }
  0x16   : > { %580 = vst.msk [vmem:[#allocation2 + $0x80] sm:$0xff] %vm397_vm1, %v6506_v11  ;;  %581 = vst.msk [vmem:[#allocation2 + $0x88] sm:$0xff] %vm397_vm1, %v6509_v12  ;;  %v389_v25 = vpack.c.bf16 %v6548_v23, %v6545_v22  ;;  %v6566_v27 = vld [vmem:[%s6483_s18 + $0x78] sm:$0xff]  ;;  %v6569_v28 = vld [vmem:[%s6483_s18 + $0x30] sm:$0xff]  ;;  %5891 = vmatmul.mubr.msk.bf16.vlgmr.msra.gmra.mxu1 %vm397_vm1, %v388_v19  ;;  %5899 = vmatpush3.bf16.msra.mxu0 %v605_v17 }
  0x17   : > { %8287 = vst [vmem:[#allocation9_spill] sm:$0xff] %v6522_v15  ;;  %8288 = vst [vmem:[#allocation10_spill] sm:$0xff] %v6525_v16  ;;  %v6577_v29 = vld [vmem:[%s6483_s18 + $0x38] sm:$0xff]  ;;  %v6582_v30 = vld [vmem:[%s6483_s18 + $0x80] sm:$0xff]  ;;  %5909 = vmatpush3.bf16.msra.mxu1 %v712_v20  ;;  %5884 = vmatprep.mubr.msk.bf16.mxu0 %vm397_vm1, %v408_v24  ;;  %v409_v38 = vpack.c.bf16 %v6566_v27, %v6563_v26 }
  0x18   : > { %8289 = vst [vmem:[#allocation11_spill] sm:$0xff] %v6529_v18  ;;  %400 = vst.msk [vmem:[#allocation2 + $0x20] sm:$0xff] %vm397_vm1, %v6522_v15  ;;  %v6585_v31 = vld [vmem:[%s6483_s18 + $0x88] sm:$0xff]  ;;  %v6595_v32 = vld [vmem:[%s6483_s18 + $0xc0] sm:$0xff]  ;;  %5894 = vmatprep.mubr.msk.bf16.mxu1 %vm397_vm1, %v389_v25  ;;  %v390_v42 = vpack.c.bf16 %v6577_v29, %v6569_v28  ;;  %6342 = vmatprep.subr.msk.bf16.mxu0 %vm424_vm0, %v813_v56 }
  0x19   : > { %401 = vst.msk [vmem:[#allocation2 + $0x28] sm:$0xff] %vm397_vm1, %v6525_v16  ;;  %8290 = vst [vmem:[#allocation12_spill] sm:$0xff] %v6540_v21  ;;  %v6598_v33 = vld [vmem:[%s6483_s18 + $0xc8] sm:$0xff]  ;;  %v6601_v34 = vld [vmem:[%s6483_s18 + $0x90] sm:$0xff]  ;;  %v586_v43 = vpack.c.bf16 %v6585_v31, %v6582_v30  ;;  %6343 = vmatprep.subr.msk.bf16.mxu1 %vm424_vm0, %v808_v58 }
  0x1a   : > { %582 = vst.msk [vmem:[#allocation2 + $0x90] sm:$0xff] %vm397_vm1, %v6529_v18  ;;  %8291 = vst [vmem:[#allocation13_spill] sm:$0xff] %v6545_v22  ;;  %v6609_v35 = vld [vmem:[%s6483_s18 + $0x98] sm:$0xff]  ;;  %v6614_v36 = vld [vmem:[%s6483_s18 + $0xd0] sm:$0xff]  ;;  %v693_v47 = vpack.c.bf16 %v6598_v33, %v6595_v32 }
  0x1b   : > { %8292 = vst [vmem:[#allocation14_spill] sm:$0xff] %v6548_v23  ;;  %583 = vst.msk [vmem:[#allocation2 + $0x98] sm:$0xff] %vm397_vm1, %v6540_v21  ;;  %v6617_v37 = vld [vmem:[%s6483_s18 + $0xd8] sm:$0xff]  ;;  %v6628_v39 = vld [vmem:[%s6483_s18 + $0xa0] sm:$0xff]  ;;  %v587_v50 = vpack.c.bf16 %v6609_v35, %v6601_v34 }
  0x1c   : > { %402 = vst.msk [vmem:[#allocation2 + $0x30] sm:$0xff] %vm397_vm1, %v6545_v22  ;;  %403 = vst.msk [vmem:[#allocation2 + $0x38] sm:$0xff] %vm397_vm1, %v6548_v23  ;;  %v6631_v40 = vld [vmem:[%s6483_s18 + $0xa8] sm:$0xff]  ;;  %v6634_v41 = vld [vmem:[%s6483_s18 + $0xe0] sm:$0xff]  ;;  %v694_v51 = vpack.c.bf16 %v6617_v37, %v6614_v36 }
  0x1d   : > { %8293 = vst [vmem:[#allocation15_spill] sm:$0xff] %v6563_v26  ;;  %8294 = vst [vmem:[#allocation16_spill] sm:$0xff] %v6566_v27  ;;  %v6645_v44 = vld [vmem:[%s6483_s18 + $0xe8] sm:$0xff]  ;;  %v6650_v45 = vld [vmem:[%s6483_s18 + $0xb0] sm:$0xff]  ;;  %5885 = vmatmul.mubr.msk.bf16.gmra.mxu0 %vm397_vm1, %v409_v38  ;;  %v588_v52 = vpack.c.bf16 %v6631_v40, %v6628_v39 }
  0x1e   : > { %8295 = vst [vmem:[#allocation17_spill] sm:$0xff] %v6569_v28  ;;  %584 = vst.msk [vmem:[#allocation2 + $0xa0] sm:$0xff] %vm397_vm1, %v6563_v26  ;;  %v6653_v46 = vld [vmem:[%s6483_s18 + $0xb8] sm:$0xff]  ;;  %v6664_v48 = vld [vmem:[%s6483_s18 + $0xf0] sm:$0xff]  ;;  %5895 = vmatmul.mubr.msk.bf16.gmra.mxu1 %vm397_vm1, %v390_v42  ;;  %5900 = vmatprep.mubr.msk.bf16.mxu0 %vm397_vm1, %v586_v43  ;;  %v695_v53 = vpack.c.bf16 %v6645_v44, %v6634_v41 }
  0x1f   : > { %585 = vst.msk [vmem:[#allocation2 + $0xa8] sm:$0xff] %vm397_vm1, %v6566_v27  ;;  %8296 = vst [vmem:[#allocation18_spill] sm:$0xff] %v6577_v29  ;;  %v6667_v49 = vld [vmem:[%s6483_s18 + $0xf8] sm:$0xff]  ;;  %5910 = vmatprep.mubr.msk.bf16.mxu1 %vm397_vm1, %v693_v47  ;;  %v589_v54 = vpack.c.bf16 %v6653_v46, %v6650_v45  ;;  %v6711_v60 = vld [vmem:[%s323_s26] sm:$0xff]  ;;  %s6816_s18 = scalar_lea.vmem %s8209_s7, %s5644_s21 }
  0x20   : > { %404 = vst.msk [vmem:[#allocation2 + $0x40] sm:$0xff] %vm397_vm1, %v6569_v28  ;;  %8297 = vst [vmem:[#allocation19_spill] sm:$0xff] %v6582_v30  ;;  %v696_v55 = vpack.c.bf16 %v6667_v49, %v6664_v48  ;;  %v6713_v61 = vld [vmem:[%s323_s26 + $0x8] sm:$0xff]  ;;  %v6719_v63 = vld [vmem:[%s323_s26 + $0x10] sm:$0xff] }
  0x21   : > { %8298 = vst [vmem:[#allocation20_spill] sm:$0xff] %v6585_v31  ;;  %405 = vst.msk [vmem:[#allocation2 + $0x48] sm:$0xff] %vm397_vm1, %v6577_v29  ;;  %v6717_v62 = vpack.c.bf16 %v6713_v61, %v6711_v60  ;;  %v6721_v0 = vld [vmem:[%s323_s26 + $0x18] sm:$0xff]  ;;  %v6736_v3 = vld [vmem:[%s323_s26 + $0x20] sm:$0xff] }
  0x22   : > { %685 = vst.msk [vmem:[#allocation2 + $0xd0] sm:$0xff] %vm397_vm1, %v6582_v30  ;;  %686 = vst.msk [vmem:[#allocation2 + $0xd8] sm:$0xff] %vm397_vm1, %v6585_v31  ;;  %v6725_v1 = vpack.c.bf16 %v6721_v0, %v6719_v63  ;;  %v6738_v4 = vld [vmem:[%s323_s26 + $0x28] sm:$0xff]  ;;  %v6746_v9 = vld [vmem:[%s323_s26 + $0x30] sm:$0xff] }
  0x23   : > { %8299 = vst [vmem:[#allocation21_spill] sm:$0xff] %v6595_v32  ;;  %8300 = vst [vmem:[#allocation22_spill] sm:$0xff] %v6598_v33  ;;  %v6744_v5 = vpack.c.bf16 %v6738_v4, %v6736_v3  ;;  %v6748_v13 = vld [vmem:[%s323_s26 + $0x38] sm:$0xff]  ;;  %v5411_v17 = vld [vmem:[%s8205_s3 + $0x2] sm:$0x3] }
  0x24   : > { %8301 = vst [vmem:[#allocation23_spill] sm:$0xff] %v6601_v34  ;;  %792 = vst.msk [vmem:[#allocation2 + $0x130] sm:$0xff] %vm397_vm1, %v6595_v32  ;;  %v6752_v14 = vpack.c.bf16 %v6748_v13, %v6746_v9  ;;  %v1111_v19 = vsel %vm424_vm0, %v5411_v17, 0 }
  0x25   : > { %793 = vst.msk [vmem:[#allocation2 + $0x138] sm:$0xff] %vm397_vm1, %v6598_v33  ;;  %8302 = vst [vmem:[#allocation24_spill] sm:$0xff] %v6609_v35  ;;  %5901 = vmatmul.mubr.msk.bf16.vlgmr.msra.gmra.mxu0 %vm397_vm1, %v587_v50 }
  0x26   : > { %687 = vst.msk [vmem:[#allocation2 + $0xe0] sm:$0xff] %vm397_vm1, %v6601_v34  ;;  %8303 = vst [vmem:[#allocation25_spill] sm:$0xff] %v6614_v36  ;;  %5911 = vmatmul.mubr.msk.bf16.vlgmr.msra.gmra.mxu1 %vm397_vm1, %v694_v51  ;;  %5904 = vmatprep.mubr.msk.bf16.mxu0 %vm397_vm1, %v588_v52 }
  0x27   : > { %8304 = vst [vmem:[#allocation26_spill] sm:$0xff] %v6617_v37  ;;  %688 = vst.msk [vmem:[#allocation2 + $0xe8] sm:$0xff] %vm397_vm1, %v6609_v35  ;;  %5914 = vmatprep.mubr.msk.bf16.mxu1 %vm397_vm1, %v695_v53  ;;  %5919 = vmatpush3.bf16.msra.mxu0 %v827_v57 }
  0x28   : > { %794 = vst.msk [vmem:[#allocation2 + $0x140] sm:$0xff] %vm397_vm1, %v6614_v36  ;;  %795 = vst.msk [vmem:[#allocation2 + $0x148] sm:$0xff] %vm397_vm1, %v6617_v37  ;;  %5929 = vmatpush3.bf16.msra.mxu1 %v907_v59  ;;  %6344 = vmatprep.subr.msk.bf16.mxu0 %vm424_vm0, %v6734_v2 }
  0x29   : > { %8305 = vst [vmem:[#allocation27_spill] sm:$0xff] %v6628_v39  ;;  %8306 = vst [vmem:[#allocation28_spill] sm:$0xff] %v6631_v40  ;;  %6345 = vmatprep.subr.msk.bf16.mxu1 %vm424_vm0, %v5411_v17 }
  0x2a   : > { %8307 = vst [vmem:[#allocation29_spill] sm:$0xff] %v6634_v41  ;;  %689 = vst.msk [vmem:[#allocation2 + $0xf0] sm:$0xff] %vm397_vm1, %v6628_v39 }
  0x2b   : > { %690 = vst.msk [vmem:[#allocation2 + $0xf8] sm:$0xff] %vm397_vm1, %v6631_v40  ;;  %8308 = vst [vmem:[#allocation30_spill] sm:$0xff] %v6645_v44 }
  0x2c   : > { %796 = vst.msk [vmem:[#allocation2 + $0x150] sm:$0xff] %vm397_vm1, %v6634_v41  ;;  %8309 = vst [vmem:[#allocation31_spill] sm:$0xff] %v6650_v45 }
  0x2d   : > { %8310 = vst [vmem:[#allocation32_spill] sm:$0xff] %v6653_v46  ;;  %797 = vst.msk [vmem:[#allocation2 + $0x158] sm:$0xff] %vm397_vm1, %v6645_v44  ;;  %5905 = vmatmul.mubr.msk.bf16.gmra.mxu0 %vm397_vm1, %v589_v54 }
  0x2e   : > { %691 = vst.msk [vmem:[#allocation2 + $0x100] sm:$0xff] %vm397_vm1, %v6650_v45  ;;  %692 = vst.msk [vmem:[#allocation2 + $0x108] sm:$0xff] %vm397_vm1, %v6653_v46  ;;  %5915 = vmatmul.mubr.msk.bf16.gmra.mxu1 %vm397_vm1, %v696_v55 }
  0x2f   : > { %8311 = vst [vmem:[#allocation33_spill] sm:$0xff] %v6664_v48  ;;  %8312 = vst [vmem:[#allocation34_spill] sm:$0xff] %v6667_v49  ;;  %5930 = vmatprep.mubr.msk.bf16.mxu1 %vm397_vm1, %v6717_v62 }
  0x30   : > { %798 = vst.msk [vmem:[#allocation2 + $0x160] sm:$0xff] %vm397_vm1, %v6664_v48  ;;  %799 = vst.msk [vmem:[#allocation2 + $0x168] sm:$0xff] %vm397_vm1, %v6667_v49 }
  0x36   : > { %5931 = vmatmul.mubr.msk.bf16.vlgmr.msra.gmra.mxu1 %vm397_vm1, %v6725_v1 }
  0x37   : > { %5934 = vmatprep.mubr.msk.bf16.mxu1 %vm397_vm1, %v6744_v5  ;;  %5949 = vmatpush3.bf16.msra.mxu1 %v1111_v19 }
  0x3e   : > { %5935 = vmatmul.mubr.msk.bf16.gmra.mxu1 %vm397_vm1, %v6752_v14 }
  0x3f   : > { %5950 = vmatprep.mubr.msk.bf16.mxu1 %vm397_vm1, %v6717_v62 }
  0x46   : > { %5951 = vmatmul.mubr.msk.bf16.vlgmr.msra.gmra.mxu1 %vm397_vm1, %v6725_v1 }
  0x47   : > { %5954 = vmatprep.mubr.msk.bf16.mxu1 %vm397_vm1, %v6744_v5 }
  0x4e   : > { %5955 = vmatmul.mubr.msk.bf16.gmra.mxu1 %vm397_vm1, %v6752_v14 }
  0x4f   : > { %5970 = vmatprep.mubr.msk.bf16.mxu1 %vm397_vm1, %v6717_v62 }
  0xd5   : > { %v5882_v20 = vpop.f32.mrf.mxu0 }
  0xd6   : > { %v5892_v24 = vpop.f32.mrf.mxu1 }
  0xd7   : > { %v462_v25 = vpop.f32.mrf.mxu0  ;;  %v551_v44 = vadd.f32 %v5892_v24, %v5882_v20 }
  0xd8   : > { %v542_v38 = vpop.f32.mrf.mxu1 }
  0xd9   : > { %v5883_v42 = vpop.f32.mrf.mxu0  ;;  %v543_v17 = vadd.f32 %v542_v38, %v462_v25 }
  0xda   : > { %v5893_v43 = vpop.f32.mrf.mxu1 }
  0xdb   : > { %v465_v47 = vpop.f32.mrf.mxu0  ;;  %v554_v41 = vadd.f32 %v5893_v43, %v5883_v42 }
  0xdc   : > { %v545_v50 = vpop.f32.mrf.mxu1 }
  0xdd   : > { %v5886_v51 = vpop.f32.mrf.mxu0  ;;  %v546_v36 = vadd.f32 %v545_v50, %v465_v47 }
  0xde   : > { %v5896_v52 = vpop.f32.mrf.mxu1 }
  0xdf   : > { %v478_v53 = vpop.f32.mrf.mxu0  ;;  %v567_v20 = vadd.f32 %v5896_v52, %v5886_v51 }
  0xe0   : > { %v558_v54 = vpop.f32.mrf.mxu1 }
  0xe1   : > { %v5887_v55 = vpop.f32.mrf.mxu0  ;;  %v559_v27 = vadd.f32 %v558_v54, %v478_v53 }
  0xe2   : > { %v5897_v56 = vpop.f32.mrf.mxu1 }
  0xe3   : > { %v481_v57 = vpop.f32.mrf.mxu0 }
  0xe4   : > { %v561_v58 = vpop.f32.mrf.mxu1 }
  0xe5   : > { %v5902_v59 = vpop.f32.mrf.mxu0 }
  0xe6   : > { %v5912_v19 = vpop.f32.mrf.mxu1  ;;  %v674_v37 = vadd.f32 %v5902_v59, %v551_v44 }
  0xe7   : > { %v641_v49 = vpop.f32.mrf.mxu0 }
  0xe8   : > { %v672_v48 = vadd.f32 %v641_v49, %v543_v17  ;;  %v748_v33 = vpop.f32.mrf.mxu1  ;;  %v781_v34 = vadd.f32 %v5912_v19, %v674_v37  ;;  %v570_v49 = vadd.f32 %v5897_v56, %v5887_v55 }
  0xe9   : > { %v5903_v32 = vpop.f32.mrf.mxu0 }
  0xea   : > { %v675_v40 = vadd.f32 %v5903_v32, %v554_v41  ;;  %v5913_v46 = vpop.f32.mrf.mxu1  ;;  %v779_v45 = vadd.f32 %v748_v33, %v672_v48  ;;  %v802_v32 = vmax.f32 %v781_v34, 0.0  ;;  %v562_v33 = vadd.f32 %v561_v58, %v481_v57  ;;  %v5421_v57 = vld [vmem:[%s8205_s3 + $0x6] sm:$0x3] }
  0xeb   : > { %v644_v39 = vpop.f32.mrf.mxu0  ;;  %6347 = vmatprep.subr.msk.bf16.mxu1 %vm424_vm0, %v5421_v57  ;;  %v1331_v58 = vsel %vm424_vm0, %v5421_v57, 0 }
  0xec   : > { %v782_v31 = vadd.f32 %v5913_v46, %v675_v40  ;;  %v673_v35 = vadd.f32 %v644_v39, %v546_v36  ;;  %v751_v30 = vpop.f32.mrf.mxu1  ;;  %v800_v43 = vmax.f32 %v779_v45, 0.0  ;;  %5969 = vmatpush3.bf16.msra.mxu1 %v1331_v58 }
  0xed   : > { %v5906_v21 = vpop.f32.mrf.mxu0 }
  0xee   : > { %v780_v25 = vadd.f32 %v751_v30, %v673_v35  ;;  %v5916_v38 = vpop.f32.mrf.mxu1  ;;  %v803_v24 = vmax.f32 %v782_v31, 0.0  ;;  %v678_v41 = vadd.f32 %v5906_v21, %v567_v20  ;;  %v1000_v30 = vsel %vm424_vm0, %v6734_v2, 0 }
  0xef   : > { %v657_v42 = vpop.f32.mrf.mxu0  ;;  %5971 = vmatmul.mubr.msk.bf16.vlgmr.msra.gmra.mxu1 %vm397_vm1, %v6725_v1 }
  0xf0   : > { %v801_v44 = vmax.f32 %v780_v25, 0.0  ;;  %v676_v59 = vadd.f32 %v657_v42, %v559_v27  ;;  %v764_v47 = vpop.f32.mrf.mxu1  ;;  %v810_v37 = vpack.c.bf16 %v803_v24, %v802_v32  ;;  %v5416_v27 = vld [vmem:[%s8205_s3 + $0x4] sm:$0x3]  ;;  %v785_v21 = vadd.f32 %v5916_v38, %v678_v41  ;;  %5974 = vmatprep.mubr.msk.bf16.mxu1 %vm397_vm1, %v6744_v5  ;;  %v5444_v32 = vld [vmem:[%s8208_s6 + $0xc] sm:$0xf] }
  0xf1   : > { %v5907_v50 = vpop.f32.mrf.mxu0  ;;  %v1221_v56 = vsel %vm424_vm0, %v5416_v27, 0 }
  0xf2   : > { %v809_v40 = vpack.c.bf16 %v801_v44, %v800_v43  ;;  %v679_v36 = vadd.f32 %v5907_v50, %v570_v49  ;;  %v5917_v39 = vpop.f32.mrf.mxu1  ;;  %v783_v35 = vadd.f32 %v764_v47, %v676_v59  ;;  %v806_v53 = vmax.f32 %v785_v21, 0.0 }
  0xf3   : > { %v660_v46 = vpop.f32.mrf.mxu0 }
  0xf4   : > { %v786_v31 = vadd.f32 %v5917_v39, %v679_v36  ;;  %v677_v48 = vadd.f32 %v660_v46, %v562_v33  ;;  %5920 = vmatprep.mubr.msk.bf16.mxu0 %vm397_vm1, %v809_v40  ;;  %v767_v34 = vpop.f32.mrf.mxu1  ;;  %v804_v52 = vmax.f32 %v783_v35, 0.0  ;;  %v8229_v40 = vmov 0.0   ;;  %v1603_v36 = vld [vmem:[%s8208_s6] sm:$0xf] }
  0xf5   : > { %5921 = vmatmul.mubr.msk.bf16.vlgmr.msra.gmra.mxu0 %vm397_vm1, %v810_v37  ;;  %393 = vst.msk [vmem:[#allocation2] sm:$0xff] %vm392_vm3, %v8229_v40  ;;  %394 = vst.msk [vmem:[#allocation2 + $0x8] sm:$0xff] %vm392_vm3, %v8229_v40  ;;  %v1653_v39 = vsel %vm1651_vm2, %v5444_v32, 0  ;;  %6349 = vmatprep.subr.msk.bf16.mxu1 %vm1651_vm2, %v1603_v36  ;;  %v1733_v35 = vsel %vm1651_vm2, %v1603_v36, 0 }
  0xf6   : > { %v784_v45 = vadd.f32 %v767_v34, %v677_v48  ;;  %5939 = vmatpush3.bf16.msra.mxu0 %v1000_v30  ;;  %v807_v51 = vmax.f32 %v786_v31, 0.0  ;;  %395 = vst.msk [vmem:[#allocation2 + $0x50] sm:$0xff] %vm392_vm3, %v8229_v40  ;;  %396 = vst.msk [vmem:[#allocation2 + $0x58] sm:$0xff] %vm392_vm3, %v8229_v40  ;;  %5989 = vmatpush3.bf16.msra.mxu1 %v1733_v35 }
  0xf7   : > { %6346 = vmatprep.subr.msk.bf16.mxu0 %vm424_vm0, %v5416_v27  ;;  %5975 = vmatmul.mubr.msk.bf16.gmra.mxu1 %vm397_vm1, %v6752_v14  ;;  %574 = vst.msk [vmem:[#allocation2 + $0x60] sm:$0xff] %vm392_vm3, %v8229_v40  ;;  %575 = vst.msk [vmem:[#allocation2 + $0x68] sm:$0xff] %vm392_vm3, %v8229_v40 }
  0xf8   : > { %v805_v2 = vmax.f32 %v784_v45, 0.0  ;;  %v812_v55 = vpack.c.bf16 %v807_v51, %v806_v53  ;;  %576 = vst.msk [vmem:[#allocation2 + $0xb0] sm:$0xff] %vm392_vm3, %v8229_v40  ;;  %577 = vst.msk [vmem:[#allocation2 + $0xb8] sm:$0xff] %vm392_vm3, %v8229_v40 }
  0xf9   : > { %681 = vst.msk [vmem:[#allocation2 + $0xc0] sm:$0xff] %vm392_vm3, %v8229_v40  ;;  %682 = vst.msk [vmem:[#allocation2 + $0xc8] sm:$0xff] %vm392_vm3, %v8229_v40 }
  0xfa   : > { %v811_v54 = vpack.c.bf16 %v805_v2, %v804_v52  ;;  %683 = vst.msk [vmem:[#allocation2 + $0x110] sm:$0xff] %vm392_vm3, %v8229_v40  ;;  %684 = vst.msk [vmem:[#allocation2 + $0x118] sm:$0xff] %vm392_vm3, %v8229_v40 }
  0xfb   : > { %788 = vst.msk [vmem:[#allocation2 + $0x120] sm:$0xff] %vm392_vm3, %v8229_v40  ;;  %789 = vst.msk [vmem:[#allocation2 + $0x128] sm:$0xff] %vm392_vm3, %v8229_v40 }
  0xfc   : > { %5924 = vmatprep.mubr.msk.bf16.mxu0 %vm397_vm1, %v811_v54  ;;  %790 = vst.msk [vmem:[#allocation2 + $0x170] sm:$0xff] %vm392_vm3, %v8229_v40  ;;  %791 = vst.msk [vmem:[#allocation2 + $0x178] sm:$0xff] %vm392_vm3, %v8229_v40 }
  0xfd   : > { %5925 = vmatmul.mubr.msk.bf16.gmra.mxu0 %vm397_vm1, %v812_v55 }
  0xfe   : > { %5940 = vmatprep.mubr.msk.bf16.mxu0 %vm397_vm1, %v6717_v62 }
 0x105   : > { %5941 = vmatmul.mubr.msk.bf16.vlgmr.msra.gmra.mxu0 %vm397_vm1, %v6725_v1 }
 0x106   : > { %5944 = vmatprep.mubr.msk.bf16.mxu0 %vm397_vm1, %v6744_v5  ;;  %5959 = vmatpush3.bf16.msra.mxu0 %v1221_v56 }
 0x107   : > { %6348 = vmatprep.subr.msk.bf16.mxu0 %vm1651_vm2, %v5444_v32 }
 0x10d   : > { %5945 = vmatmul.mubr.msk.bf16.gmra.mxu0 %vm397_vm1, %v6752_v14 }
 0x10e   : > { %5960 = vmatprep.mubr.msk.bf16.mxu0 %vm397_vm1, %v6717_v62  ;;  %v5932_v62 = vpop.f32.mrf.mxu1 }
 0x110   : > { %v943_v17 = vpop.f32.mrf.mxu1 }
 0x112   : > { %v5933_v19 = vpop.f32.mrf.mxu1 }
 0x114   : > { %v946_v25 = vpop.f32.mrf.mxu1 }
 0x115   : > { %5961 = vmatmul.mubr.msk.bf16.vlgmr.msra.gmra.mxu0 %vm397_vm1, %v6725_v1 }
 0x116   : > { %5964 = vmatprep.mubr.msk.bf16.mxu0 %vm397_vm1, %v6744_v5  ;;  %v5936_v20 = vpop.f32.mrf.mxu1  ;;  %5979 = vmatpush3.bf16.msra.mxu0 %v1653_v39 }
 0x118   : > { %v959_v5 = vpop.f32.mrf.mxu1 }
 0x11d   : > { %5965 = vmatmul.mubr.msk.bf16.gmra.mxu0 %vm397_vm1, %v6752_v14 }
 0x1b5   : > { %v5922_v38 = vpop.f32.mrf.mxu0 }
 0x1b6   : > { %v952_v24 = vadd.f32 %v5932_v62, %v5922_v38 }
 0x1b7   : > { %v863_v42 = vpop.f32.mrf.mxu0 }
 0x1b8   : > { %v976_v49 = vmax.f32 %v952_v24, 0.0  ;;  %v944_v43 = vadd.f32 %v943_v17, %v863_v42 }
 0x1b9   : > { %v5923_v1 = vpop.f32.mrf.mxu0 }
 0x1ba   : > { %v984_v14 = vadd.f32 %v976_v49, %v6719_v63  ;;  %v974_v44 = vmax.f32 %v944_v43, 0.0  ;;  %v955_v59 = vadd.f32 %v5933_v19, %v5923_v1  ;;  %v5937_v63 = vpop.f32.mrf.mxu1 }
 0x1bb   : > { %v866_v47 = vpop.f32.mrf.mxu0 }
 0x1bc   : > { %992 = vst.msk [vmem:[%s6816_s18 + $0x10] sm:$0xff] %vm397_vm1, %v984_v14  ;;  %v982_v41 = vadd.f32 %v974_v44, %v6711_v60  ;;  %v977_v50 = vmax.f32 %v955_v59, 0.0  ;;  %v947_v33 = vadd.f32 %v946_v25, %v866_v47  ;;  %v962_v45 = vpop.f32.mrf.mxu1  ;;  %v6895_v25 = vld [vmem:[%s8208_s6 + $0x4] sm:$0xf] }
 0x1bd   : > { %v5926_v60 = vpop.f32.mrf.mxu0  ;;  %6351 = vmatprep.subr.msk.bf16.mxu1 %vm1651_vm2, %v6895_v25 }
 0x1be   : > { %990 = vst.msk [vmem:[%s6816_s18] sm:$0xff] %vm397_vm1, %v982_v41  ;;  %v985_v37 = vadd.f32 %v977_v50, %v6721_v0  ;;  %v975_v46 = vmax.f32 %v947_v33, 0.0  ;;  %v968_v30 = vadd.f32 %v5936_v20, %v5926_v60  ;;  %v5952_v56 = vpop.f32.mrf.mxu1 }
 0x1bf   : > { %v879_v31 = vpop.f32.mrf.mxu0 }
 0x1c0   : > { %993 = vst.msk [vmem:[%s6816_s18 + $0x18] sm:$0xff] %vm397_vm1, %v985_v37  ;;  %v983_v48 = vadd.f32 %v975_v46, %v6713_v61  ;;  %v980_v27 = vmax.f32 %v968_v30, 0.0  ;;  %v960_v21 = vadd.f32 %v959_v5, %v879_v31  ;;  %v1147_v17 = vpop.f32.mrf.mxu1 }
 0x1c1   : > { %v5927_v34 = vpop.f32.mrf.mxu0 }
 0x1c2   : > { %991 = vst.msk [vmem:[%s6816_s18 + $0x8] sm:$0xff] %vm397_vm1, %v983_v48  ;;  %v988_v0 = vadd.f32 %v980_v27, %v6746_v9  ;;  %v978_v51 = vmax.f32 %v960_v21, 0.0  ;;  %v971_v52 = vadd.f32 %v5937_v63, %v5927_v34  ;;  %v5953_v38 = vpop.f32.mrf.mxu1 }
 0x1c3   : > { %v882_v2 = vpop.f32.mrf.mxu0 }
 0x1c4   : > { %996 = vst.msk [vmem:[%s6816_s18 + $0x30] sm:$0xff] %vm397_vm1, %v988_v0  ;;  %v986_v53 = vadd.f32 %v978_v51, %v6736_v3  ;;  %v981_v54 = vmax.f32 %v971_v52, 0.0  ;;  %v963_v61 = vadd.f32 %v962_v45, %v882_v2  ;;  %v1150_v42 = vpop.f32.mrf.mxu1  ;;  %v1591_v45 = vld [vmem:[#allocation2 + $0x7] sm:$0xff] }
 0x1c5   : > { %v5942_v55 = vpop.f32.mrf.mxu0 }
 0x1c6   : > { %994 = vst.msk [vmem:[%s6816_s18 + $0x20] sm:$0xff] %vm397_vm1, %v986_v53  ;;  %v989_v57 = vadd.f32 %v981_v54, %v6748_v13  ;;  %v979_v58 = vmax.f32 %v963_v61, 0.0  ;;  %1079 = vrot.lane.b32.xlu1 %v5942_v55, %s6403_s23  ;;  %v6890_v13 = vld [vmem:[%s8208_s6 + $0x10] sm:$0xf]  ;;  %v5956_v43 = vpop.f32.mrf.mxu1 }
 0x1c7   : > { %v1036_v9 = vpop.f32.mrf.mxu0  ;;  %6350 = vmatprep.subr.msk.bf16.mxu0 %vm1651_vm2, %v6890_v13 }
 0x1c8   : > { %997 = vst.msk [vmem:[%s6816_s18 + $0x38] sm:$0xff] %vm397_vm1, %v989_v57  ;;  %v987_v62 = vadd.f32 %v979_v58, %v6738_v4  ;;  %1075 = vrot.lane.b32.xlu0 %v1036_v9, %s6403_s23  ;;  %v1163_v5 = vpop.f32.mrf.mxu1  ;;  %v1907_v9 = vsel %vm1651_vm2, %v6895_v25, 0 }
 0x1c9   : > { %v5943_v3 = vpop.f32.mrf.mxu0 }
 0x1ca   : > { %995 = vst.msk [vmem:[%s6816_s18 + $0x28] sm:$0xff] %vm397_vm1, %v987_v62  ;;  %1081 = vrot.lane.b32.xlu1 %v5943_v3, %s6403_s23  ;;  %v5957_v44 = vpop.f32.mrf.mxu1  ;;  %v1827_v62 = vsel %vm1651_vm2, %v6890_v13, 0  ;;  %v5443_v3 = vld [vmem:[%s8208_s6 + $0x8] sm:$0xf]  ;;  %s7843_s18 = scalar_lea.vmem %s8210_s8, %s5645_s15 }
 0x1cb   : > { %v1039_v19 = vpop.f32.mrf.mxu0 }
 0x1cc   : > { %1077 = vrot.lane.b32.xlu0 %v1039_v19, %s6403_s23  ;;  %v1166_v47 = vpop.f32.mrf.mxu1 }
 0x1cd   : > { %v5946_v4 = vpop.f32.mrf.mxu0 }
 0x1ce   : > { %v5972_v63 = vpop.f32.mrf.mxu1 }
 0x1cf   : > { %v1052_v20 = vpop.f32.mrf.mxu0 }
 0x1d0   : > { %1083 = vrot.lane.b32.xlu0 %v1052_v20, %s6403_s23  ;;  %v1367_v36 = vpop.f32.mrf.mxu1 }
 0x1d1   : > { %v5947_v24 = vpop.f32.mrf.mxu0 }
 0x1d2   : > { %v5973_v39 = vpop.f32.mrf.mxu1 }
 0x1d3   : > { %v1055_v49 = vpop.f32.mrf.mxu0 }
 0x1d4   : > { %1087 = vrot.lane.b32.xlu0 %v5946_v4, %s6403_s23  ;;  %1085 = vrot.lane.b32.xlu1 %v1055_v49, %s6403_s23  ;;  %v1370_v37 = vpop.f32.mrf.mxu1 }
 0x1d5   : > { %v5962_v1 = vpop.f32.mrf.mxu0 }
 0x1d6   : > { %v5976_v46 = vpop.f32.mrf.mxu1 }
 0x1d7   : > { %v1257_v14 = vpop.f32.mrf.mxu0 }
 0x1d8   : > { %1089 = vrot.lane.b32.xlu1 %v5947_v24, %s6403_s23  ;;  %1186 = vrot.lane.b32.xlu0 %v1147_v17, %s6403_s23  ;;  %v1383_v30 = vpop.f32.mrf.mxu1  ;;  %v5462_v17 = vld [vmem:[%s8208_s6 + $0x14] sm:$0xf] }
 0x1d9   : > { %v5963_v59 = vpop.f32.mrf.mxu0 }
 0x1da   : > { %v5977_v35 = vpop.f32.mrf.mxu1 }
 0x1db   : > { %v1260_v32 = vpop.f32.mrf.mxu0 }
 0x1dc   : > { %1188 = vrot.lane.b32.xlu1 %v1150_v42, %s6403_s23  ;;  %1190 = vrot.lane.b32.xlu0 %v5952_v56, %s6403_s23  ;;  %v1386_v31 = vpop.f32.mrf.mxu1 }
 0x1dd   : > { %v5966_v41 = vpop.f32.mrf.mxu0 }
 0x1df   : > { %v1273_v50 = vpop.f32.mrf.mxu0 }
 0x1e0   : > { %1192 = vrot.lane.b32.xlu1 %v5953_v38, %s6403_s23  ;;  %1194 = vrot.lane.b32.xlu0 %v1163_v5, %s6403_s23  ;;  %v1604_v38 = vld [vmem:[#allocation2 + $0x8] sm:$0xff] }
 0x1e1   : > { %v5967_v33 = vpop.f32.mrf.mxu0 }
 0x1e3   : > { %v1276_v60 = vpop.f32.mrf.mxu0 }
 0x1e4   : > { %1196 = vrot.lane.b32.xlu1 %v1166_v47, %s6403_s23  ;;  %1198 = vrot.lane.b32.xlu0 %v5956_v43, %s6403_s23 }
 0x1e8   : > { %1200 = vrot.lane.b32.xlu1 %v5957_v44, %s6403_s23  ;;  %1296 = vrot.lane.b32.xlu0 %v1257_v14, %s6403_s23 }
 0x1ec   : > { %1298 = vrot.lane.b32.xlu1 %v1260_v32, %s6403_s23  ;;  %1300 = vrot.lane.b32.xlu0 %v5962_v1, %s6403_s23 }
 0x1f0   : > { %1302 = vrot.lane.b32.xlu1 %v5963_v59, %s6403_s23  ;;  %1304 = vrot.lane.b32.xlu0 %v1273_v50, %s6403_s23 }
 0x1f4   : > { %1306 = vrot.lane.b32.xlu1 %v1276_v60, %s6403_s23  ;;  %1308 = vrot.lane.b32.xlu0 %v5966_v41, %s6403_s23 }
 0x1f8   : > { %1310 = vrot.lane.b32.xlu1 %v5967_v33, %s6403_s23  ;;  %1406 = vrot.lane.b32.xlu0 %v1367_v36, %s6403_s23 }
 0x1fc   : > { %1408 = vrot.lane.b32.xlu1 %v1370_v37, %s6403_s23  ;;  %1410 = vrot.lane.b32.xlu0 %v5972_v63, %s6403_s23 }
 0x200   : > { %1412 = vrot.lane.b32.xlu1 %v5973_v39, %s6403_s23  ;;  %1414 = vrot.lane.b32.xlu0 %v1383_v30, %s6403_s23 }
 0x204   : > { %1416 = vrot.lane.b32.xlu1 %v1386_v31, %s6403_s23  ;;  %1418 = vrot.lane.b32.xlu0 %v5976_v46, %s6403_s23  ;;  %v2081_v46 = vsel %vm1651_vm2, %v5443_v3, 0 }
 0x208   : > { %1420 = vrot.lane.b32.xlu1 %v5977_v35, %s6403_s23  ;;  %v5476_v35 = vld [vmem:[%s8208_s6 + $0x1c] sm:$0xf] }
 0x238   : > { %v1080_v48 = vpop.permute.xlu1 %1079 }
 0x239   : > { %1102 = vst.msk [vmem:[#allocation2 + $0x20] sm:$0xff] %vm1099_vm4, %v1080_v48 }
 0x23a   : > { %v1076_v27 = vpop.permute.xlu0 %1075 }
 0x23b   : > { %1100 = vst.msk [vmem:[#allocation2 + $0x10] sm:$0xff] %vm1099_vm4, %v1076_v27 }
 0x23c   : > { %v1082_v21 = vpop.permute.xlu1 %1081 }
 0x23d   : > { %1103 = vst.msk [vmem:[#allocation2 + $0x28] sm:$0xff] %vm1099_vm4, %v1082_v21 }
 0x23e   : > { %v1078_v34 = vpop.permute.xlu0 %1077 }
 0x23f   : > { %1101 = vst.msk [vmem:[#allocation2 + $0x18] sm:$0xff] %vm1099_vm4, %v1078_v34  ;;  %v2001_v34 = vsel %vm1651_vm2, %v5462_v17, 0 }
 0x240   : > { %v1607_v60 = vld [vmem:[#allocation2 + $0x20] sm:$0xff] }
 0x242   : > { %v1084_v0 = vpop.permute.xlu0 %1083  ;;  %v1592_v51 = vld [vmem:[#allocation2 + $0xf] sm:$0xff] }
 0x243   : > { %1104 = vst.msk [vmem:[#allocation2 + $0x30] sm:$0xff] %vm1099_vm4, %v1084_v0  ;;  %v1599_v52 = vpack.c.bf16 %v1592_v51, %v1591_v45  ;;  %v1605_v20 = vld [vmem:[#allocation2 + $0x10] sm:$0xff] }
 0x244   : > { %v1595_v55 = vld [vmem:[#allocation2 + $0x27] sm:$0xff]  ;;  %v1612_v14 = vpack.c.bf16 %v1605_v20, %v1604_v38 }
 0x245   : > { %5990 = vmatprep.mubr.msk.bf16.mxu1 %vm392_vm3, %v1599_v52  ;;  %v1608_v37 = vld [vmem:[#allocation2 + $0x28] sm:$0xff] }
 0x246   : > { %v1088_v2 = vpop.permute.xlu0 %1087  ;;  %v1086_v53 = vpop.permute.xlu1 %1085  ;;  %v1593_v54 = vld [vmem:[#allocation2 + $0x17] sm:$0xff]  ;;  %v1594_v61 = vld [vmem:[#allocation2 + $0x1f] sm:$0xff]  ;;  %v1809_v21 = vpack.c.bf16 %v1608_v37, %v1607_v60 }
 0x247   : > { %1106 = vst.msk [vmem:[#allocation2 + $0x40] sm:$0xff] %vm1099_vm4, %v1088_v2  ;;  %1105 = vst.msk [vmem:[#allocation2 + $0x38] sm:$0xff] %vm1099_vm4, %v1086_v53  ;;  %v6938_v56 = vpack.c.bf16 %v1594_v61, %v1593_v54  ;;  %v1633_v57 = vpack.c.bf16 %v1593_v54, %v1592_v51  ;;  %v1634_v58 = vpack.c.bf16 %v1595_v55, %v1594_v61  ;;  %v1801_v44 = vld [vmem:[#allocation2 + $0x18] sm:$0xff]  ;;  %v1618_v61 = vld [vmem:[#allocation2 + $0x9] sm:$0xff] }
 0x248   : > { %v1808_v50 = vpack.c.bf16 %v1801_v44, %v1605_v20  ;;  %v6977_v39 = vpack.c.bf16 %v1607_v60, %v1801_v44  ;;  %v5471_v51 = vld [vmem:[%s8208_s6 + $0x18] sm:$0xf] }
 0x249   : > { %5980 = vmatprep.mubr.msk.bf16.mxu0 %vm392_vm3, %v1633_v57  ;;  %5991 = vmatmul.mubr.msk.bf16.vlgmr.msra.gmra.mxu1 %vm392_vm3, %v6938_v56  ;;  %v1619_v52 = vld [vmem:[#allocation2 + $0x11] sm:$0xff] }
 0x24a   : > { %5981 = vmatmul.mubr.msk.bf16.vlgmr.msra.gmra.mxu0 %vm392_vm3, %v1634_v58  ;;  %v1090_v19 = vpop.permute.xlu1 %1089  ;;  %v1596_v25 = vld [vmem:[#allocation2 + $0x2f] sm:$0xff]  ;;  %6009 = vmatpush3.bf16.msra.mxu1 %v1907_v9  ;;  %v1187_v4 = vpop.permute.xlu0 %1186  ;;  %v1975_v58 = vld [vmem:[#allocation2 + $0x19] sm:$0xff] }
 0x24b   : > { %1107 = vst.msk [vmem:[#allocation2 + $0x48] sm:$0xff] %vm1099_vm4, %v1090_v19  ;;  %v6955_v13 = vpack.c.bf16 %v1596_v25, %v1595_v55  ;;  %5999 = vmatpush3.bf16.msra.mxu0 %v1827_v62  ;;  %6353 = vmatprep.subr.msk.bf16.mxu1 %vm1651_vm2, %v5443_v3  ;;  %1210 = vst.msk [vmem:[#allocation2 + $0x70] sm:$0xff] %vm1099_vm4, %v1187_v4  ;;  %v1609_v33 = vld [vmem:[#allocation2 + $0x30] sm:$0xff]  ;;  %v1626_v55 = vpack.c.bf16 %v1619_v52, %v1618_v61 }
 0x24c   : > { %6352 = vmatprep.subr.msk.bf16.mxu0 %vm1651_vm2, %v5462_v17  ;;  %v6982_v30 = vpack.c.bf16 %v1609_v33, %v1608_v37  ;;  %v1982_v17 = vpack.c.bf16 %v1975_v58, %v1619_v52  ;;  %v5497_v37 = vld [vmem:[%s8208_s6 + $0x10] sm:$0xf] }
 0x24d   : > { %5994 = vmatprep.mubr.msk.bf16.mxu1 %vm392_vm3, %v6955_v13  ;;  %v2741_v61 = vsel %vm1651_vm2, %v5497_v37, 0 }
 0x24e   : > { %v1597_v24 = vld [vmem:[#allocation2 + $0x37] sm:$0xff]  ;;  %v1598_v42 = vld [vmem:[#allocation2 + $0x3f] sm:$0xff]  ;;  %v1189_v49 = vpop.permute.xlu1 %1188  ;;  %v1191_v43 = vpop.permute.xlu0 %1190 }
 0x24f   : > { %v1635_v1 = vpack.c.bf16 %v1597_v24, %v1596_v25  ;;  %v6962_v5 = vpack.c.bf16 %v1598_v42, %v1597_v24  ;;  %1211 = vst.msk [vmem:[#allocation2 + $0x78] sm:$0xff] %vm1099_vm4, %v1189_v49  ;;  %1212 = vst.msk [vmem:[#allocation2 + $0x80] sm:$0xff] %vm1099_vm4, %v1191_v43  ;;  %v1805_v31 = vld [vmem:[#allocation2 + $0x38] sm:$0xff]  ;;  %v1611_v0 = vld [vmem:[#allocation2 + $0x40] sm:$0xff] }
 0x250   : > { %v1810_v45 = vpack.c.bf16 %v1805_v31, %v1609_v33  ;;  %v1615_v54 = vpack.c.bf16 %v1611_v0, %v1805_v31  ;;  %v1623_v19 = vld [vmem:[#allocation2 + $0x31] sm:$0xff]  ;;  %v1621_v25 = vld [vmem:[#allocation2 + $0x21] sm:$0xff]  ;;  %v1622_v24 = vld [vmem:[#allocation2 + $0x29] sm:$0xff] }
 0x251   : > { %5984 = vmatprep.mubr.msk.bf16.mxu0 %vm392_vm3, %v1635_v1  ;;  %5995 = vmatmul.mubr.msk.bf16.gmra.mxu1 %vm392_vm3, %v6962_v5  ;;  %v7012_v20 = vpack.c.bf16 %v1621_v25, %v1975_v58  ;;  %v7017_v49 = vpack.c.bf16 %v1623_v19, %v1622_v24  ;;  %v5488_v43 = vld [vmem:[%s8208_s6 + $0xc] sm:$0xf]  ;;  %v1979_v1 = vld [vmem:[#allocation2 + $0x39] sm:$0xff]  ;;  %v1983_v44 = vpack.c.bf16 %v1622_v24, %v1621_v25 }
 0x252   : > { %6010 = vmatprep.mubr.msk.bf16.mxu1 %vm392_vm3, %v1612_v14  ;;  %v6970_v59 = vld [vmem:[#allocation2 + $0x47] sm:$0xff]  ;;  %v1193_v47 = vpop.permute.xlu1 %1192  ;;  %v1195_v32 = vpop.permute.xlu0 %1194  ;;  %v2522_v31 = vld [vmem:[%s8208_s6] sm:$0xf] }
 0x253   : > { %v1636_v41 = vpack.c.bf16 %v6970_v59, %v1598_v42  ;;  %1213 = vst.msk [vmem:[#allocation2 + $0x88] sm:$0xff] %vm1099_vm4, %v1193_v47  ;;  %1214 = vst.msk [vmem:[#allocation2 + $0x90] sm:$0xff] %vm1099_vm4, %v1195_v32  ;;  %v7003_v57 = vld [vmem:[#allocation2 + $0x48] sm:$0xff]  ;;  %v2277_v42 = vsel %vm1651_vm2, %v5476_v35, 0  ;;  %v2175_v47 = vsel %vm1651_vm2, %v5471_v51, 0  ;;  %v1984_v32 = vpack.c.bf16 %v1979_v1, %v1623_v19 }
 0x254   : > { %v1811_v3 = vpack.c.bf16 %v7003_v57, %v1611_v0  ;;  %v7037_v60 = vld [vmem:[#allocation2 + $0x49] sm:$0xff]  ;;  %v2648_v58 = vsel %vm1651_vm2, %v2522_v31, 0 }
 0x255   : > { %5985 = vmatmul.mubr.msk.bf16.gmra.mxu0 %vm392_vm3, %v1636_v41  ;;  %v1625_v41 = vld [vmem:[#allocation2 + $0x41] sm:$0xff] }
 0x256   : > { %6000 = vmatprep.mubr.msk.bf16.mxu0 %vm392_vm3, %v1808_v50  ;;  %v1197_v63 = vpop.permute.xlu1 %1196  ;;  %v1199_v36 = vpop.permute.xlu0 %1198  ;;  %v5481_v50 = vld [vmem:[%s8208_s6 + $0x20] sm:$0xf]  ;;  %v7034_v33 = vpack.c.bf16 %v1625_v41, %v1979_v1  ;;  %v2716_v19 = vld [vmem:[#allocation2 + $0x78] sm:$0xff] }
 0x257   : > { %1215 = vst.msk [vmem:[#allocation2 + $0x98] sm:$0xff] %vm1099_vm4, %v1197_v63  ;;  %1216 = vst.msk [vmem:[#allocation2 + $0xa0] sm:$0xff] %vm1099_vm4, %v1199_v36  ;;  %v1985_v63 = vpack.c.bf16 %v7037_v60, %v1625_v41  ;;  %v2568_v36 = vsel %vm1651_vm2, %v5488_v43, 0  ;;  %v2717_v1 = vld [vmem:[#allocation2 + $0x80] sm:$0xff] }
 0x259   : > { %6011 = vmatmul.mubr.msk.bf16.vlgmr.msra.gmra.mxu1 %vm392_vm3, %v6977_v39 }
 0x25a   : > { %6014 = vmatprep.mubr.msk.bf16.mxu1 %vm392_vm3, %v6982_v30  ;;  %6029 = vmatpush3.bf16.msra.mxu1 %v2081_v46  ;;  %v1201_v48 = vpop.permute.xlu1 %1200  ;;  %v1297_v27 = vpop.permute.xlu0 %1296  ;;  %v7055_v46 = vld [vmem:[#allocation2 + $0x6f] sm:$0xff]  ;;  %v2514_v0 = vld [vmem:[#allocation2 + $0x87] sm:$0xff] }
 0x25b   : > { %6355 = vmatprep.subr.msk.bf16.mxu1 %vm1651_vm2, %v5476_v35  ;;  %1217 = vst.msk [vmem:[#allocation2 + $0xa8] sm:$0xff] %vm1099_vm4, %v1201_v48  ;;  %1320 = vst.msk [vmem:[#allocation2 + $0xd0] sm:$0xff] %vm1099_vm4, %v1297_v27  ;;  %v7057_v35 = vld [vmem:[#allocation2 + $0x77] sm:$0xff] }
 0x25d   : > { %6001 = vmatmul.mubr.msk.bf16.vlgmr.msra.gmra.mxu0 %vm392_vm3, %v1809_v21  ;;  %v2155_v21 = vld [vmem:[#allocation2 + $0x4f] sm:$0xff] }
 0x25e   : > { %6019 = vmatpush3.bf16.msra.mxu0 %v2001_v34  ;;  %6004 = vmatprep.mubr.msk.bf16.mxu0 %vm392_vm3, %v1810_v45  ;;  %v1299_v2 = vpop.permute.xlu1 %1298  ;;  %v1301_v53 = vpop.permute.xlu0 %1300  ;;  %v2513_v45 = vld [vmem:[#allocation2 + $0x7f] sm:$0xff]  ;;  %v7078_v52 = vld [vmem:[#allocation2 + $0x97] sm:$0xff] }
 0x25f   : > { %6354 = vmatprep.subr.msk.bf16.mxu0 %vm1651_vm2, %v5471_v51  ;;  %1321 = vst.msk [vmem:[#allocation2 + $0xd8] sm:$0xff] %vm1099_vm4, %v1299_v2  ;;  %1322 = vst.msk [vmem:[#allocation2 + $0xe0] sm:$0xff] %vm1099_vm4, %v1301_v53  ;;  %v2515_v51 = vld [vmem:[#allocation2 + $0x8f] sm:$0xff] }
 0x261   : > { %6015 = vmatmul.mubr.msk.bf16.gmra.mxu1 %vm392_vm3, %v1615_v54 }
 0x262   : > { %6030 = vmatprep.mubr.msk.bf16.mxu1 %vm392_vm3, %v1626_v55  ;;  %v1303_v9 = vpop.permute.xlu1 %1302  ;;  %v1305_v62 = vpop.permute.xlu0 %1304  ;;  %v5506_v55 = vld [vmem:[%s8208_s6 + $0x14] sm:$0xf] }
 0x263   : > { %1323 = vst.msk [vmem:[#allocation2 + $0xe8] sm:$0xff] %vm1099_vm4, %v1303_v9  ;;  %1324 = vst.msk [vmem:[#allocation2 + $0xf0] sm:$0xff] %vm1099_vm4, %v1305_v62  ;;  %v2517_v9 = vld [vmem:[#allocation2 + $0x9f] sm:$0xff]  ;;  %v7094_v62 = vld [vmem:[#allocation2 + $0xa7] sm:$0xff]  ;;  %v2914_v41 = vsel %vm1651_vm2, %v5506_v55, 0 }
 0x264   : > { %v2553_v25 = vpack.c.bf16 %v7094_v62, %v2517_v9 }
 0x265   : > { %6005 = vmatmul.mubr.msk.bf16.gmra.mxu0 %vm392_vm3, %v1811_v3  ;;  %v5486_v3 = vld [vmem:[%s8208_s6 + $0x4] sm:$0xf] }
 0x266   : > { %6020 = vmatprep.mubr.msk.bf16.mxu0 %vm392_vm3, %v1982_v17  ;;  %v1307_v4 = vpop.permute.xlu1 %1306  ;;  %v1309_v38 = vpop.permute.xlu0 %1308  ;;  %v2715_v17 = vld [vmem:[#allocation2 + $0x70] sm:$0xff] }
 0x267   : > { %1325 = vst.msk [vmem:[#allocation2 + $0xf8] sm:$0xff] %vm1099_vm4, %v1307_v4  ;;  %1326 = vst.msk [vmem:[#allocation2 + $0x100] sm:$0xff] %vm1099_vm4, %v1309_v38  ;;  %v2723_v4 = vpack.c.bf16 %v2716_v19, %v2715_v17  ;;  %v2359_v38 = vld [vmem:[#allocation2 + $0x51] sm:$0xff] }
 0x269   : > { %6031 = vmatmul.mubr.msk.bf16.vlgmr.msra.gmra.mxu1 %vm392_vm3, %v7012_v20 }
 0x26a   : > { %6034 = vmatprep.mubr.msk.bf16.mxu1 %vm392_vm3, %v7017_v49  ;;  %6049 = vmatpush3.bf16.msra.mxu1 %v2277_v42  ;;  %v1311_v14 = vpop.permute.xlu1 %1310  ;;  %v1407_v48 = vpop.permute.xlu0 %1406 }
 0x26b   : > { %6357 = vmatprep.subr.msk.bf16.mxu1 %vm1651_vm2, %v5488_v43  ;;  %1327 = vst.msk [vmem:[#allocation2 + $0x108] sm:$0xff] %vm1099_vm4, %v1311_v14  ;;  %1430 = vst.msk [vmem:[#allocation2 + $0x130] sm:$0xff] %vm1099_vm4, %v1407_v48  ;;  %v2718_v14 = vld [vmem:[#allocation2 + $0x88] sm:$0xff] }
 0x26c   : > { %v2523_v48 = vld [vmem:[#allocation2 + $0x68] sm:$0xff] }
 0x26d   : > { %6021 = vmatmul.mubr.msk.bf16.vlgmr.msra.gmra.mxu0 %vm392_vm3, %v1983_v44  ;;  %v2720_v44 = vld [vmem:[#allocation2 + $0x98] sm:$0xff] }
 0x26e   : > { %6039 = vmatpush3.bf16.msra.mxu0 %v2175_v47  ;;  %6024 = vmatprep.mubr.msk.bf16.mxu0 %vm392_vm3, %v1984_v32  ;;  %v1409_v34 = vpop.permute.xlu1 %1408  ;;  %v2724_v47 = vpack.c.bf16 %v2718_v14, %v2717_v1  ;;  %v2719_v32 = vld [vmem:[#allocation2 + $0x90] sm:$0xff] }
 0x26f   : > { %6356 = vmatprep.subr.msk.bf16.mxu0 %vm1651_vm2, %v5481_v50  ;;  %1431 = vst.msk [vmem:[#allocation2 + $0x138] sm:$0xff] %vm1099_vm4, %v1409_v34  ;;  %v2890_v34 = vld [vmem:[#allocation2 + $0x81] sm:$0xff] }
 0x271   : > { %6035 = vmatmul.mubr.msk.bf16.gmra.mxu1 %vm392_vm3, %v7034_v33 }
 0x272   : > { %6050 = vmatprep.mubr.msk.bf16.mxu1 %vm392_vm3, %v6977_v39  ;;  %v2379_v39 = vsel %vm1651_vm2, %v5481_v50, 0  ;;  %v1413_v2 = vpop.permute.xlu1 %1412  ;;  %v2725_v50 = vpack.c.bf16 %v2720_v44, %v2719_v32 }
 0x273   : > { %1433 = vst.msk [vmem:[#allocation2 + $0x148] sm:$0xff] %vm1099_vm4, %v1413_v2 }
 0x275   : > { %6025 = vmatmul.mubr.msk.bf16.gmra.mxu0 %vm392_vm3, %v1985_v63  ;;  %v2821_v63 = vsel %vm1651_vm2, %v5486_v3, 0 }
 0x276   : > { %6040 = vmatprep.mubr.msk.bf16.mxu0 %vm392_vm3, %v6938_v56  ;;  %v2257_v56 = vld [vmem:[#allocation2 + $0x50] sm:$0xff] }
 0x277   : > { %v2261_v27 = vpack.c.bf16 %v2257_v56, %v7003_v57  ;;  %v1417_v57 = vpop.permute.xlu1 %1416  ;;  %v2888_v56 = vld [vmem:[#allocation2 + $0x71] sm:$0xff] }
 0x278   : > { %1435 = vst.msk [vmem:[#allocation2 + $0x158] sm:$0xff] %vm1099_vm4, %v1417_v57  ;;  %v5520_v57 = vld [vmem:[%s8208_s6 + $0x1c] sm:$0xf] }
 0x279   : > { %6051 = vmatmul.mubr.msk.bf16.vlgmr.msra.gmra.mxu1 %vm392_vm3, %v6982_v30  ;;  %v2550_v30 = vpack.c.bf16 %v7057_v35, %v7055_v46 }
 0x27a   : > { %6054 = vmatprep.mubr.msk.bf16.mxu1 %vm392_vm3, %v1615_v54  ;;  %6069 = vmatpush3.bf16.msra.mxu1 %v2568_v36  ;;  %v2551_v54 = vpack.c.bf16 %v2514_v0, %v2513_v45  ;;  %v2520_v36 = vpack.c.bf16 %v2515_v51, %v2514_v0  ;;  %v2892_v0 = vld [vmem:[#allocation2 + $0x91] sm:$0xff] }
 0x27b   : > { %6359 = vmatprep.subr.msk.bf16.mxu1 %vm1651_vm2, %v5497_v37  ;;  %v1421_v42 = vpop.permute.xlu1 %1420  ;;  %v2721_v37 = vld [vmem:[#allocation2 + $0xa0] sm:$0xff] }
 0x27c   : > { %1437 = vst.msk [vmem:[#allocation2 + $0x168] sm:$0xff] %vm1099_vm4, %v1421_v42  ;;  %v5540_v42 = vld [vmem:[%s8208_s6 + $0xc] sm:$0xf] }
 0x27d   : > { %6041 = vmatmul.mubr.msk.bf16.vlgmr.msra.gmra.mxu0 %vm392_vm3, %v6955_v13  ;;  %v1411_v13 = vpop.permute.xlu0 %1410 }
 0x27e   : > { %6059 = vmatpush3.bf16.msra.mxu0 %v2379_v39  ;;  %6044 = vmatprep.mubr.msk.bf16.mxu0 %vm392_vm3, %v6962_v5  ;;  %v2159_v5 = vpack.c.bf16 %v2155_v21, %v6970_v59  ;;  %1432 = vst.msk [vmem:[#allocation2 + $0x140] sm:$0xff] %vm1099_vm4, %v1411_v13  ;;  %v2552_v59 = vpack.c.bf16 %v7078_v52, %v2515_v51  ;;  %v7122_v39 = vld [vmem:[#allocation2 + $0xa8] sm:$0xff] }
 0x27f   : > { %6358 = vmatprep.subr.msk.bf16.mxu0 %vm1651_vm2, %v2522_v31  ;;  %v2889_v31 = vld [vmem:[#allocation2 + $0x79] sm:$0xff]  ;;  %v2531_v21 = vpack.c.bf16 %v2715_v17, %v2523_v48  ;;  %v2891_v13 = vld [vmem:[#allocation2 + $0x89] sm:$0xff] }
 0x281   : > { %6055 = vmatmul.mubr.msk.bf16.gmra.mxu1 %vm392_vm3, %v2261_v27  ;;  %v1415_v53 = vpop.permute.xlu0 %1414  ;;  %v2521_v27 = vpack.c.bf16 %v2517_v9, %v7078_v52  ;;  %v2532_v52 = vpack.c.bf16 %v2717_v1, %v2716_v19  ;;  %v2536_v9 = vld [vmem:[#allocation2 + $0x69] sm:$0xff] }
 0x282   : > { %6070 = vmatprep.mubr.msk.bf16.mxu1 %vm392_vm3, %v2550_v30  ;;  %1434 = vst.msk [vmem:[#allocation2 + $0x150] sm:$0xff] %vm1099_vm4, %v1415_v53  ;;  %v2896_v30 = vpack.c.bf16 %v2889_v31, %v2888_v56  ;;  %v5525_v53 = vld [vmem:[%s8208_s6 + $0x20] sm:$0xf]  ;;  %v2544_v17 = vpack.c.bf16 %v2888_v56, %v2536_v9  ;;  %v3425_v56 = vld [vmem:[#allocation2 + $0xe7] sm:$0xff] }
 0x283   : > { %v3289_v19 = vsel %vm1651_vm2, %v5525_v53, 0 }
 0x285   : > { %6045 = vmatmul.mubr.msk.bf16.gmra.mxu0 %vm392_vm3, %v2159_v5  ;;  %v1419_v24 = vpop.permute.xlu0 %1418  ;;  %v2893_v5 = vld [vmem:[#allocation2 + $0x99] sm:$0xff] }
 0x286   : > { %6060 = vmatprep.mubr.msk.bf16.mxu0 %vm392_vm3, %v7012_v20  ;;  %v2510_v20 = vld [vmem:[#allocation2 + $0x67] sm:$0xff]  ;;  %1436 = vst.msk [vmem:[#allocation2 + $0x160] sm:$0xff] %vm1099_vm4, %v1419_v24  ;;  %v2898_v2 = vpack.c.bf16 %v2893_v5, %v2892_v0  ;;  %v3068_v24 = vld [vmem:[#allocation2 + $0xaf] sm:$0xff]  ;;  %v7460_v11 = vld [vmem:[#allocation2 + $0x139] sm:$0xff] }
 0x287   : > { %v2518_v43 = vpack.c.bf16 %v7055_v46, %v2510_v20  ;;  %v5487_v46 = vld [vmem:[%s8208_s6 + $0x8] sm:$0xf]  ;;  %v2546_v20 = vpack.c.bf16 %v2892_v0, %v2891_v13 }
 0x288   : > { %v3434_v0 = vld [vmem:[#allocation2 + $0xc8] sm:$0xff] }
 0x289   : > { %6071 = vmatmul.mubr.msk.bf16.vlgmr.msra.gmra.mxu1 %vm392_vm3, %v2551_v54  ;;  %v2994_v54 = vsel %vm1651_vm2, %v5487_v46, 0 }
 0x28a   : > { %6074 = vmatprep.mubr.msk.bf16.mxu1 %vm392_vm3, %v2552_v59  ;;  %6089 = vmatpush3.bf16.msra.mxu1 %v2741_v61  ;;  %v2533_v61 = vpack.c.bf16 %v2719_v32, %v2718_v14  ;;  %v2894_v59 = vld [vmem:[#allocation2 + $0xa1] sm:$0xff]  ;;  %v3270_v32 = vld [vmem:[#allocation2 + $0xb1] sm:$0xff] }
 0x28b   : > { %6361 = vmatprep.subr.msk.bf16.mxu1 %vm1651_vm2, %v5506_v55  ;;  %v2895_v55 = vld [vmem:[#allocation2 + $0xa9] sm:$0xff]  ;;  %v5538_v14 = vld [vmem:[%s8208_s6 + $0x4] sm:$0xf] }
 0x28d   : > { %6061 = vmatmul.mubr.msk.bf16.vlgmr.msra.gmra.mxu0 %vm392_vm3, %v7017_v49  ;;  %v2363_v49 = vpack.c.bf16 %v2359_v38, %v7037_v60  ;;  %v2519_v60 = vpack.c.bf16 %v2513_v45, %v7057_v35  ;;  %v2726_v35 = vpack.c.bf16 %v7122_v39, %v2721_v37  ;;  %v2897_v45 = vpack.c.bf16 %v2891_v13, %v2890_v34  ;;  %v3428_v13 = vld [vmem:[#allocation2 + $0xff] sm:$0xff] }
 0x28e   : > { %6079 = vmatpush3.bf16.msra.mxu0 %v2648_v58  ;;  %6064 = vmatprep.mubr.msk.bf16.mxu0 %vm392_vm3, %v7034_v33  ;;  %v5515_v33 = vld [vmem:[%s8208_s6 + $0x18] sm:$0xf]  ;;  %v2899_v58 = vpack.c.bf16 %v2895_v55, %v2894_v59  ;;  %v3188_v38 = vsel %vm1651_vm2, %v5520_v57, 0 }
 0x28f   : > { %6360 = vmatprep.subr.msk.bf16.mxu0 %vm1651_vm2, %v5486_v3  ;;  %v3087_v51 = vsel %vm1651_vm2, %v5515_v33, 0  ;;  %v2534_v3 = vpack.c.bf16 %v2721_v37, %v2720_v44  ;;  %v3421_v44 = vld [vmem:[#allocation2 + $0xc7] sm:$0xff]  ;;  %v3424_v37 = vld [vmem:[#allocation2 + $0xdf] sm:$0xff] }
 0x291   : > { %6075 = vmatmul.mubr.msk.bf16.gmra.mxu1 %vm392_vm3, %v2553_v25  ;;  %v3433_v25 = vld [vmem:[%s8208_s6] sm:$0xf] }
 0x292   : > { %6090 = vmatprep.mubr.msk.bf16.mxu1 %vm392_vm3, %v2723_v4  ;;  %v2545_v4 = vpack.c.bf16 %v2890_v34, %v2889_v31  ;;  %v3559_v1 = vsel %vm1651_vm2, %v3433_v25, 0  ;;  %v3426_v31 = vld [vmem:[#allocation2 + $0xef] sm:$0xff] }
 0x293   : > { %v7195_v48 = vpack.c.bf16 %v3426_v31, %v3425_v56 }
 0x295   : > { %6065 = vmatmul.mubr.msk.bf16.gmra.mxu0 %vm392_vm3, %v2363_v49  ;;  %v3072_v49 = vpack.c.bf16 %v3068_v24, %v7094_v62  ;;  %v3479_v62 = vsel %vm1651_vm2, %v5540_v42, 0  ;;  %v3441_v24 = vld [vmem:[#allocation2 + $0x100] sm:$0xff] }
 0x296   : > { %6080 = vmatprep.mubr.msk.bf16.mxu0 %vm392_vm3, %v2518_v43  ;;  %v2547_v43 = vpack.c.bf16 %v2894_v59, %v2893_v5 }
 0x299   : > { %6091 = vmatmul.mubr.msk.bf16.vlgmr.msra.gmra.mxu1 %vm392_vm3, %v2724_v47  ;;  %v3422_v47 = vld [vmem:[#allocation2 + $0xcf] sm:$0xff] }
 0x29a   : > { %6094 = vmatprep.mubr.msk.bf16.mxu1 %vm392_vm3, %v2725_v50  ;;  %6109 = vmatpush3.bf16.msra.mxu1 %v2914_v41  ;;  %v5549_v41 = vld [vmem:[%s8208_s6 + $0x10] sm:$0xf]  ;;  %v3429_v50 = vpack.c.bf16 %v3422_v47, %v3421_v44  ;;  %v3800_v44 = vld [vmem:[#allocation2 + $0xd9] sm:$0xff] }
 0x29b   : > { %6363 = vmatprep.subr.msk.bf16.mxu1 %vm1651_vm2, %v5515_v33  ;;  %v3274_v33 = vpack.c.bf16 %v3270_v32, %v2895_v55  ;;  %v3652_v34 = vsel %vm1651_vm2, %v5549_v41, 0  ;;  %v3437_v55 = vld [vmem:[#allocation2 + $0xe0] sm:$0xff] }
 0x29d   : > { %6081 = vmatmul.mubr.msk.bf16.vlgmr.msra.gmra.mxu0 %vm392_vm3, %v2519_v60 }
 0x29e   : > { %6099 = vmatpush3.bf16.msra.mxu0 %v2821_v63  ;;  %6084 = vmatprep.mubr.msk.bf16.mxu0 %vm392_vm3, %v2520_v36  ;;  %v3423_v63 = vld [vmem:[#allocation2 + $0xd7] sm:$0xff] }
 0x29f   : > { %6362 = vmatprep.subr.msk.bf16.mxu0 %vm1651_vm2, %v5487_v46  ;;  %v3461_v46 = vpack.c.bf16 %v3423_v63, %v3422_v47 }
 0x2a1   : > { %6095 = vmatmul.mubr.msk.bf16.gmra.mxu1 %vm392_vm3, %v2726_v35  ;;  %v7192_v35 = vpack.c.bf16 %v3424_v37, %v3423_v63 }
 0x2a2   : > { %6110 = vmatprep.mubr.msk.bf16.mxu1 %vm392_vm3, %v2896_v30  ;;  %v3732_v30 = vsel %vm1651_vm2, %v5538_v14, 0 }
 0x2a5   : > { %6085 = vmatmul.mubr.msk.bf16.gmra.mxu0 %vm392_vm3, %v2521_v27 }
 0x2a6   : > { %6100 = vmatprep.mubr.msk.bf16.mxu0 %vm392_vm3, %v2531_v21  ;;  %v3462_v21 = vpack.c.bf16 %v3425_v56, %v3424_v37  ;;  %v5592_v37 = vld [vmem:[%s8208_s6 + $0xc] sm:$0xf] }
 0x2a9   : > { %6111 = vmatmul.mubr.msk.bf16.vlgmr.msra.gmra.mxu1 %vm392_vm3, %v2897_v45  ;;  %v5558_v45 = vld [vmem:[%s8208_s6 + $0x14] sm:$0xf] }
 0x2aa   : > { %6114 = vmatprep.mubr.msk.bf16.mxu1 %vm392_vm3, %v2898_v2  ;;  %6129 = vmatpush3.bf16.msra.mxu1 %v3087_v51  ;;  %v3435_v51 = vld [vmem:[#allocation2 + $0xd0] sm:$0xff] }
 0x2ab   : > { %6365 = vmatprep.subr.msk.bf16.mxu1 %vm1651_vm2, %v5525_v53  ;;  %v7214_v53 = vld [vmem:[#allocation2 + $0x107] sm:$0xff] }
 0x2ad   : > { %6101 = vmatmul.mubr.msk.bf16.vlgmr.msra.gmra.mxu0 %vm392_vm3, %v2532_v52 }
 0x2ae   : > { %6119 = vmatpush3.bf16.msra.mxu0 %v2994_v54  ;;  %6104 = vmatprep.mubr.msk.bf16.mxu0 %vm392_vm3, %v2533_v61  ;;  %v3627_v54 = vld [vmem:[#allocation2 + $0xd8] sm:$0xff] }
 0x2af   : > { %6364 = vmatprep.subr.msk.bf16.mxu0 %vm1651_vm2, %v5520_v57  ;;  %v3634_v59 = vpack.c.bf16 %v3627_v54, %v3435_v51  ;;  %v3438_v57 = vld [vmem:[#allocation2 + $0xe8] sm:$0xff]  ;;  %v3443_v9 = vpack.c.bf16 %v3437_v55, %v3627_v54 }
 0x2b1   : > { %6115 = vmatmul.mubr.msk.bf16.gmra.mxu1 %vm392_vm3, %v2899_v58  ;;  %v3439_v58 = vld [vmem:[#allocation2 + $0xf0] sm:$0xff] }
 0x2b2   : > { %6130 = vmatprep.mubr.msk.bf16.mxu1 %vm392_vm3, %v2519_v60  ;;  %v3169_v60 = vld [vmem:[#allocation2 + $0xb0] sm:$0xff] }
 0x2b5   : > { %6105 = vmatmul.mubr.msk.bf16.gmra.mxu0 %vm392_vm3, %v2534_v3 }
 0x2b6   : > { %6120 = vmatprep.mubr.msk.bf16.mxu0 %vm392_vm3, %v2544_v17  ;;  %v3444_v17 = vpack.c.bf16 %v3439_v58, %v3438_v57 }
 0x2b9   : > { %6131 = vmatmul.mubr.msk.bf16.vlgmr.msra.gmra.mxu1 %vm392_vm3, %v2520_v36  ;;  %v3173_v36 = vpack.c.bf16 %v3169_v60, %v7122_v39  ;;  %v3427_v39 = vld [vmem:[#allocation2 + $0xf7] sm:$0xff] }
 0x2ba   : > { %6134 = vmatprep.mubr.msk.bf16.mxu1 %vm392_vm3, %v2521_v27  ;;  %6149 = vmatpush3.bf16.msra.mxu1 %v3289_v19  ;;  %v5539_v27 = vld [vmem:[%s8208_s6 + $0x8] sm:$0xf]  ;;  %v3463_v5 = vpack.c.bf16 %v3427_v39, %v3426_v31  ;;  %v7211_v2 = vpack.c.bf16 %v3428_v13, %v3427_v39  ;;  %v5572_v19 = vld [vmem:[%s8208_s6 + $0x1c] sm:$0xf]  ;;  %v5577_v39 = vld [vmem:[%s8208_s6 + $0x20] sm:$0xf] }
 0x2bb   : > { %6367 = vmatprep.subr.msk.bf16.mxu1 %vm1651_vm2, %v3433_v25  ;;  %v3631_v25 = vld [vmem:[#allocation2 + $0xf8] sm:$0xff]  ;;  %v4099_v63 = vsel %vm1651_vm2, %v5572_v19, 0  ;;  %v4200_v54 = vsel %vm1651_vm2, %v5577_v39, 0 }
 0x2bd   : > { %6121 = vmatmul.mubr.msk.bf16.vlgmr.msra.gmra.mxu0 %vm392_vm3, %v2545_v4 }
 0x2be   : > { %6139 = vmatpush3.bf16.msra.mxu0 %v3188_v38  ;;  %6124 = vmatprep.mubr.msk.bf16.mxu0 %vm392_vm3, %v2546_v20  ;;  %v3825_v38 = vsel %vm1651_vm2, %v5558_v45, 0 }
 0x2bf   : > { %6366 = vmatprep.subr.msk.bf16.mxu0 %vm1651_vm2, %v5540_v42  ;;  %v5567_v42 = vld [vmem:[%s8208_s6 + $0x18] sm:$0xf] }
 0x2c0   : > { %v3998_v31 = vsel %vm1651_vm2, %v5567_v42, 0 }
 0x2c1   : > { %6135 = vmatmul.mubr.msk.bf16.gmra.mxu1 %vm392_vm3, %v3072_v49  ;;  %v3447_v49 = vld [vmem:[#allocation2 + $0xc9] sm:$0xff] }
 0x2c2   : > { %6150 = vmatprep.mubr.msk.bf16.mxu1 %vm392_vm3, %v2545_v4  ;;  %v3635_v4 = vpack.c.bf16 %v3438_v57, %v3437_v55  ;;  %v4080_v55 = vld [vmem:[#allocation2 + $0x110] sm:$0xff]  ;;  %v4344_v57 = vld [vmem:[%s8208_s6] sm:$0xf] }
 0x2c5   : > { %6125 = vmatmul.mubr.msk.bf16.gmra.mxu0 %vm392_vm3, %v2547_v43 }
 0x2c6   : > { %6140 = vmatprep.mubr.msk.bf16.mxu0 %vm392_vm3, %v2532_v52  ;;  %v3442_v52 = vpack.c.bf16 %v3435_v51, %v3434_v0 }
 0x2c9   : > { %6151 = vmatmul.mubr.msk.bf16.vlgmr.msra.gmra.mxu1 %vm392_vm3, %v2546_v20  ;;  %v3636_v20 = vpack.c.bf16 %v3631_v25, %v3439_v58 }
 0x2ca   : > { %6154 = vmatprep.mubr.msk.bf16.mxu1 %vm392_vm3, %v2547_v43  ;;  %6169 = vmatpush3.bf16.msra.mxu1 %v3559_v1  ;;  %v3448_v43 = vld [vmem:[#allocation2 + $0xd1] sm:$0xff]  ;;  %v3445_v1 = vpack.c.bf16 %v3441_v24, %v3631_v25 }
 0x2cb   : > { %6369 = vmatprep.subr.msk.bf16.mxu1 %vm1651_vm2, %v5538_v14  ;;  %v3455_v14 = vpack.c.bf16 %v3448_v43, %v3447_v49  ;;  %v3807_v32 = vpack.c.bf16 %v3800_v44, %v3448_v43  ;;  %v3979_v25 = vld [vmem:[#allocation2 + $0x10f] sm:$0xff] }
 0x2cc   : > { %v7329_v43 = vld [vmem:[#allocation2 + $0x14f] sm:$0xff] }
 0x2cd   : > { %6141 = vmatmul.mubr.msk.bf16.vlgmr.msra.gmra.mxu0 %vm392_vm3, %v2533_v61  ;;  %v3464_v61 = vpack.c.bf16 %v7214_v53, %v3428_v13 }
 0x2ce   : > { %6159 = vmatpush3.bf16.msra.mxu0 %v3479_v62  ;;  %6144 = vmatprep.mubr.msk.bf16.mxu0 %vm392_vm3, %v2534_v3  ;;  %v3905_v3 = vsel %vm1651_vm2, %v5539_v27, 0  ;;  %v7236_v62 = vld [vmem:[#allocation2 + $0x108] sm:$0xff] }
 0x2cf   : > { %6368 = vmatprep.subr.msk.bf16.mxu0 %vm1651_vm2, %v5549_v41  ;;  %v3637_v47 = vpack.c.bf16 %v7236_v62, %v3441_v24  ;;  %v3450_v41 = vld [vmem:[#allocation2 + $0xe1] sm:$0xff] }
 0x2d0   : > { %v7243_v60 = vpack.c.bf16 %v3450_v41, %v3800_v44  ;;  %v7322_v24 = vld [vmem:[#allocation2 + $0x147] sm:$0xff] }
 0x2d1   : > { %6155 = vmatmul.mubr.msk.bf16.gmra.mxu1 %vm392_vm3, %v3274_v33  ;;  %v3452_v33 = vld [vmem:[#allocation2 + $0xf1] sm:$0xff]  ;;  %v7443_v6 = vpack.c.bf16 %v7329_v43, %v7322_v24 }
 0x2d2   : > { %6170 = vmatprep.mubr.msk.bf16.mxu1 %vm392_vm3, %v3429_v50  ;;  %v3451_v50 = vld [vmem:[#allocation2 + $0xe9] sm:$0xff] }
 0x2d3   : > { %v3808_v56 = vpack.c.bf16 %v3451_v50, %v3450_v41 }
 0x2d5   : > { %6145 = vmatmul.mubr.msk.bf16.gmra.mxu0 %vm392_vm3, %v3173_v36  ;;  %v7246_v36 = vpack.c.bf16 %v3452_v33, %v3451_v50 }
 0x2d6   : > { %6160 = vmatprep.mubr.msk.bf16.mxu0 %vm392_vm3, %v3461_v46  ;;  %v3804_v46 = vld [vmem:[#allocation2 + $0xf9] sm:$0xff] }
 0x2d9   : > { %6171 = vmatmul.mubr.msk.bf16.vlgmr.msra.gmra.mxu1 %vm392_vm3, %v7192_v35 }
 0x2da   : > { %6174 = vmatprep.mubr.msk.bf16.mxu1 %vm392_vm3, %v7195_v48  ;;  %6189 = vmatpush3.bf16.msra.mxu1 %v3732_v30  ;;  %v3809_v30 = vpack.c.bf16 %v3804_v46, %v3452_v33 }
 0x2db   : > { %6371 = vmatprep.subr.msk.bf16.mxu1 %vm1651_vm2, %v5539_v27  ;;  %v3454_v27 = vld [vmem:[#allocation2 + $0x101] sm:$0xff] }
 0x2dd   : > { %6161 = vmatmul.mubr.msk.bf16.vlgmr.msra.gmra.mxu0 %vm392_vm3, %v3462_v21  ;;  %v7262_v21 = vpack.c.bf16 %v3454_v27, %v3804_v46  ;;  %v7361_v46 = vld [vmem:[#allocation2 + $0x167] sm:$0xff] }
 0x2de   : > { %6179 = vmatpush3.bf16.msra.mxu0 %v3652_v34  ;;  %6164 = vmatprep.mubr.msk.bf16.mxu0 %vm392_vm3, %v3463_v5  ;;  %v7265_v34 = vld [vmem:[#allocation2 + $0x109] sm:$0xff]  ;;  %v4390_v5 = vsel %vm1651_vm2, %v5592_v37, 0 }
 0x2df   : > { %6370 = vmatprep.subr.msk.bf16.mxu0 %vm1651_vm2, %v5558_v45  ;;  %v3810_v13 = vpack.c.bf16 %v7265_v34, %v3454_v27  ;;  %v5601_v45 = vld [vmem:[%s8208_s6 + $0x10] sm:$0xf] }
 0x2e0   : > { %v4563_v44 = vsel %vm1651_vm2, %v5601_v45, 0  ;;  %v7372_v27 = vld [vmem:[#allocation2 + $0x130] sm:$0xff] }
 0x2e1   : > { %6175 = vmatmul.mubr.msk.bf16.gmra.mxu1 %vm392_vm3, %v7211_v2 }
 0x2e2   : > { %6190 = vmatprep.mubr.msk.bf16.mxu1 %vm392_vm3, %v3442_v52 }
 0x2e5   : > { %6165 = vmatmul.mubr.msk.bf16.gmra.mxu0 %vm392_vm3, %v3464_v61  ;;  %v7289_v61 = vld [vmem:[#allocation2 + $0x137] sm:$0xff] }
 0x2e6   : > { %6180 = vmatprep.mubr.msk.bf16.mxu0 %vm392_vm3, %v3634_v59 }
 0x2e9   : > { %6191 = vmatmul.mubr.msk.bf16.vlgmr.msra.gmra.mxu1 %vm392_vm3, %v3443_v9 }
 0x2ea   : > { %6194 = vmatprep.mubr.msk.bf16.mxu1 %vm392_vm3, %v3444_v17  ;;  %6209 = vmatpush3.bf16.msra.mxu1 %v3905_v3 }
 0x2eb   : > { %6373 = vmatprep.subr.msk.bf16.mxu1 %vm1651_vm2, %v5572_v19  ;;  %v4084_v19 = vpack.c.bf16 %v4080_v55, %v7236_v62 }
 0x2ed   : > { %6181 = vmatmul.mubr.msk.bf16.vlgmr.msra.gmra.mxu0 %vm392_vm3, %v3635_v4 }
 0x2ee   : > { %6199 = vmatpush3.bf16.msra.mxu0 %v3825_v38  ;;  %6184 = vmatprep.mubr.msk.bf16.mxu0 %vm392_vm3, %v3636_v20  ;;  %v3983_v38 = vpack.c.bf16 %v3979_v25, %v7214_v53  ;;  %v7320_v20 = vld [vmem:[#allocation2 + $0x13f] sm:$0xff] }
 0x2ef   : > { %6372 = vmatprep.subr.msk.bf16.mxu0 %vm1651_vm2, %v5567_v42  ;;  %v4373_v53 = vpack.c.bf16 %v7322_v24, %v7320_v20  ;;  %v7433_v26 = vpack.c.bf16 %v7320_v20, %v7289_v61  ;;  %v1438_v24 = vlaneseq }
 0x2f1   : > { %6195 = vmatmul.mubr.msk.bf16.gmra.mxu1 %vm392_vm3, %v3445_v1  ;;  %v7479_v16 = vshrl.u32 %v1438_v24, 7 }
 0x2f2   : > { %6210 = vmatprep.mubr.msk.bf16.mxu1 %vm392_vm3, %v3455_v14 }
 0x2f5   : > { %6185 = vmatmul.mubr.msk.bf16.gmra.mxu0 %vm392_vm3, %v3637_v47 }
 0x2f6   : > { %6200 = vmatprep.mubr.msk.bf16.mxu0 %vm392_vm3, %v3807_v32  ;;  %v5610_v32 = vld [vmem:[%s8208_s6 + $0x14] sm:$0xf] }
 0x2f9   : > { %6211 = vmatmul.mubr.msk.bf16.vlgmr.msra.gmra.mxu1 %vm392_vm3, %v7243_v60 }
 0x2fa   : > { %6214 = vmatprep.mubr.msk.bf16.mxu1 %vm392_vm3, %v7246_v36  ;;  %6229 = vmatpush3.bf16.msra.mxu1 %v4099_v63  ;;  %v4470_v63 = vsel %vm1651_vm2, %v4344_v57, 0 }
 0x2fb   : > { %6375 = vmatprep.subr.msk.bf16.mxu1 %vm1651_vm2, %v5592_v37  ;;  %v7359_v37 = vld [vmem:[#allocation2 + $0x15f] sm:$0xff] }
 0x2fd   : > { %6201 = vmatmul.mubr.msk.bf16.vlgmr.msra.gmra.mxu0 %vm392_vm3, %v3808_v56  ;;  %v5590_v56 = vld [vmem:[%s8208_s6 + $0x4] sm:$0xf] }
 0x2fe   : > { %6219 = vmatpush3.bf16.msra.mxu0 %v3998_v31  ;;  %6204 = vmatprep.mubr.msk.bf16.mxu0 %vm392_vm3, %v3809_v30  ;;  %v4643_v12 = vsel %vm1651_vm2, %v5590_v56, 0 }
 0x2ff   : > { %6374 = vmatprep.subr.msk.bf16.mxu0 %vm1651_vm2, %v5577_v39  ;;  %v7374_v39 = vld [vmem:[#allocation2 + $0x138] sm:$0xff] }
 0x301   : > { %6215 = vmatmul.mubr.msk.bf16.gmra.mxu1 %vm392_vm3, %v7262_v21 }
 0x302   : > { %6230 = vmatprep.mubr.msk.bf16.mxu1 %vm392_vm3, %v3443_v9 }
 0x305   : > { %6205 = vmatmul.mubr.msk.bf16.gmra.mxu0 %vm392_vm3, %v3810_v13  ;;  %v4375_v13 = vpack.c.bf16 %v7361_v46, %v7359_v37 }
 0x306   : > { %6220 = vmatprep.mubr.msk.bf16.mxu0 %vm392_vm3, %v7192_v35  ;;  %v7287_v35 = vld [vmem:[#allocation2 + $0x12f] sm:$0xff] }
 0x307   : > { %v4372_v9 = vpack.c.bf16 %v7289_v61, %v7287_v35  ;;  %v5591_v61 = vld [vmem:[%s8208_s6 + $0x8] sm:$0xf] }
 0x309   : > { %v7278_v0 = vpop.f32.mrf.mxu1  ;;  %6231 = vmatmul.mubr.msk.bf16.vlgmr.msra.gmra.mxu1 %vm392_vm3, %v3444_v17 }
 0x30a   : > { %v7281_v51 = vpop.f32.mrf.mxu0  ;;  %6234 = vmatprep.mubr.msk.bf16.mxu1 %vm392_vm3, %v3445_v1  ;;  %6249 = vmatpush3.bf16.msra.mxu1 %v4390_v5  ;;  %v7331_v1 = vld [vmem:[#allocation2 + $0x157] sm:$0xff] }
 0x30b   : > { %v7284_v52 = vpop.f32.mrf.mxu1  ;;  %6377 = vmatprep.subr.msk.bf16.mxu1 %vm1651_vm2, %v5601_v45  ;;  %v4374_v47 = vpack.c.bf16 %v7331_v1, %v7329_v43  ;;  %v7483_v8 = vpack.c.bf16 %v7359_v37, %v7331_v1  ;;  %v7498_v1 = vadd.s32 16, %v7479_v16 }
 0x30c   : > { %v7292_v59 = vpop.f32.mrf.mxu0 }
 0x30d   : > { %v7297_v58 = vpop.f32.mrf.mxu1  ;;  %6221 = vmatmul.mubr.msk.bf16.vlgmr.msra.gmra.mxu0 %vm392_vm3, %v7195_v48 }
 0x30e   : > { %6239 = vmatpush3.bf16.msra.mxu0 %v4200_v54  ;;  %6224 = vmatprep.mubr.msk.bf16.mxu0 %vm392_vm3, %v7211_v2  ;;  %v7305_v3 = vpop.f32.mrf.mxu0  ;;  %v4181_v54 = vld [vmem:[#allocation2 + $0x111] sm:$0xff] }
 0x30f   : > { %v7307_v17 = vpop.f32.mrf.mxu1  ;;  %6376 = vmatprep.subr.msk.bf16.mxu0 %vm1651_vm2, %v4344_v57  ;;  %v4185_v25 = vpack.c.bf16 %v4181_v54, %v7265_v34  ;;  %v4736_v54 = vsel %vm1651_vm2, %v5610_v32, 0 }
 0x310   : > { %v7315_v48 = vpop.f32.mrf.mxu0 }
 0x311   : > { %v7311_v4 = vpop.f32.mrf.mxu1  ;;  %6235 = vmatmul.mubr.msk.bf16.gmra.mxu1 %vm392_vm3, %v4084_v19 }
 0x312   : > { %6250 = vmatprep.mubr.msk.bf16.mxu1 %vm392_vm3, %v4372_v9 }
 0x313   : > { %v7317_v2 = vpop.f32.mrf.mxu1 }
 0x315   : > { %v7324_v42 = vpop.f32.mrf.mxu0  ;;  %v7326_v49 = vpop.f32.mrf.mxu1  ;;  %6225 = vmatmul.mubr.msk.bf16.gmra.mxu0 %vm392_vm3, %v3983_v38 }
 0x316   : > { %6240 = vmatprep.mubr.msk.bf16.mxu0 %vm392_vm3, %v7243_v60 }
 0x317   : > { %v7337_v14 = vpop.f32.mrf.mxu0  ;;  %v7339_v62 = vpop.f32.mrf.mxu1 }
 0x319   : > { %v7347_v41 = vpop.f32.mrf.mxu0  ;;  %v7349_v50 = vpop.f32.mrf.mxu1  ;;  %6251 = vmatmul.mubr.msk.bf16.vlgmr.msra.gmra.mxu1 %vm392_vm3, %v4373_v53  ;;  %v7399_v53 = vld [vmem:[#allocation2 + $0x140] sm:$0xff] }
 0x31a   : > { %6254 = vmatprep.mubr.msk.bf16.mxu1 %vm392_vm3, %v4374_v47  ;;  %6269 = vmatpush3.bf16.msra.mxu1 %v4563_v44  ;;  %v7401_v44 = vld [vmem:[#allocation2 + $0x148] sm:$0xff] }
 0x31b   : > { %v7353_v33 = vpop.f32.mrf.mxu0  ;;  %v7355_v60 = vpop.f32.mrf.mxu1  ;;  %6379 = vmatprep.subr.msk.bf16.mxu1 %vm1651_vm2, %v5610_v32  ;;  %v4546_v34 = vpack.c.bf16 %v7401_v44, %v7399_v53 }
 0x31d   : > { %v7366_v31 = vpop.f32.mrf.mxu0  ;;  %v7368_v30 = vpop.f32.mrf.mxu1  ;;  %6241 = vmatmul.mubr.msk.bf16.vlgmr.msra.gmra.mxu0 %vm392_vm3, %v7246_v36  ;;  %v4545_v36 = vpack.c.bf16 %v7374_v39, %v7372_v27 }
 0x31e   : > { %6259 = vmatpush3.bf16.msra.mxu0 %v4470_v63  ;;  %6244 = vmatprep.mubr.msk.bf16.mxu0 %vm392_vm3, %v7262_v21  ;;  %v4332_v21 = vld [vmem:[#allocation2 + $0x127] sm:$0xff] }
 0x31f   : > { %v7380_v5 = vpop.f32.mrf.mxu0  ;;  %v7382_v45 = vpop.f32.mrf.mxu1  ;;  %6378 = vmatprep.subr.msk.bf16.mxu0 %vm1651_vm2, %v5590_v56  ;;  %v4340_v38 = vpack.c.bf16 %v7287_v35, %v4332_v21  ;;  %v7417_v35 = vld [vmem:[#allocation2 + $0x150] sm:$0xff] }
 0x320   : > { %v7458_v56 = vld [vmem:[#allocation2 + $0x131] sm:$0xff] }
 0x321   : > { %v7387_v55 = vpop.f32.mrf.mxu0  ;;  %v7389_v57 = vpop.f32.mrf.mxu1  ;;  %6255 = vmatmul.mubr.msk.bf16.gmra.mxu1 %vm392_vm3, %v4375_v13  ;;  %v7408_v13 = vld [vmem:[#allocation2 + $0x158] sm:$0xff]  ;;  %v4718_v22 = vpack.c.bf16 %v7460_v11, %v7458_v56 }
 0x322   : > { %6270 = vmatprep.mubr.msk.bf16.mxu1 %vm392_vm3, %v4545_v36  ;;  %v4547_v21 = vpack.c.bf16 %v7408_v13, %v7417_v35 }
 0x323   : > { %v7393_v9 = vpop.f32.mrf.mxu0  ;;  %v7395_v19 = vpop.f32.mrf.mxu1 }
 0x325   : > { %v7403_v47 = vpop.f32.mrf.mxu0  ;;  %v7405_v63 = vpop.f32.mrf.mxu1  ;;  %6245 = vmatmul.mubr.msk.bf16.gmra.mxu0 %vm392_vm3, %v4185_v25  ;;  %v5619_v25 = vld [vmem:[%s8208_s6 + $0x18] sm:$0xf] }
 0x326   : > { %8313 = vst [vmem:[#allocation35_spill] sm:$0xff] %v7405_v63  ;;  %6260 = vmatprep.mubr.msk.bf16.mxu0 %vm392_vm3, %v4340_v38  ;;  %v4716_v63 = vld [vmem:[#allocation2 + $0x161] sm:$0xff] }
 0x327   : > { %v7411_v36 = vpop.f32.mrf.mxu0  ;;  %v7413_v40 = vpop.f32.mrf.mxu1 }
 0x328   : > { %8314 = vst [vmem:[#allocation36_spill] sm:$0xff] %v7413_v40  ;;  %v7532_v40 = vadd.s32 40, %v7479_v16 }
 0x329   : > { %v7425_v18 = vpop.f32.mrf.mxu0  ;;  %v7427_v38 = vpop.f32.mrf.mxu1  ;;  %6271 = vmatmul.mubr.msk.bf16.vlgmr.msra.gmra.mxu1 %vm392_vm3, %v4546_v34  ;;  %v7445_v34 = vld [vmem:[#allocation2 + $0x160] sm:$0xff] }
 0x32a   : > { %8315 = vst [vmem:[#allocation37_spill] sm:$0xff] %v7425_v18  ;;  %8316 = vst [vmem:[#allocation38_spill] sm:$0xff] %v7427_v38  ;;  %6274 = vmatprep.mubr.msk.bf16.mxu1 %vm392_vm3, %v4547_v21  ;;  %6289 = vmatpush3.bf16.msra.mxu1 %v4736_v54  ;;  %v7447_v21 = vld [vmem:[#allocation2 + $0x168] sm:$0xff]  ;;  %v1465_v38 = vand.u32 7, %v7498_v1 }
 0x32b   : > { %v7435_v32 = vpop.f32.mrf.mxu0  ;;  %v7437_v7 = vpop.f32.mrf.mxu1  ;;  %6381 = vmatprep.subr.msk.bf16.mxu1 %vm1651_vm2, %v5619_v25  ;;  %8319 = vst [vmem:[#allocation41_spill] sm:$0xff] %v7447_v21  ;;  %v4548_v29 = vpack.c.bf16 %v7447_v21, %v7445_v34  ;;  %v4358_v1 = vld [vmem:[#allocation2 + $0x129] sm:$0xff] }
 0x32c   : > { %8317 = vst [vmem:[#allocation39_spill] sm:$0xff] %v7435_v32  ;;  %8318 = vst [vmem:[#allocation40_spill] sm:$0xff] %v7437_v7  ;;  %v7510_v7 = vadd.s32 48, %v7479_v16  ;;  %v4816_v32 = vsel %vm1651_vm2, %v5591_v61, 0  ;;  %vm7569_vm5 = vcmp.ge.s32.totalorder %v1465_v38, 1  ;;  %vm7626_vm13 = vcmp.le.s32.totalorder %v1465_v38, 6 }
 0x32d   : > { %v7452_v20 = vpop.f32.mrf.mxu0  ;;  %v7454_v54 = vpop.f32.mrf.mxu1  ;;  %6261 = vmatmul.mubr.msk.bf16.vlgmr.msra.gmra.mxu0 %vm392_vm3, %v7433_v26 }
 0x32e   : > { %8320 = vst [vmem:[#allocation42_spill] sm:$0xff] %v7452_v20  ;;  %8321 = vst [vmem:[#allocation43_spill] sm:$0xff] %v7454_v54  ;;  %6279 = vmatpush3.bf16.msra.mxu0 %v4643_v12  ;;  %6264 = vmatprep.mubr.msk.bf16.mxu0 %vm392_vm3, %v7443_v6  ;;  %v4345_v12 = vld [vmem:[#allocation2 + $0x128] sm:$0xff]  ;;  %v1451_v20 = vand.u32 7, %v7479_v16 }
 0x32f   : > { %v7464_v43 = vpop.f32.mrf.mxu0  ;;  %v7466_v23 = vpop.f32.mrf.mxu1  ;;  %6380 = vmatprep.subr.msk.bf16.mxu0 %vm1651_vm2, %v5591_v61  ;;  %v4712_v54 = vld [vmem:[#allocation2 + $0x141] sm:$0xff] }
 0x330   : > { %8322 = vst [vmem:[#allocation44_spill] sm:$0xff] %v7464_v43  ;;  %8323 = vst [vmem:[#allocation45_spill] sm:$0xff] %v7466_v23  ;;  %v4353_v23 = vpack.c.bf16 %v7372_v27, %v4345_v12  ;;  %v4714_v12 = vld [vmem:[#allocation2 + $0x151] sm:$0xff]  ;;  %v7526_v43 = vadd.s32 56, %v7479_v16  ;;  %vm1543_vm6 = vcmp.ge.s32.totalorder %v1451_v20, 1  ;;  %vm7630_vm14 = vcmp.le.s32.totalorder %v1451_v20, 6 }
 0x331   : > { %v7473_v28 = vpop.f32.mrf.mxu0  ;;  %v7475_v10 = vpop.f32.mrf.mxu1  ;;  %6275 = vmatmul.mubr.msk.bf16.gmra.mxu1 %vm392_vm3, %v4548_v29 }
 0x332   : > { %8324 = vst [vmem:[#allocation46_spill] sm:$0xff] %v7473_v28  ;;  %8325 = vst [vmem:[#allocation47_spill] sm:$0xff] %v7475_v10  ;;  %6290 = vmatprep.mubr.msk.bf16.mxu1 %vm392_vm3, %v4718_v22  ;;  %v4713_v28 = vld [vmem:[#allocation2 + $0x149] sm:$0xff]  ;;  %v4715_v22 = vld [vmem:[#allocation2 + $0x159] sm:$0xff] }
 0x333   : > { %v7485_v21 = vpop.f32.mrf.mxu0  ;;  %v7487_v15 = vpop.f32.mrf.mxu1  ;;  %v4719_v27 = vpack.c.bf16 %v4713_v28, %v4712_v54 }
 0x334   : > { %8326 = vst [vmem:[#allocation48_spill] sm:$0xff] %v7485_v21  ;;  %8327 = vst [vmem:[#allocation49_spill] sm:$0xff] %v7487_v15  ;;  %v4909_v15 = vsel %vm1651_vm2, %v5619_v25, 0  ;;  %v7507_v21 = vadd.s32 8, %v7479_v16  ;;  %v7523_v25 = vadd.s32 32, %v7479_v16 }
 0x335   : > { %v7490_v10 = vpop.f32.mrf.mxu0  ;;  %v7492_v29 = vpop.f32.mrf.mxu1  ;;  %6265 = vmatmul.mubr.msk.bf16.gmra.mxu0 %vm392_vm3, %v7483_v8 }
 0x336   : > { %8328 = vst [vmem:[#allocation50_spill] sm:$0xff] %v7490_v10  ;;  %8329 = vst [vmem:[#allocation51_spill] sm:$0xff] %v7492_v29  ;;  %6280 = vmatprep.mubr.msk.bf16.mxu0 %vm392_vm3, %v4353_v23  ;;  %v4720_v10 = vpack.c.bf16 %v4715_v22, %v4714_v12  ;;  %v1442_v29 = vadd.s32 24, %v7479_v16  ;;  %v7515_v23 = vld [vmem:[%s8208_s6 + $0x20] sm:$0xf] }
 0x337   : > { %v7500_v37 = vpop.f32.mrf.mxu0  ;;  %v7502_v24 = vpop.f32.mrf.mxu1 }
 0x338   : > { %8330 = vst [vmem:[#allocation52_spill] sm:$0xff] %v7500_v37  ;;  %8331 = vst [vmem:[#allocation53_spill] sm:$0xff] %v7502_v24  ;;  %v1472_v16 = vand.u32 7, %v1442_v29 }
 0x339   : > { %v7517_v37 = vpop.f32.mrf.mxu0  ;;  %v7519_v24 = vpop.f32.mrf.mxu1  ;;  %6291 = vmatmul.mubr.msk.bf16.vlgmr.msra.gmra.mxu1 %vm392_vm3, %v4719_v27  ;;  %v7540_v27 = vpack.c.bf16 %v7399_v53, %v7374_v39  ;;  %v5624_v39 = vld [vmem:[%s8208_s6 + $0x1c] sm:$0xf]  ;;  %v7556_v53 = vld [vmem:[#allocation2 + $0x16f] sm:$0xff] }
 0x33a   : > { %8332 = vst [vmem:[#allocation54_spill] sm:$0xff] %v7517_v37  ;;  %8333 = vst [vmem:[#allocation55_spill] sm:$0xff] %v7519_v24  ;;  %6294 = vmatprep.mubr.msk.bf16.mxu1 %vm392_vm3, %v4720_v10  ;;  %6309 = vmatpush3.bf16.msra.mxu1 %v4909_v15  ;;  %v7543_v10 = vld [vmem:[#allocation2 + $0x169] sm:$0xff]  ;;  %v7549_v15 = vpack.c.bf16 %v7417_v35, %v7401_v44  ;;  %v1479_v44 = vand.u32 7, %v7523_v25  ;;  %vm7591_vm7 = vcmp.ge.s32.totalorder %v1472_v16, 1  ;;  %vm7634_vm15 = vcmp.le.s32.totalorder %v1472_v16, 6 }
 0x33b   : > { %v7534_v37 = vpop.f32.mrf.mxu0  ;;  %v7536_v24 = vpop.f32.mrf.mxu1  ;;  %8336 = vst [vmem:[#allocation58_spill] sm:$0xff] %v7540_v27  ;;  %8337 = vst [vmem:[#allocation59_spill] sm:$0xff] %v7543_v10  ;;  %6383 = vmatprep.subr.msk.bf16.mxu1 %vm1651_vm2, %v7515_v23  ;;  %v8396_v16 = vld [vmem:[#allocation43_spill] sm:$0xff] }
 0x33c   : > { %8334 = vst [vmem:[#allocation56_spill] sm:$0xff] %v7534_v37  ;;  %8335 = vst [vmem:[#allocation57_spill] sm:$0xff] %v7536_v24  ;;  %v1458_v24 = vand.u32 7, %v7507_v21  ;;  %v1493_v37 = vand.u32 7, %v7510_v7  ;;  %v7567_v21 = vpack.c.bf16 %v4712_v54, %v7460_v11  ;;  %v4721_v11 = vpack.c.bf16 %v7543_v10, %v4716_v63 }
 0x33d   : > { %8338 = vst [vmem:[#allocation60_spill] sm:$0xff] %v7549_v15  ;;  %v7558_v61 = vpop.f32.mrf.mxu0  ;;  %v7560_v18 = vpop.f32.mrf.mxu1  ;;  %6281 = vmatmul.mubr.msk.bf16.vlgmr.msra.gmra.mxu0 %vm392_vm3, %v7540_v27  ;;  %v7585_v54 = vpack.c.bf16 %v7445_v34, %v7408_v13  ;;  %v7603_v13 = vpack.c.bf16 %v4716_v63, %v4715_v22  ;;  %v8350_v34 = vmov 0.0   ;;  %vm1547_vm10 = vcmp.ge.s32.totalorder %v1479_v44, 1 }
 0x33e   : > { %8339 = vst [vmem:[#allocation61_spill] sm:$0xff] %v7560_v18  ;;  %6299 = vmatpush3.bf16.msra.mxu0 %v4816_v32  ;;  %6284 = vmatprep.mubr.msk.bf16.mxu0 %vm392_vm3, %v7549_v15  ;;  %v7576_v18 = vpack.c.bf16 %v4714_v12, %v4713_v28  ;;  %v4366_v32 = vpack.c.bf16 %v7458_v56, %v4358_v1  ;;  %vm7595_vm8 = vcmp.ge.s32.totalorder %v1458_v24, 1  ;;  %vm7599_vm9 = vcmp.ge.s32.totalorder %v1493_v37, 1 }
 0x33f   : > { %v7578_v27 = vpop.f32.mrf.mxu0  ;;  %v7580_v25 = vpop.f32.mrf.mxu1  ;;  %8342 = vst [vmem:[#allocation62_spill] sm:$0xff] %v7585_v54  ;;  %6382 = vmatprep.subr.msk.bf16.mxu0 %vm1651_vm2, %v5624_v39  ;;  %8349 = vst [vmem:[#allocation63_spill] sm:$0xff] %v7603_v13  ;;  %v7608_v56 = vsel %vm7569_vm5, 1.0, %v8350_v34  ;;  %v7611_v1 = vsel %vm1543_vm6, 1.0, %v8350_v34  ;;  %v8354_v15 = vand.u32 7, %v7526_v43  ;;  %v8355_v63 = vand.u32 7, %v7532_v40 }
 0x340   : > { %8351 = vst [vmem:[#allocation64_spill] sm:$0xff] %v7608_v56  ;;  %8352 = vst [vmem:[#allocation65_spill] sm:$0xff] %v7611_v1  ;;  %v7646_v38 = vsel %vm7595_vm8, 1.0, %v8350_v34  ;;  %v7653_v20 = vsel %vm7599_vm9, 1.0, %v8350_v34  ;;  %vm7655_vm0 = vcmp.le.s32.totalorder %v1458_v24, 6  ;;  %v7660_v28 = vsel %vm1547_vm10, 1.0, %v8350_v34 }
 0x341   : > { %v6043_v35 = vpop.f32.mrf.mxu0  ;;  %v7613_v10 = vpop.f32.mrf.mxu1  ;;  %6295 = vmatmul.mubr.msk.bf16.gmra.mxu1 %vm392_vm3, %v4721_v11  ;;  %vm1550_vm11 = vcmp.ge.s32.totalorder %v8354_v15, 1  ;;  %vm7622_vm12 = vcmp.ge.s32.totalorder %v8355_v63, 1  ;;  %8365 = vst [vmem:[#allocation68_spill] sm:$0xff] %v7646_v38  ;;  %8367 = vst [vmem:[#allocation70_spill] sm:$0xff] %v7653_v20  ;;  %vm7665_vm4 = vcmp.le.s32.totalorder %v1493_v37, 6  ;;  %vm7669_vm5 = vcmp.le.s32.totalorder %v1479_v44, 6 }
 0x342   : > { %8353 = vst [vmem:[#allocation66_spill] sm:$0xff] %v7613_v10  ;;  %6310 = vmatprep.mubr.msk.bf16.mxu1 %vm392_vm3, %v7433_v26  ;;  %v7641_v26 = vsel %vm7591_vm7, 1.0, %v8350_v34  ;;  %8370 = vst [vmem:[#allocation71_spill] sm:$0xff] %v7660_v28  ;;  %v7663_v10 = vsel %vm1550_vm11, 1.0, %v8350_v34  ;;  %v7682_v28 = vsel %vm7622_vm12, 1.0, %v8350_v34  ;;  %v7687_v37 = vsel %vm7626_vm13, 1.0, %v8350_v34 }
 0x343   : > { %8364 = vst [vmem:[#allocation67_spill] sm:$0xff] %v7641_v26  ;;  %v2214_v15 = vpop.f32.mrf.mxu0  ;;  %v7648_v63 = vpop.f32.mrf.mxu1  ;;  %8371 = vst [vmem:[#allocation72_spill] sm:$0xff] %v7663_v10  ;;  %v7692_v44 = vsel %vm7630_vm14, 1.0, %v8350_v34  ;;  %v7697_v10 = vsel %vm7634_vm15, 1.0, %v8350_v34  ;;  %v1778_v22 = vadd.f32 %v7278_v0, %v7281_v51  ;;  %v5111_v7 = vsel %vm1651_vm2, %v7515_v23, 0 }
 0x344   : > { %8366 = vst [vmem:[#allocation69_spill] sm:$0xff] %v7648_v63  ;;  %8377 = vst [vmem:[#allocation74_spill] sm:$0xff] %v7682_v28  ;;  %v7708_v13 = vsel %vm7655_vm0, 1.0, %v8350_v34  ;;  %v1770_v11 = vadd.f32 %v7284_v52, %v7292_v59  ;;  %v1781_v28 = vadd.f32 %v7297_v58, %v7305_v3  ;;  %v7719_v51 = vsel %vm7665_vm4, 1.0, %v8350_v34 }
 0x345   : > { %v7673_v29 = vpop.f32.mrf.mxu0  ;;  %v7675_v24 = vpop.f32.mrf.mxu1  ;;  %6285 = vmatmul.mubr.msk.bf16.gmra.mxu0 %vm392_vm3, %v7585_v54  ;;  %8378 = vst [vmem:[#allocation75_spill] sm:$0xff] %v7687_v37  ;;  %8379 = vst [vmem:[#allocation76_spill] sm:$0xff] %v7692_v44  ;;  %v5010_v54 = vsel %vm1651_vm2, %v5624_v39, 0  ;;  %v7724_v23 = vsel %vm7669_vm5, 1.0, %v8350_v34  ;;  %v1773_v39 = vadd.f32 %v7307_v17, %v7315_v48  ;;  %v1794_v52 = vadd.f32 %v7311_v4, %v7324_v42 }
 0x346   : > { %8376 = vst [vmem:[#allocation73_spill] sm:$0xff] %v7675_v24  ;;  %8380 = vst [vmem:[#allocation77_spill] sm:$0xff] %v7697_v10  ;;  %6300 = vmatprep.mubr.msk.bf16.mxu0 %vm392_vm3, %v4366_v32  ;;  %v1786_v59 = vadd.f32 %v7317_v2, %v7337_v14  ;;  %v2244_v58 = vadd.f32 %v7558_v61, %v1778_v22  ;;  %v1797_v3 = vadd.f32 %v7326_v49, %v7347_v41  ;;  %v8397_v22 = vld [vmem:[#allocation48_spill] sm:$0xff] }
 0x347   : > { %8381 = vst [vmem:[#allocation78_spill] sm:$0xff] %v7708_v13  ;;  %v2227_v24 = vpop.f32.mrf.mxu0  ;;  %v7714_v0 = vpop.f32.mrf.mxu1  ;;  %8382 = vst [vmem:[#allocation79_spill] sm:$0xff] %v7719_v51  ;;  %v7737_v32 = vadd.f32 %v7339_v62, %v7353_v33  ;;  %v1952_v63 = vadd.f32 %v7349_v50, %v7366_v31  ;;  %v1944_v17 = vadd.f32 %v7355_v60, %v7380_v5  ;;  %v8384_v14 = vand.u32 7, %v7526_v43  ;;  %v8387_v50 = vld [vmem:[#allocation37_spill] sm:$0xff]  ;;  %v8388_v33 = vld [vmem:[#allocation35_spill] sm:$0xff] }
 0x348   : > { %8383 = vst [vmem:[#allocation80_spill] sm:$0xff] %v7724_v23  ;;  %v1955_v2 = vadd.f32 %v7368_v30, %v7387_v55  ;;  %v1947_v42 = vadd.f32 %v7382_v45, %v7393_v9  ;;  %v2242_v49 = vadd.f32 %v7578_v27, %v1770_v11  ;;  %v7764_v41 = vadd.f32 %v7395_v19, %v7411_v36  ;;  %v8389_v5 = vld [vmem:[#allocation39_spill] sm:$0xff]  ;;  %v8390_v45 = vld [vmem:[#allocation36_spill] sm:$0xff]  ;;  %v8391_v9 = vld [vmem:[#allocation42_spill] sm:$0xff] }
 0x349   : > { %v6047_v48 = vpop.f32.mrf.mxu0  ;;  %v7743_v4 = vpop.f32.mrf.mxu1  ;;  %6311 = vmatmul.mubr.msk.bf16.vlgmr.msra.gmra.mxu1 %vm392_vm3, %v7443_v6  ;;  %vm7756_vm2 = vcmp.le.s32.totalorder %v8384_v14, 6  ;;  %v1968_v6 = vadd.f32 %v7389_v57, %v7403_v47  ;;  %v7768_v60 = vadd.f32 %v8388_v33, %v8387_v50  ;;  %v2245_v31 = vadd.f32 %v6043_v35, %v1781_v28  ;;  %v8392_v43 = vld [vmem:[#allocation38_spill] sm:$0xff]  ;;  %v8393_v57 = vld [vmem:[#allocation44_spill] sm:$0xff]  ;;  %v8398_v35 = vld [vmem:[#allocation45_spill] sm:$0xff] }
 0x34a   : > { %6314 = vmatprep.mubr.msk.bf16.mxu1 %vm392_vm3, %v7483_v8  ;;  %6329 = vmatpush3.bf16.msra.mxu1 %v5111_v7  ;;  %v7774_v55 = vadd.f32 %v8390_v45, %v8389_v5  ;;  %v2126_v27 = vadd.f32 %v8392_v43, %v8391_v9  ;;  %v8394_v47 = vld [vmem:[#allocation40_spill] sm:$0xff]  ;;  %v2456_v19 = vmul.f32 %v7608_v56, %v2244_v58  ;;  %v8395_v36 = vld [vmem:[#allocation46_spill] sm:$0xff]  ;;  %v8400_v11 = vld [vmem:[#allocation47_spill] sm:$0xff] }
 0x34b   : > { %v2230_v8 = vpop.f32.mrf.mxu0  ;;  %v7770_v30 = vpop.f32.mrf.mxu1  ;;  %v2118_v61 = vadd.f32 %v8394_v47, %v8393_v57  ;;  %v2129_v12 = vadd.f32 %v8396_v16, %v8395_v36  ;;  %v2121_v28 = vadd.f32 %v8398_v35, %v8397_v22  ;;  %v8399_v7 = vld [vmem:[#allocation50_spill] sm:$0xff]  ;;  %v2243_v50 = vadd.f32 %v2214_v15, %v1773_v39  ;;  %v8401_v45 = vld [vmem:[#allocation55_spill] sm:$0xff]  ;;  %v8403_v15 = vld [vmem:[#allocation52_spill] sm:$0xff] }
 0x34c   : > { %v2142_v14 = vadd.f32 %v8400_v11, %v8399_v7  ;;  %v2346_v9 = vadd.f32 %v8401_v45, %v1952_v63  ;;  %v2454_v58 = vmul.f32 %v7611_v1, %v2242_v49  ;;  %v7798_v57 = vsel %vm7756_vm2, 1.0, %v8350_v34  ;;  %v8404_v39 = vld [vmem:[#allocation49_spill] sm:$0xff]  ;;  %v8405_v36 = vld [vmem:[#allocation54_spill] sm:$0xff]  ;;  %v8406_v16 = vld [vmem:[#allocation51_spill] sm:$0xff] }
 0x34d   : > { %v6062_v33 = vpop.f32.mrf.mxu0  ;;  %v7787_v5 = vpop.f32.mrf.mxu1  ;;  %6301 = vmatmul.mubr.msk.bf16.vlgmr.msra.gmra.mxu0 %vm392_vm3, %v7567_v21  ;;  %8402 = vst [vmem:[#allocation37_spill] sm:$0xff] %v7798_v57  ;;  %v2134_v47 = vadd.f32 %v8404_v39, %v8403_v15  ;;  %v7804_v22 = vadd.f32 %v8406_v16, %v8405_v36  ;;  %v8407_v63 = vld [vmem:[#allocation56_spill] sm:$0xff]  ;;  %v8408_v35 = vld [vmem:[#allocation53_spill] sm:$0xff]  ;;  %v8410_v15 = vand.u32 7, %v7532_v40 }
 0x34e   : > { %v2448_v43 = vadd.f32 %v6062_v33, %v2126_v27  ;;  %6319 = vmatpush3.bf16.msra.mxu0 %v5010_v54  ;;  %6304 = vmatprep.mubr.msk.bf16.mxu0 %vm392_vm3, %v7576_v18  ;;  %v7808_v49 = vadd.f32 %v8408_v35, %v8407_v63  ;;  %v2457_v54 = vmul.f32 %v7641_v26, %v2245_v31  ;;  %v8409_v11 = vld [vmem:[#allocation57_spill] sm:$0xff] }
 0x34f   : > { %v2415_v27 = vpop.f32.mrf.mxu0  ;;  %v7811_v7 = vpop.f32.mrf.mxu1  ;;  %v2344_v62 = vadd.f32 %v8409_v11, %v1944_v17  ;;  %v2464_v33 = vadd.f32 %v2456_v19, %v2346_v9  ;;  %vm7817_vm6 = vcmp.le.s32.totalorder %v8410_v15, 6  ;;  %v8413_v36 = vld [vmem:[#allocation61_spill] sm:$0xff]  ;;  %v2455_v63 = vmul.f32 %v7646_v38, %v2243_v50 }
 0x350   : > { %v2472_v45 = vmul.f32 %v7687_v37, %v2448_v43  ;;  %v2446_v1 = vadd.f32 %v2415_v27, %v2118_v61  ;;  %v2347_v16 = vadd.f32 %v8413_v36, %v1955_v2  ;;  %v2248_v31 = vadd.f32 %v7673_v29, %v1794_v52  ;;  %v8415_v52 = vld [vmem:[#allocation66_spill] sm:$0xff]  ;;  %v8422_v36 = vld [vmem:[#allocation72_spill] sm:$0xff] }
 0x351   : > { %v2246_v35 = vadd.f32 %v2227_v24, %v1786_v59  ;;  %v6063_v26 = vpop.f32.mrf.mxu0  ;;  %v7824_v56 = vpop.f32.mrf.mxu1  ;;  %v8414_v17 = vpack.c.bf16 %v7556_v53, %v7361_v46  ;;  %v2462_v40 = vadd.f32 %v2454_v58, %v2344_v62  ;;  %v2345_v29 = vadd.f32 %v7580_v25, %v1947_v42 }
 0x352   : > { %v2480_v61 = vadd.f32 %v2472_v45, %v2464_v33  ;;  %v2470_v19 = vmul.f32 %v7692_v44, %v2446_v1  ;;  %v2449_v9 = vadd.f32 %v6063_v26, %v2129_v12  ;;  %v2465_v24 = vadd.f32 %v2457_v54, %v2347_v16  ;;  %v8416_v1 = vld [vmem:[#allocation71_spill] sm:$0xff]  ;;  %v8418_v12 = vld [vmem:[#allocation9_spill] sm:$0xff]  ;;  %v8419_v33 = vld [vmem:[#allocation58_spill] sm:$0xff] }
 0x353   : > { %6315 = vmatmul.mubr.msk.bf16.gmra.mxu1 %vm392_vm3, %v8414_v17  ;;  %v2350_v59 = vadd.f32 %v8415_v52, %v1968_v6  ;;  %v2249_v2 = vadd.f32 %v6047_v48, %v1797_v3  ;;  %v2418_v50 = vpop.f32.mrf.mxu0  ;;  %v7835_v43 = vpop.f32.mrf.mxu1  ;;  %v2460_v25 = vmul.f32 %v7653_v20, %v2248_v31  ;;  %v2458_v26 = vmul.f32 %v8416_v1, %v2246_v35  ;;  %v8417_v6 = vld [vmem:[#allocation63_spill] sm:$0xff]  ;;  %v8420_v45 = vld [vmem:[#allocation69_spill] sm:$0xff] }
 0x354   : > { %6330 = vmatprep.mubr.msk.bf16.mxu1 %vm392_vm3, %v7567_v21  ;;  %v2488_v46 = vmax.f32 %v2480_v61, 0.0  ;;  %v2478_v53 = vadd.f32 %v2470_v19, %v2462_v40  ;;  %v2473_v58 = vmul.f32 %v7697_v10, %v2449_v9  ;;  %v2447_v27 = vadd.f32 %v2418_v50, %v2121_v28  ;;  %v8423_v17 = vld [vmem:[#allocation5_spill] sm:$0xff] }
 0x355   : > { %v2463_v21 = vadd.f32 %v2455_v63, %v2345_v29  ;;  %v2247_v3 = vadd.f32 %v2230_v8, %v7737_v32  ;;  %v6066_v48 = vpop.f32.mrf.mxu0  ;;  %v7848_v42 = vpop.f32.mrf.mxu1  ;;  %6305 = vmatmul.mubr.msk.bf16.gmra.mxu0 %vm392_vm3, %v8417_v6  ;;  %v2348_v15 = vadd.f32 %v8420_v45, %v7764_v41  ;;  %v8421_v32 = vld [vmem:[#allocation73_spill] sm:$0xff]  ;;  %v2461_v16 = vmul.f32 %v8422_v36, %v2249_v2  ;;  %v8424_v41 = vld [vmem:[#allocation74_spill] sm:$0xff] }
 0x356   : > { %v2496_v28 = vadd.f32 %v2488_v46, %v8418_v12  ;;  %v2486_v54 = vmax.f32 %v2478_v53, 0.0  ;;  %v2481_v11 = vadd.f32 %v2473_v58, %v2465_v24  ;;  %v2471_v62 = vmul.f32 %v7708_v13, %v2447_v27  ;;  %6320 = vmatprep.mubr.msk.bf16.mxu0 %vm392_vm3, %v8419_v33  ;;  %v8429_v45 = vld [vmem:[#allocation62_spill] sm:$0xff] }
 0x357   : > { %v2351_v8 = vadd.f32 %v8421_v32, %v7768_v60  ;;  %v2452_v63 = vadd.f32 %v6066_v48, %v2142_v14  ;;  %v2431_v31 = vpop.f32.mrf.mxu0  ;;  %v7861_v35 = vpop.f32.mrf.mxu1  ;;  %v2468_v29 = vadd.f32 %v2460_v25, %v2350_v59  ;;  %v2466_v24 = vadd.f32 %v2458_v26, %v2348_v15  ;;  %v8425_v14 = vld [vmem:[#allocation10_spill] sm:$0xff] }
 0x358   : > { %2504 = vst.msk [vmem:[%s7843_s18 + $0x10] sm:$0xff] %vm397_vm1, %v2496_v28  ;;  %v2494_v40 = vadd.f32 %v2486_v54, %v8423_v17  ;;  %v2489_v61 = vmax.f32 %v2481_v11, 0.0  ;;  %v2479_v19 = vadd.f32 %v2471_v62, %v2463_v21  ;;  %v2450_v9 = vadd.f32 %v2431_v31, %v2134_v47  ;;  %v8432_v31 = vld [vmem:[#allocation13_spill] sm:$0xff] }
 0x359   : > { %v2459_v52 = vmul.f32 %v8424_v41, %v2247_v3  ;;  %v2476_v60 = vmul.f32 %v7719_v51, %v2452_v63  ;;  %v6067_v2 = vpop.f32.mrf.mxu0  ;;  %v7868_v50 = vpop.f32.mrf.mxu1  ;;  %v2349_v58 = vadd.f32 %v7714_v0, %v7774_v55  ;;  %v2469_v27 = vadd.f32 %v2461_v16, %v2351_v8  ;;  %v5092_v55 = vld [vmem:[#allocation2 + $0x171] sm:$0xff]  ;;  %v8431_v16 = vld [vmem:[#allocation59_spill] sm:$0xff] }
 0x35a   : > { %2502 = vst.msk [vmem:[%s7843_s18] sm:$0xff] %vm397_vm1, %v2494_v40  ;;  %v2497_v46 = vadd.f32 %v2489_v61, %v8425_v14  ;;  %v2487_v53 = vmax.f32 %v2479_v19, 0.0  ;;  %v2474_v47 = vmul.f32 %v7724_v23, %v2450_v9  ;;  %v2453_v59 = vadd.f32 %v6067_v2, %v7804_v22  ;;  %v8427_v22 = vld [vmem:[#allocation6_spill] sm:$0xff]  ;;  %v4991_v19 = vld [vmem:[#allocation2 + $0x170] sm:$0xff] }
 0x35b   : > { %6331 = vmatmul.mubr.msk.bf16.vlgmr.msra.gmra.mxu1 %vm392_vm3, %v7576_v18  ;;  %v2484_v21 = vadd.f32 %v2476_v60, %v2468_v29  ;;  %v7884_v18 = vsel %vm7817_vm6, 1.0, %v8350_v34  ;;  %v2434_v25 = vpop.f32.mrf.mxu0  ;;  %v7886_v26 = vpop.f32.mrf.mxu1  ;;  %v8428_v34 = vld [vmem:[#allocation60_spill] sm:$0xff]  ;;  %v2467_v39 = vadd.f32 %v2459_v52, %v2349_v58  ;;  %v5096_v63 = vpack.c.bf16 %v5092_v55, %v8431_v16 }
 0x35c   : > { %6334 = vmatprep.mubr.msk.bf16.mxu1 %vm392_vm3, %v8417_v6  ;;  %8426 = vst [vmem:[#allocation35_spill] sm:$0xff] %v7884_v18  ;;  %2505 = vst.msk [vmem:[%s7843_s18 + $0x18] sm:$0xff] %vm397_vm1, %v2497_v46  ;;  %v2495_v3 = vadd.f32 %v2487_v53, %v8427_v22  ;;  %v2482_v48 = vadd.f32 %v2474_v47, %v2466_v24  ;;  %v2477_v6 = vmul.f32 %v7798_v57, %v2453_v59  ;;  %v8433_v24 = vld [vmem:[#allocation18_spill] sm:$0xff]  ;;  %v8434_v46 = vld [vmem:[#allocation41_spill] sm:$0xff] }
 0x35d   : > { %v2451_v0 = vadd.f32 %v2434_v25, %v7808_v49  ;;  %v2492_v12 = vmax.f32 %v2484_v21, 0.0  ;;  %v7893_v28 = vpop.f32.mrf.mxu0  ;;  %v7895_v54 = vpop.f32.mrf.mxu1  ;;  %6321 = vmatmul.mubr.msk.bf16.vlgmr.msra.gmra.mxu0 %vm392_vm3, %v8428_v34  ;;  %v8430_v49 = vld [vmem:[#allocation17_spill] sm:$0xff]  ;;  %v4995_v53 = vpack.c.bf16 %v4991_v19, %v8434_v46  ;;  %v8435_v47 = vld [vmem:[#allocation14_spill] sm:$0xff] }
 0x35e   : > { %2503 = vst.msk [vmem:[%s7843_s18 + $0x8] sm:$0xff] %vm397_vm1, %v2495_v3  ;;  %v2490_v11 = vmax.f32 %v2482_v48, 0.0  ;;  %v2485_v62 = vadd.f32 %v2477_v6, %v2469_v27  ;;  %6324 = vmatprep.mubr.msk.bf16.mxu0 %vm392_vm3, %v8429_v45  ;;  %v2693_v57 = vadd.f32 %v7893_v28, %v7743_v4 }
 0x35f   : > { %v2475_v33 = vmul.f32 %v7884_v18, %v2451_v0  ;;  %v2500_v15 = vadd.f32 %v2492_v12, %v8430_v49  ;;  %v2684_v32 = vpop.f32.mrf.mxu0  ;;  %v7905_v8 = vpop.f32.mrf.mxu1 }
 0x360   : > { %v2498_v17 = vadd.f32 %v2490_v11, %v8432_v31  ;;  %v2493_v40 = vmax.f32 %v2485_v62, 0.0  ;;  %v2685_v51 = vadd.f32 %v2684_v32, %v7770_v30 }
 0x361   : > { %v2483_v61 = vadd.f32 %v2475_v33, %v2467_v39  ;;  %2508 = vst.msk [vmem:[%s7843_s18 + $0x30] sm:$0xff] %vm397_vm1, %v2500_v15  ;;  %v6083_v9 = vpop.f32.mrf.mxu0  ;;  %v7911_v29 = vpop.f32.mrf.mxu1 }
 0x362   : > { %2506 = vst.msk [vmem:[%s7843_s18 + $0x20] sm:$0xff] %vm397_vm1, %v2498_v17  ;;  %v2501_v52 = vadd.f32 %v2493_v40, %v8433_v24 }
 0x363   : > { %6335 = vmatmul.mubr.msk.bf16.gmra.mxu1 %vm392_vm3, %v5096_v63  ;;  %v2491_v60 = vmax.f32 %v2483_v61, 0.0  ;;  %v2687_v2 = vpop.f32.mrf.mxu0  ;;  %v2793_v14 = vpop.f32.mrf.mxu1 }
 0x364   : > { %2509 = vst.msk [vmem:[%s7843_s18 + $0x38] sm:$0xff] %vm397_vm1, %v2501_v52  ;;  %v2688_v13 = vadd.f32 %v2687_v2, %v7811_v7 }
 0x365   : > { %v2499_v59 = vadd.f32 %v2491_v60, %v8435_v47  ;;  %v6086_v58 = vpop.f32.mrf.mxu0  ;;  %v6097_v27 = vpop.f32.mrf.mxu1  ;;  %6325 = vmatmul.mubr.msk.bf16.gmra.mxu0 %vm392_vm3, %v4995_v53 }
 0x367   : > { %2507 = vst.msk [vmem:[%s7843_s18 + $0x28] sm:$0xff] %vm397_vm1, %v2499_v59  ;;  %v2700_v21 = vpop.f32.mrf.mxu0  ;;  %v7924_v25 = vpop.f32.mrf.mxu1 }
 0x368   : > { %v2701_v10 = vadd.f32 %v2700_v21, %v7835_v43 }
 0x369   : > { %v6087_v22 = vpop.f32.mrf.mxu0  ;;  %v6112_v3 = vpop.f32.mrf.mxu1 }
 0x36b   : > { %v2703_v48 = vpop.f32.mrf.mxu0  ;;  %v2950_v6 = vpop.f32.mrf.mxu1 }
 0x36c   : > { %v7945_v36 = vadd.f32 %v2703_v48, %v7861_v35 }
 0x36d   : > { %v6102_v0 = vpop.f32.mrf.mxu0  ;;  %v6113_v55 = vpop.f32.mrf.mxu1 }
 0x36e   : > { %v2866_v4 = vadd.f32 %v6102_v0, %v7868_v50  ;;  %v8441_v0 = vld [vmem:[#allocation64_spill] sm:$0xff] }
 0x36f   : > { %v2857_v12 = vpop.f32.mrf.mxu0  ;;  %v2953_v34 = vpop.f32.mrf.mxu1 }
 0x371   : > { %v6103_v39 = vpop.f32.mrf.mxu0  ;;  %v7926_v11 = vpop.f32.mrf.mxu1 }
 0x372   : > { %8436 = vst [vmem:[#allocation39_spill] sm:$0xff] %v7926_v11  ;;  %v2869_v30 = vadd.f32 %v6103_v39, %v7895_v54 }
 0x373   : > { %v2860_v62 = vpop.f32.mrf.mxu0  ;;  %v7928_v33 = vpop.f32.mrf.mxu1 }
 0x374   : > { %8437 = vst [vmem:[#allocation36_spill] sm:$0xff] %v7928_v33  ;;  %v2712_v33 = vadd.f32 %v6087_v22, %v7848_v42  ;;  %v2861_v7 = vadd.f32 %v2860_v62, %v7905_v8 }
 0x375   : > { %v6106_v45 = vpop.f32.mrf.mxu0  ;;  %v7930_v49 = vpop.f32.mrf.mxu1 }
 0x376   : > { %8438 = vst [vmem:[#allocation42_spill] sm:$0xff] %v7930_v49  ;;  %v2709_v49 = vadd.f32 %v6086_v58, %v7824_v56  ;;  %v2882_v56 = vadd.f32 %v6106_v45, %v7911_v29 }
 0x377   : > { %v2873_v15 = vpop.f32.mrf.mxu0  ;;  %v7932_v16 = vpop.f32.mrf.mxu1 }
 0x378   : > { %8439 = vst [vmem:[#allocation38_spill] sm:$0xff] %v7932_v16  ;;  %v2696_v16 = vadd.f32 %v6083_v9, %v7787_v5  ;;  %v7952_v43 = vadd.f32 %v2873_v15, %v2793_v14 }
 0x379   : > { %v6107_v63 = vpop.f32.mrf.mxu0  ;;  %v6132_v31 = vpop.f32.mrf.mxu1 }
 0x37a   : > { %v3156_v5 = vadd.f32 %v6132_v31, %v2693_v57  ;;  %v7954_v2 = vadd.f32 %v6107_v63, %v6097_v27 }
 0x37b   : > { %v2876_v17 = vpop.f32.mrf.mxu0  ;;  %v3123_v40 = vpop.f32.mrf.mxu1 }
 0x37c   : > { %v3154_v42 = vadd.f32 %v3123_v40, %v2685_v51  ;;  %v3366_v8 = vmul.f32 %v8441_v0, %v3156_v5  ;;  %v7958_v29 = vadd.f32 %v2876_v17, %v7924_v25 }
 0x37d   : > { %v6122_v61 = vpop.f32.mrf.mxu0  ;;  %v6133_v19 = vpop.f32.mrf.mxu1 }
 0x37e   : > { %v3039_v32 = vadd.f32 %v6122_v61, %v6112_v3  ;;  %v3157_v50 = vadd.f32 %v6133_v19, %v2696_v16  ;;  %v8444_v19 = vld [vmem:[#allocation39_spill] sm:$0xff] }
 0x37f   : > { %v3030_v24 = vpop.f32.mrf.mxu0  ;;  %v3126_v52 = vpop.f32.mrf.mxu1 }
 0x380   : > { %v3031_v58 = vadd.f32 %v3030_v24, %v2950_v6  ;;  %v3155_v22 = vadd.f32 %v3126_v52, %v2688_v13  ;;  %v8443_v13 = vld [vmem:[#allocation67_spill] sm:$0xff]  ;;  %v8445_v52 = vld [vmem:[#allocation72_spill] sm:$0xff] }
 0x381   : > { %v6123_v60 = vpop.f32.mrf.mxu0  ;;  %v6136_v46 = vpop.f32.mrf.mxu1 }
 0x382   : > { %v3160_v48 = vadd.f32 %v6136_v46, %v2709_v49  ;;  %v3365_v16 = vmul.f32 %v7646_v38, %v3155_v22  ;;  %v8446_v46 = vld [vmem:[#allocation36_spill] sm:$0xff]  ;;  %v8449_v22 = vld [vmem:[#allocation78_spill] sm:$0xff] }
 0x383   : > { %v3033_v53 = vpop.f32.mrf.mxu0  ;;  %v3139_v47 = vpop.f32.mrf.mxu1 }
 0x384   : > { %v3158_v54 = vadd.f32 %v3139_v47, %v2701_v10  ;;  %v3034_v27 = vadd.f32 %v3033_v53, %v2953_v34  ;;  %v3370_v25 = vmul.f32 %v7653_v20, %v3160_v48  ;;  %v8447_v53 = vld [vmem:[#allocation77_spill] sm:$0xff] }
 0x385   : > { %v6126_v59 = vpop.f32.mrf.mxu0  ;;  %v6137_v18 = vpop.f32.mrf.mxu1 }
 0x386   : > { %v3161_v62 = vadd.f32 %v6137_v18, %v2712_v33  ;;  %v3368_v63 = vmul.f32 %v8416_v1, %v3158_v54  ;;  %v3055_v24 = vadd.f32 %v6126_v59, %v8444_v19 }
 0x387   : > { %v3046_v41 = vpop.f32.mrf.mxu0  ;;  %v7936_v23 = vpop.f32.mrf.mxu1 }
 0x388   : > { %8440 = vst [vmem:[#allocation44_spill] sm:$0xff] %v7936_v23  ;;  %v2858_v23 = vadd.f32 %v2857_v12, %v7886_v26  ;;  %v3042_v26 = vadd.f32 %v6123_v60, %v6113_v55  ;;  %v8442_v12 = vld [vmem:[#allocation65_spill] sm:$0xff]  ;;  %v3367_v55 = vmul.f32 %v8443_v13, %v3157_v50  ;;  %v3371_v60 = vmul.f32 %v8445_v52, %v3161_v62 }
 0x389   : > { %v6127_v28 = vpop.f32.mrf.mxu0  ;;  %v6152_v11 = vpop.f32.mrf.mxu1  ;;  %v3364_v39 = vmul.f32 %v8442_v12, %v3154_v42 }
 0x38a   : > { %v3358_v21 = vadd.f32 %v6152_v11, %v3039_v32 }
 0x38b   : > { %v3049_v9 = vpop.f32.mrf.mxu0  ;;  %v3325_v35 = vpop.f32.mrf.mxu1 }
 0x38c   : > { %v3356_v14 = vadd.f32 %v3325_v35, %v3031_v58  ;;  %v3382_v10 = vmul.f32 %v7687_v37, %v3358_v21  ;;  %v8448_v58 = vld [vmem:[#allocation42_spill] sm:$0xff] }
 0x38d   : > { %v6142_v57 = vpop.f32.mrf.mxu0  ;;  %v6153_v3 = vpop.f32.mrf.mxu1  ;;  %v3058_v21 = vadd.f32 %v6127_v28, %v8448_v58 }
 0x38e   : > { %v3257_v51 = vadd.f32 %v6142_v57, %v2866_v4  ;;  %v3359_v45 = vadd.f32 %v6153_v3, %v3042_v26  ;;  %v3380_v18 = vmul.f32 %v7692_v44, %v3356_v14  ;;  %v8450_v57 = vld [vmem:[#allocation7_spill] sm:$0xff] }
 0x38f   : > { %v3224_v6 = vpop.f32.mrf.mxu0  ;;  %v3328_v11 = vpop.f32.mrf.mxu1 }
 0x390   : > { %v3374_v49 = vadd.f32 %v3366_v8, %v3257_v51  ;;  %v3255_v15 = vadd.f32 %v3224_v6, %v2858_v23  ;;  %v3357_v31 = vadd.f32 %v3328_v11, %v3034_v27  ;;  %v3047_v23 = vadd.f32 %v3046_v41, %v8446_v46  ;;  %v8451_v51 = vld [vmem:[#allocation44_spill] sm:$0xff]  ;;  %v8452_v27 = vld [vmem:[#allocation38_spill] sm:$0xff]  ;;  %v8453_v11 = vld [vmem:[#allocation3_spill] sm:$0xff] }
 0x391   : > { %v6143_v17 = vpop.f32.mrf.mxu0  ;;  %v6156_v40 = vpop.f32.mrf.mxu1  ;;  %v3383_v47 = vmul.f32 %v8447_v53, %v3359_v45  ;;  %v3050_v62 = vadd.f32 %v3049_v9, %v8452_v27 }
 0x392   : > { %v3390_v34 = vadd.f32 %v3382_v10, %v3374_v49  ;;  %v3372_v33 = vadd.f32 %v3364_v39, %v3255_v15  ;;  %v3258_v61 = vadd.f32 %v6143_v17, %v2869_v30  ;;  %v3381_v26 = vmul.f32 %v8449_v22, %v3357_v31  ;;  %v8454_v31 = vld [vmem:[#allocation79_spill] sm:$0xff]  ;;  %v8455_v17 = vld [vmem:[#allocation80_spill] sm:$0xff] }
 0x393   : > { %v3227_v4 = vpop.f32.mrf.mxu0  ;;  %v3341_v5 = vpop.f32.mrf.mxu1  ;;  %v3362_v30 = vadd.f32 %v6156_v40, %v3055_v24  ;;  %v3159_v39 = vadd.f32 %v8451_v51, %v7945_v36 }
 0x394   : > { %v3398_v32 = vmax.f32 %v3390_v34, 0.0  ;;  %v3388_v42 = vadd.f32 %v3380_v18, %v3372_v33  ;;  %v3375_v35 = vadd.f32 %v3367_v55, %v3258_v61  ;;  %v3256_v50 = vadd.f32 %v3227_v4, %v2861_v7  ;;  %v8456_v34 = vld [vmem:[#allocation8_spill] sm:$0xff] }
 0x395   : > { %v3360_v48 = vadd.f32 %v3341_v5, %v3047_v23  ;;  %v6146_v59 = vpop.f32.mrf.mxu0  ;;  %v6157_v54 = vpop.f32.mrf.mxu1 }
 0x396   : > { %v3406_v3 = vadd.f32 %v8450_v57, %v3398_v32  ;;  %v3396_v41 = vmax.f32 %v3388_v42, 0.0  ;;  %v3391_v8 = vadd.f32 %v3383_v47, %v3375_v35  ;;  %v3373_v14 = vadd.f32 %v3365_v16, %v3256_v50  ;;  %v8458_v47 = vld [vmem:[#allocation37_spill] sm:$0xff]  ;;  %v8459_v32 = vld [vmem:[#allocation4_spill] sm:$0xff]  ;;  %v8461_v57 = vld [vmem:[#allocation15_spill] sm:$0xff] }
 0x397   : > { %v3261_v7 = vadd.f32 %v6146_v59, %v2882_v56  ;;  %v3363_v28 = vadd.f32 %v6157_v54, %v3058_v21  ;;  %v3240_v45 = vpop.f32.mrf.mxu0  ;;  %v3344_v6 = vpop.f32.mrf.mxu1  ;;  %v3386_v16 = vmul.f32 %v8454_v31, %v3362_v30  ;;  %v3384_v36 = vmul.f32 %v8455_v17, %v3360_v48  ;;  %v8460_v30 = vld [vmem:[#allocation35_spill] sm:$0xff] }
 0x398   : > { %5532 = vst.msk [vmem:[%s7843_s18 + $0x50] sm:$0xff] %vm397_vm1, %v3406_v3  ;;  %v3404_v55 = vadd.f32 %v8453_v11, %v3396_v41  ;;  %v3399_v10 = vmax.f32 %v3391_v8, 0.0  ;;  %v3389_v49 = vadd.f32 %v3381_v26, %v3373_v14  ;;  %v3259_v15 = vadd.f32 %v3240_v45, %v7952_v43  ;;  %v8457_v43 = vld [vmem:[#allocation74_spill] sm:$0xff]  ;;  %v8465_v11 = vld [vmem:[#allocation12_spill] sm:$0xff] }
 0x399   : > { %v3378_v40 = vadd.f32 %v3370_v25, %v3261_v7  ;;  %v3361_v9 = vadd.f32 %v3344_v6, %v3050_v62  ;;  %v6147_v18 = vpop.f32.mrf.mxu0  ;;  %v7983_v56 = vpop.f32.mrf.mxu1  ;;  %v3369_v46 = vmul.f32 %v8457_v43, %v3159_v39  ;;  %v3387_v4 = vmul.f32 %v8458_v47, %v3363_v28  ;;  %v8464_v62 = vld [vmem:[#allocation16_spill] sm:$0xff] }
 0x39a   : > { %5530 = vst.msk [vmem:[%s7843_s18 + $0x40] sm:$0xff] %vm397_vm1, %v3404_v55  ;;  %v3407_v33 = vadd.f32 %v8456_v34, %v3399_v10  ;;  %v3397_v61 = vmax.f32 %v3389_v49, 0.0  ;;  %v3376_v19 = vadd.f32 %v3368_v63, %v3259_v15  ;;  %v3262_v24 = vadd.f32 %v6147_v18, %v7954_v2 }
 0x39b   : > { %v3394_v23 = vadd.f32 %v3386_v16, %v3378_v40  ;;  %v3243_v5 = vpop.f32.mrf.mxu0  ;;  %v7991_v25 = vpop.f32.mrf.mxu1  ;;  %v3385_v48 = vmul.f32 %v8460_v30, %v3361_v9 }
 0x39c   : > { %5533 = vst.msk [vmem:[%s7843_s18 + $0x58] sm:$0xff] %vm397_vm1, %v3407_v33  ;;  %v3405_v42 = vadd.f32 %v8459_v32, %v3397_v61  ;;  %v3392_v35 = vadd.f32 %v3384_v36, %v3376_v19  ;;  %v3379_v50 = vadd.f32 %v3371_v60, %v3262_v24  ;;  %v3260_v58 = vadd.f32 %v3243_v5, %v7958_v29  ;;  %v8462_v29 = vld [vmem:[#allocation11_spill] sm:$0xff] }
 0x39d   : > { %v3402_v63 = vmax.f32 %v3394_v23, 0.0  ;;  %v7997_v21 = vpop.f32.mrf.mxu0  ;;  %v7999_v2 = vpop.f32.mrf.mxu1 }
 0x39e   : > { %5531 = vst.msk [vmem:[%s7843_s18 + $0x48] sm:$0xff] %vm397_vm1, %v3405_v42  ;;  %v3400_v26 = vmax.f32 %v3392_v35, 0.0  ;;  %v3395_v59 = vadd.f32 %v3387_v4, %v3379_v50  ;;  %v3377_v54 = vadd.f32 %v3369_v46, %v3260_v58  ;;  %v3604_v37 = vadd.f32 %v7983_v56, %v7997_v21 }
 0x39f   : > { %v3410_v3 = vadd.f32 %v8461_v57, %v3402_v63  ;;  %v8005_v60 = vpop.f32.mrf.mxu0  ;;  %v8007_v41 = vpop.f32.mrf.mxu1 }
 0x3a0   : > { %v3408_v8 = vadd.f32 %v8462_v29, %v3400_v26  ;;  %v3403_v14 = vmax.f32 %v3395_v59, 0.0  ;;  %v3393_v51 = vadd.f32 %v3385_v48, %v3377_v54  ;;  %v3596_v0 = vadd.f32 %v7991_v25, %v8005_v60 }
 0x3a1   : > { %5536 = vst.msk [vmem:[%s7843_s18 + $0x70] sm:$0xff] %vm397_vm1, %v3410_v3  ;;  %v8012_v39 = vpop.f32.mrf.mxu0  ;;  %v8014_v27 = vpop.f32.mrf.mxu1 }
 0x3a2   : > { %8463 = vst [vmem:[#allocation40_spill] sm:$0xff] %v8014_v27  ;;  %5534 = vst.msk [vmem:[%s7843_s18 + $0x60] sm:$0xff] %vm397_vm1, %v3408_v8  ;;  %v3411_v7 = vadd.f32 %v8464_v62, %v3403_v14  ;;  %v3401_v28 = vmax.f32 %v3393_v51, 0.0 }
 0x3a3   : > { %v3518_v45 = vpop.f32.mrf.mxu0  ;;  %v3611_v6 = vpop.f32.mrf.mxu1 }
 0x3a4   : > { %5537 = vst.msk [vmem:[%s7843_s18 + $0x78] sm:$0xff] %vm397_vm1, %v3411_v7  ;;  %v3409_v55 = vadd.f32 %v8465_v11, %v3401_v28 }
 0x3a5   : > { %v6166_v10 = vpop.f32.mrf.mxu0  ;;  %v6177_v49 = vpop.f32.mrf.mxu1 }
 0x3a6   : > { %5535 = vst.msk [vmem:[%s7843_s18 + $0x68] sm:$0xff] %vm397_vm1, %v3409_v55 }
 0x3a7   : > { %v3531_v15 = vpop.f32.mrf.mxu0  ;;  %v3614_v16 = vpop.f32.mrf.mxu1 }
 0x3a8   : > { %v3612_v21 = vadd.f32 %v3611_v6, %v3531_v15 }
 0x3a9   : > { %v6167_v36 = vpop.f32.mrf.mxu0  ;;  %v6192_v40 = vpop.f32.mrf.mxu1 }
 0x3aa   : > { %v3623_v56 = vadd.f32 %v6177_v49, %v6167_v36 }
 0x3ab   : > { %v3534_v9 = vpop.f32.mrf.mxu0  ;;  %v3768_v18 = vpop.f32.mrf.mxu1 }
 0x3ad   : > { %v6182_v34 = vpop.f32.mrf.mxu0  ;;  %v6193_v33 = vpop.f32.mrf.mxu1 }
 0x3af   : > { %v3688_v61 = vpop.f32.mrf.mxu0  ;;  %v3771_v19 = vpop.f32.mrf.mxu1 }
 0x3b1   : > { %v6183_v24 = vpop.f32.mrf.mxu0  ;;  %v6196_v46 = vpop.f32.mrf.mxu1 }
 0x3b3   : > { %v3691_v23 = vpop.f32.mrf.mxu0  ;;  %v3784_v4 = vpop.f32.mrf.mxu1 }
 0x3b5   : > { %v6186_v5 = vpop.f32.mrf.mxu0  ;;  %v6197_v32 = vpop.f32.mrf.mxu1 }
 0x3b7   : > { %v3704_v42 = vpop.f32.mrf.mxu0  ;;  %v3787_v35 = vpop.f32.mrf.mxu1 }
 0x3b9   : > { %v6187_v50 = vpop.f32.mrf.mxu0  ;;  %v6212_v58 = vpop.f32.mrf.mxu1 }
 0x3ba   : > { %v3796_v36 = vadd.f32 %v6197_v32, %v6187_v50 }
 0x3bb   : > { %v3707_v63 = vpop.f32.mrf.mxu0  ;;  %v3941_v26 = vpop.f32.mrf.mxu1 }
 0x3bc   : > { %v8046_v49 = vadd.f32 %v3787_v35, %v3707_v63 }
 0x3bd   : > { %v6202_v48 = vpop.f32.mrf.mxu0  ;;  %v6213_v59 = vpop.f32.mrf.mxu1 }
 0x3bf   : > { %v3861_v54 = vpop.f32.mrf.mxu0  ;;  %v3944_v57 = vpop.f32.mrf.mxu1 }
 0x3c1   : > { %v6203_v3 = vpop.f32.mrf.mxu0  ;;  %v6216_v29 = vpop.f32.mrf.mxu1 }
 0x3c3   : > { %v3864_v8 = vpop.f32.mrf.mxu0  ;;  %v3957_v14 = vpop.f32.mrf.mxu1 }
 0x3c5   : > { %v6206_v51 = vpop.f32.mrf.mxu0  ;;  %v6217_v62 = vpop.f32.mrf.mxu1 }
 0x3c7   : > { %v3877_v7 = vpop.f32.mrf.mxu0  ;;  %v3960_v28 = vpop.f32.mrf.mxu1 }
 0x3c9   : > { %v6207_v11 = vpop.f32.mrf.mxu0  ;;  %v6232_v55 = vpop.f32.mrf.mxu1 }
 0x3cb   : > { %v3880_v30 = vpop.f32.mrf.mxu0  ;;  %v4135_v47 = vpop.f32.mrf.mxu1 }
 0x3cd   : > { %v6222_v17 = vpop.f32.mrf.mxu0  ;;  %v6233_v31 = vpop.f32.mrf.mxu1 }
 0x3ce   : > { %v4067_v27 = vadd.f32 %v6222_v17, %v3604_v37  ;;  %v3772_v17 = vadd.f32 %v3771_v19, %v3691_v23  ;;  %v3793_v37 = vadd.f32 %v6196_v46, %v6186_v5  ;;  %v8474_v19 = vld [vmem:[#allocation65_spill] sm:$0xff]  ;;  %v3958_v46 = vadd.f32 %v3957_v14, %v3877_v7  ;;  %v8475_v5 = vld [vmem:[#allocation67_spill] sm:$0xff] }
 0x3cf   : > { %v4034_v43 = vpop.f32.mrf.mxu0  ;;  %v8024_v52 = vpop.f32.mrf.mxu1  ;;  %v3969_v23 = vadd.f32 %v6217_v62, %v6207_v11 }
 0x3d0   : > { %8466 = vst [vmem:[#allocation46_spill] sm:$0xff] %v8024_v52  ;;  %v3607_v52 = vadd.f32 %v7999_v2, %v8012_v39  ;;  %v3777_v2 = vadd.f32 %v6192_v40, %v6182_v34  ;;  %v3769_v39 = vadd.f32 %v3768_v18, %v3688_v61  ;;  %v3942_v34 = vadd.f32 %v3941_v26, %v3861_v54  ;;  %v8477_v26 = vld [vmem:[#allocation68_spill] sm:$0xff] }
 0x3d1   : > { %v6223_v22 = vpop.f32.mrf.mxu0  ;;  %v8026_v1 = vpop.f32.mrf.mxu1  ;;  %v3953_v40 = vadd.f32 %v6213_v59, %v6203_v3  ;;  %v3945_v18 = vadd.f32 %v3944_v57, %v3864_v8  ;;  %v8478_v8 = vld [vmem:[#allocation76_spill] sm:$0xff] }
 0x3d2   : > { %8467 = vst [vmem:[#allocation43_spill] sm:$0xff] %v8026_v1  ;;  %v3599_v1 = vadd.f32 %v8007_v41, %v3518_v45  ;;  %v3780_v41 = vadd.f32 %v6193_v33, %v6183_v24  ;;  %v4065_v45 = vadd.f32 %v4034_v43, %v3596_v0  ;;  %v3966_v0 = vadd.f32 %v6216_v29, %v6206_v51 }
 0x3d3   : > { %v4037_v20 = vpop.f32.mrf.mxu0  ;;  %v8028_v53 = vpop.f32.mrf.mxu1  ;;  %v4168_v43 = vadd.f32 %v6232_v55, %v3777_v2  ;;  %v4166_v35 = vadd.f32 %v4135_v47, %v3769_v39 }
 0x3d4   : > { %8468 = vst [vmem:[#allocation48_spill] sm:$0xff] %v8028_v53  ;;  %v8471_v53 = vld [vmem:[#allocation40_spill] sm:$0xff]  ;;  %v4066_v61 = vadd.f32 %v4037_v20, %v3599_v1  ;;  %v8476_v20 = vld [vmem:[#allocation75_spill] sm:$0xff]  ;;  %v4169_v63 = vadd.f32 %v6233_v31, %v3780_v41  ;;  %v8482_v41 = vld [vmem:[#allocation70_spill] sm:$0xff] }
 0x3d5   : > { %v6226_v44 = vpop.f32.mrf.mxu0  ;;  %v8030_v38 = vpop.f32.mrf.mxu1 }
 0x3d6   : > { %8469 = vst [vmem:[#allocation45_spill] sm:$0xff] %v8030_v38  ;;  %v3620_v38 = vadd.f32 %v8471_v53, %v6166_v10  ;;  %v3785_v10 = vadd.f32 %v3784_v4, %v3704_v42  ;;  %v4068_v53 = vadd.f32 %v6223_v22, %v3607_v52  ;;  %v4275_v52 = vmul.f32 %v8474_v19, %v4065_v45 }
 0x3d7   : > { %v4050_v13 = vpop.f32.mrf.mxu0  ;;  %v8034_v12 = vpop.f32.mrf.mxu1  ;;  %v8052_v4 = vadd.f32 %v3960_v28, %v3880_v30  ;;  %v8479_v62 = vld [vmem:[#allocation46_spill] sm:$0xff] }
 0x3d8   : > { %8470 = vst [vmem:[#allocation50_spill] sm:$0xff] %v8034_v12  ;;  %v3615_v12 = vadd.f32 %v3614_v16, %v3534_v9  ;;  %v3950_v9 = vadd.f32 %v6212_v58, %v6202_v48  ;;  %v8473_v16 = vld [vmem:[#allocation64_spill] sm:$0xff]  ;;  %v4278_v32 = vmul.f32 %v8475_v5, %v4068_v53  ;;  %v4276_v48 = vmul.f32 %v8477_v26, %v4066_v61  ;;  %v8483_v53 = vld [vmem:[#allocation71_spill] sm:$0xff] }
 0x3d9   : > { %v6227_v25 = vpop.f32.mrf.mxu0  ;;  %v8042_v60 = vpop.f32.mrf.mxu1  ;;  %v4071_v59 = vadd.f32 %v6226_v44, %v3620_v38  ;;  %v4069_v54 = vadd.f32 %v4050_v13, %v3612_v21  ;;  %v4283_v30 = vadd.f32 %v4275_v52, %v4166_v35  ;;  %v4167_v7 = vadd.f32 %v8479_v62, %v3772_v17  ;;  %v8480_v28 = vld [vmem:[#allocation43_spill] sm:$0xff]  ;;  %v8481_v44 = vld [vmem:[#allocation77_spill] sm:$0xff] }
 0x3da   : > { %8472 = vst [vmem:[#allocation47_spill] sm:$0xff] %v8042_v60  ;;  %v4277_v60 = vmul.f32 %v8473_v16, %v4067_v27  ;;  %v4286_v47 = vadd.f32 %v4278_v32, %v4169_v63  ;;  %v4172_v11 = vadd.f32 %v8480_v28, %v3793_v37  ;;  %v4072_v55 = vadd.f32 %v6227_v25, %v3623_v56  ;;  %v8484_v37 = vld [vmem:[#allocation23_spill] sm:$0xff] }
 0x3db   : > { %v4053_v6 = vpop.f32.mrf.mxu0  ;;  %v8044_v15 = vpop.f32.mrf.mxu1  ;;  %v4284_v39 = vadd.f32 %v4276_v48, %v4167_v7  ;;  %v4281_v45 = vmul.f32 %v8482_v41, %v4071_v59  ;;  %v8486_v52 = vld [vmem:[#allocation48_spill] sm:$0xff] }
 0x3dc   : > { %v4285_v50 = vadd.f32 %v4277_v60, %v4168_v43 }
 0x3dd   : > { %v6242_v24 = vpop.f32.mrf.mxu0  ;;  %v8049_v33 = vpop.f32.mrf.mxu1  ;;  %v8487_v32 = vld [vmem:[#allocation45_spill] sm:$0xff] }
 0x3de   : > { %v4269_v22 = vadd.f32 %v6242_v24, %v3950_v9  ;;  %v4279_v9 = vmul.f32 %v8483_v53, %v4069_v54  ;;  %v8485_v24 = vld [vmem:[#allocation78_spill] sm:$0xff]  ;;  %v4289_v54 = vadd.f32 %v4281_v45, %v4172_v11 }
 0x3df   : > { %v4236_v42 = vpop.f32.mrf.mxu0  ;;  %v8055_v27 = vpop.f32.mrf.mxu1 }
 0x3e0   : > { %v4293_v1 = vmul.f32 %v8476_v20, %v4269_v22  ;;  %v4267_v58 = vadd.f32 %v4236_v42, %v3942_v34  ;;  %v4070_v34 = vadd.f32 %v4053_v6, %v3615_v12  ;;  %v4170_v22 = vadd.f32 %v8486_v52, %v3785_v10  ;;  %v8488_v42 = vld [vmem:[#allocation72_spill] sm:$0xff]  ;;  %v8489_v12 = vld [vmem:[#allocation19_spill] sm:$0xff]  ;;  %v8490_v10 = vld [vmem:[#allocation74_spill] sm:$0xff] }
 0x3e1   : > { %v6243_v57 = vpop.f32.mrf.mxu0  ;;  %v8059_v3 = vpop.f32.mrf.mxu1  ;;  %v4282_v35 = vmul.f32 %v8488_v42, %v4072_v55 }
 0x3e2   : > { %v4301_v29 = vadd.f32 %v4293_v1, %v4285_v50  ;;  %v4291_v14 = vmul.f32 %v8478_v8, %v4267_v58  ;;  %v4270_v51 = vadd.f32 %v6243_v57, %v3953_v40  ;;  %v4287_v57 = vadd.f32 %v4279_v9, %v4170_v22  ;;  %v8496_v9 = vld [vmem:[#allocation37_spill] sm:$0xff]  ;;  %v8498_v22 = vld [vmem:[#allocation31_spill] sm:$0xff] }
 0x3e3   : > { %v4239_v60 = vpop.f32.mrf.mxu0  ;;  %v8064_v31 = vpop.f32.mrf.mxu1 }
 0x3e4   : > { %v4309_v2 = vmax.f32 %v4301_v29, 0.0  ;;  %v4299_v38 = vadd.f32 %v4291_v14, %v4283_v30  ;;  %v4294_v13 = vmul.f32 %v8481_v44, %v4270_v51  ;;  %v4268_v21 = vadd.f32 %v4239_v60, %v3945_v18 }
 0x3e5   : > { %v6246_v17 = vpop.f32.mrf.mxu0  ;;  %v8069_v40 = vpop.f32.mrf.mxu1  ;;  %v4173_v18 = vadd.f32 %v8487_v32, %v3796_v36  ;;  %v4280_v30 = vmul.f32 %v8490_v10, %v4070_v34  ;;  %v8491_v36 = vld [vmem:[#allocation79_spill] sm:$0xff] }
 0x3e6   : > { %v4317_v56 = vadd.f32 %v8484_v37, %v4309_v2  ;;  %v4307_v25 = vmax.f32 %v4299_v38, 0.0  ;;  %v4302_v61 = vadd.f32 %v4294_v13, %v4286_v47  ;;  %v4292_v43 = vmul.f32 %v8485_v24, %v4268_v21  ;;  %v8493_v47 = vld [vmem:[#allocation80_spill] sm:$0xff] }
 0x3e7   : > { %v4273_v50 = vadd.f32 %v6246_v17, %v3966_v0  ;;  %v4252_v1 = vpop.f32.mrf.mxu0  ;;  %v8076_v58 = vpop.f32.mrf.mxu1  ;;  %v8492_v0 = vld [vmem:[#allocation24_spill] sm:$0xff]  ;;  %v4290_v60 = vadd.f32 %v4282_v35, %v4173_v18 }
 0x3e8   : > { %5584 = vst.msk [vmem:[%s7843_s18 + $0x90] sm:$0xff] %vm397_vm1, %v4317_v56  ;;  %v4315_v6 = vadd.f32 %v8489_v12, %v4307_v25  ;;  %v4310_v63 = vmax.f32 %v4302_v61, 0.0  ;;  %v4300_v48 = vadd.f32 %v4292_v43, %v4284_v39  ;;  %v4271_v59 = vadd.f32 %v4252_v1, %v3958_v46  ;;  %v8494_v46 = vld [vmem:[#allocation50_spill] sm:$0xff]  ;;  %v8495_v21 = vld [vmem:[#allocation20_spill] sm:$0xff]  ;;  %v8497_v43 = vld [vmem:[#allocation35_spill] sm:$0xff] }
 0x3e9   : > { %v4297_v29 = vmul.f32 %v8491_v36, %v4273_v50  ;;  %v6247_v14 = vpop.f32.mrf.mxu0  ;;  %v8083_v51 = vpop.f32.mrf.mxu1  ;;  %v4171_v11 = vadd.f32 %v8494_v46, %v8046_v49  ;;  %v8499_v50 = vld [vmem:[#allocation27_spill] sm:$0xff] }
 0x3ea   : > { %5582 = vst.msk [vmem:[%s7843_s18 + $0x80] sm:$0xff] %vm397_vm1, %v4315_v6  ;;  %v4318_v62 = vadd.f32 %v8492_v0, %v4310_v63  ;;  %v4308_v7 = vmax.f32 %v4300_v48, 0.0  ;;  %v4295_v28 = vmul.f32 %v8493_v47, %v4271_v59  ;;  %v4274_v55 = vadd.f32 %v6247_v14, %v3969_v23  ;;  %v8500_v48 = vld [vmem:[#allocation32_spill] sm:$0xff]  ;;  %v8506_v47 = vld [vmem:[#allocation47_spill] sm:$0xff] }
 0x3eb   : > { %v4305_v2 = vadd.f32 %v4297_v29, %v4289_v54  ;;  %v4255_v38 = vpop.f32.mrf.mxu0  ;;  %v8091_v13 = vpop.f32.mrf.mxu1  ;;  %v4288_v49 = vadd.f32 %v4280_v30, %v4171_v11  ;;  %v8501_v29 = vld [vmem:[#allocation28_spill] sm:$0xff] }
 0x3ec   : > { %5585 = vst.msk [vmem:[%s7843_s18 + $0x98] sm:$0xff] %vm397_vm1, %v4318_v62  ;;  %v4316_v39 = vadd.f32 %v8495_v21, %v4308_v7  ;;  %v4303_v45 = vadd.f32 %v4295_v28, %v4287_v57  ;;  %v4298_v34 = vmul.f32 %v8496_v9, %v4274_v55  ;;  %v4272_v17 = vadd.f32 %v4255_v38, %v8052_v4 }
 0x3ed   : > { %v4313_v37 = vmax.f32 %v4305_v2, 0.0  ;;  %v6262_v23 = vpop.f32.mrf.mxu0  ;;  %v8098_v56 = vpop.f32.mrf.mxu1 }
 0x3ee   : > { %5583 = vst.msk [vmem:[%s7843_s18 + $0x88] sm:$0xff] %vm397_vm1, %v4316_v39  ;;  %v4311_v25 = vmax.f32 %v4303_v45, 0.0  ;;  %v4306_v61 = vadd.f32 %v4298_v34, %v4290_v60  ;;  %v4296_v52 = vmul.f32 %v8497_v43, %v4272_v17  ;;  %v4515_v36 = vadd.f32 %v6262_v23, %v8506_v47 }
 0x3ef   : > { %v4321_v32 = vadd.f32 %v8498_v22, %v4313_v37  ;;  %v4506_v18 = vpop.f32.mrf.mxu0  ;;  %v8104_v35 = vpop.f32.mrf.mxu1 }
 0x3f0   : > { %v4319_v4 = vadd.f32 %v8499_v50, %v4311_v25  ;;  %v4314_v1 = vmax.f32 %v4306_v61, 0.0  ;;  %v4304_v12 = vadd.f32 %v4296_v52, %v4288_v49 }
 0x3f1   : > { %5588 = vst.msk [vmem:[%s7843_s18 + $0xb0] sm:$0xff] %vm397_vm1, %v4321_v32  ;;  %v6263_v6 = vpop.f32.mrf.mxu0  ;;  %v6276_v63 = vpop.f32.mrf.mxu1 }
 0x3f2   : > { %5586 = vst.msk [vmem:[%s7843_s18 + $0xa0] sm:$0xff] %vm397_vm1, %v4319_v4  ;;  %v4322_v59 = vadd.f32 %v8500_v48, %v4314_v1  ;;  %v4312_v54 = vmax.f32 %v4304_v12, 0.0  ;;  %v4518_v44 = vadd.f32 %v6263_v6, %v8049_v33 }
 0x3f3   : > { %v4509_v57 = vpop.f32.mrf.mxu0  ;;  %v4615_v30 = vpop.f32.mrf.mxu1 }
 0x3f4   : > { %5589 = vst.msk [vmem:[%s7843_s18 + $0xb8] sm:$0xff] %vm397_vm1, %v4322_v59  ;;  %v4320_v14 = vadd.f32 %v8501_v29, %v4312_v54 }
 0x3f5   : > { %v6266_v0 = vpop.f32.mrf.mxu0  ;;  %v6277_v62 = vpop.f32.mrf.mxu1 }
 0x3f6   : > { %5587 = vst.msk [vmem:[%s7843_s18 + $0xa8] sm:$0xff] %vm397_vm1, %v4320_v14  ;;  %v4531_v42 = vadd.f32 %v6266_v0, %v8059_v3 }
 0x3f7   : > { %v4522_v7 = vpop.f32.mrf.mxu0  ;;  %v8117_v28 = vpop.f32.mrf.mxu1 }
 0x3f9   : > { %v6267_v55 = vpop.f32.mrf.mxu0  ;;  %v6292_v46 = vpop.f32.mrf.mxu1 }
 0x3fa   : > { %v4534_v8 = vadd.f32 %v6267_v55, %v8069_v40 }
 0x3fb   : > { %v4525_v11 = vpop.f32.mrf.mxu0  ;;  %v4772_v60 = vpop.f32.mrf.mxu1 }
 0x3fc   : > { %v8137_v53 = vadd.f32 %v4525_v11, %v8076_v58 }
 0x3fd   : > { %v6282_v2 = vpop.f32.mrf.mxu0  ;;  %v6293_v38 = vpop.f32.mrf.mxu1 }
 0x3fe   : > { %v4688_v47 = vadd.f32 %v6282_v2, %v8083_v51 }
 0x3ff   : > { %v4679_v21 = vpop.f32.mrf.mxu0  ;;  %v4775_v39 = vpop.f32.mrf.mxu1 }
 0x401   : > { %v6283_v45 = vpop.f32.mrf.mxu0  ;;  %v8119_v34 = vpop.f32.mrf.mxu1 }
 0x402   : > { %8502 = vst [vmem:[#allocation55_spill] sm:$0xff] %v8119_v34  ;;  %v4523_v34 = vadd.f32 %v4522_v7, %v8064_v31 }
 0x403   : > { %v4682_v17 = vpop.f32.mrf.mxu0  ;;  %v8121_v37 = vpop.f32.mrf.mxu1 }
 0x404   : > { %8503 = vst [vmem:[#allocation52_spill] sm:$0xff] %v8121_v37  ;;  %v4510_v37 = vadd.f32 %v4509_v57, %v8055_v27  ;;  %v4683_v27 = vadd.f32 %v4682_v17, %v8104_v35  ;;  %v8508_v17 = vld [vmem:[#allocation70_spill] sm:$0xff] }
 0x405   : > { %v6286_v49 = vpop.f32.mrf.mxu0  ;;  %v8123_v25 = vpop.f32.mrf.mxu1 }
 0x406   : > { %8504 = vst [vmem:[#allocation49_spill] sm:$0xff] %v8123_v25  ;;  %v4704_v3 = vadd.f32 %v6286_v49, %v6276_v63 }
 0x407   : > { %v4695_v61 = vpop.f32.mrf.mxu0  ;;  %v8125_v52 = vpop.f32.mrf.mxu1 }
 0x408   : > { %8505 = vst [vmem:[#allocation54_spill] sm:$0xff] %v8125_v52  ;;  %v4507_v52 = vadd.f32 %v4506_v18, %v8044_v15  ;;  %v4691_v15 = vadd.f32 %v6283_v45, %v8098_v56  ;;  %v8143_v6 = vadd.f32 %v4695_v61, %v4615_v30 }
 0x409   : > { %v6287_v22 = vpop.f32.mrf.mxu0  ;;  %v6312_v32 = vpop.f32.mrf.mxu1 }
 0x40a   : > { %v4978_v33 = vadd.f32 %v6312_v32, %v4515_v36  ;;  %v8145_v58 = vadd.f32 %v6287_v22, %v6277_v62 }
 0x40b   : > { %v4698_v50 = vpop.f32.mrf.mxu0  ;;  %v4945_v4 = vpop.f32.mrf.mxu1 }
 0x40c   : > { %v4976_v31 = vadd.f32 %v4945_v4, %v4507_v52  ;;  %v8149_v35 = vadd.f32 %v4698_v50, %v8117_v28  ;;  %v8511_v50 = vld [vmem:[#allocation55_spill] sm:$0xff]  ;;  %v8512_v4 = vld [vmem:[#allocation72_spill] sm:$0xff] }
 0x40d   : > { %v6302_v1 = vpop.f32.mrf.mxu0  ;;  %v6313_v12 = vpop.f32.mrf.mxu1 }
 0x40e   : > { %v4861_v18 = vadd.f32 %v6302_v1, %v6292_v46  ;;  %v4979_v0 = vadd.f32 %v6313_v12, %v4518_v44  ;;  %v5188_v46 = vmul.f32 %v8473_v16, %v4978_v33  ;;  %v8513_v1 = vld [vmem:[#allocation52_spill] sm:$0xff]  ;;  %v8514_v12 = vld [vmem:[#allocation77_spill] sm:$0xff] }
 0x40f   : > { %v4852_v48 = vpop.f32.mrf.mxu0  ;;  %v4948_v59 = vpop.f32.mrf.mxu1  ;;  %v8515_v33 = vld [vmem:[#allocation49_spill] sm:$0xff] }
 0x410   : > { %v4853_v51 = vadd.f32 %v4852_v48, %v4772_v60  ;;  %v4977_v55 = vadd.f32 %v4948_v59, %v4510_v37  ;;  %v8509_v37 = vld [vmem:[#allocation71_spill] sm:$0xff] }
 0x411   : > { %v6303_v54 = vpop.f32.mrf.mxu0 }
 0x412   : > { %v4864_v11 = vadd.f32 %v6303_v54, %v6293_v38  ;;  %v5189_v38 = vmul.f32 %v8475_v5, %v4979_v0  ;;  %v5187_v16 = vmul.f32 %v8477_v26, %v4977_v55 }
 0x413   : > { %v6316_v29 = vpop.f32.mrf.mxu1  ;;  %v4855_v14 = vpop.f32.mrf.mxu0 }
 0x414   : > { %v4856_v62 = vadd.f32 %v4855_v14, %v4775_v39  ;;  %v8510_v39 = vld [vmem:[#allocation76_spill] sm:$0xff] }
 0x415   : > { %v4961_v43 = vpop.f32.mrf.mxu1  ;;  %v6306_v9 = vpop.f32.mrf.mxu0 }
 0x416   : > { %v4980_v2 = vadd.f32 %v4961_v43, %v4523_v34  ;;  %v4877_v5 = vadd.f32 %v6306_v9, %v8511_v50 }
 0x417   : > { %v6317_v10 = vpop.f32.mrf.mxu1  ;;  %v4868_v24 = vpop.f32.mrf.mxu0 }
 0x418   : > { %v4983_v45 = vadd.f32 %v6317_v10, %v4534_v8  ;;  %v5190_v49 = vmul.f32 %v8509_v37, %v4980_v2 }
 0x419   : > { %v8128_v25 = vpop.f32.mrf.mxu1  ;;  %v6307_v23 = vpop.f32.mrf.mxu0 }
 0x41a   : > { %8507 = vst [vmem:[#allocation51_spill] sm:$0xff] %v8128_v25  ;;  %v4680_v25 = vadd.f32 %v4679_v21, %v8091_v13  ;;  %v4982_v13 = vadd.f32 %v6316_v29, %v4531_v42  ;;  %v5186_v21 = vmul.f32 %v8474_v19, %v4976_v31  ;;  %v8516_v31 = vld [vmem:[#allocation78_spill] sm:$0xff] }
 0x41b   : > { %v6332_v41 = vpop.f32.mrf.mxu1  ;;  %v4871_v40 = vpop.f32.mrf.mxu0 }
 0x41c   : > { %v5180_v7 = vadd.f32 %v6332_v41, %v4861_v18  ;;  %v5192_v28 = vmul.f32 %v8508_v17, %v4982_v13  ;;  %v4880_v18 = vadd.f32 %v6307_v23, %v8515_v33  ;;  %v8531_v33 = vld [vmem:[#allocation30_spill] sm:$0xff] }
 0x41d   : > { %v5147_v57 = vpop.f32.mrf.mxu1  ;;  %v6322_v56 = vpop.f32.mrf.mxu0 }
 0x41e   : > { %v5178_v63 = vadd.f32 %v5147_v57, %v4853_v51  ;;  %v5079_v30 = vadd.f32 %v6322_v56, %v4688_v47  ;;  %v5204_v42 = vmul.f32 %v8476_v20, %v5180_v7  ;;  %v5193_v20 = vmul.f32 %v8512_v4, %v4983_v45  ;;  %v8517_v7 = vld [vmem:[#allocation25_spill] sm:$0xff]  ;;  %v8527_v4 = vld [vmem:[#allocation35_spill] sm:$0xff] }
 0x41f   : > { %v6333_v36 = vpop.f32.mrf.mxu1  ;;  %v5046_v60 = vpop.f32.mrf.mxu0 }
 0x420   : > { %v5181_v44 = vadd.f32 %v6333_v36, %v4864_v11  ;;  %v5196_v43 = vadd.f32 %v5188_v46, %v5079_v30  ;;  %v5077_v34 = vadd.f32 %v5046_v60, %v4680_v25  ;;  %v5202_v8 = vmul.f32 %v8510_v39, %v5178_v63  ;;  %v8519_v36 = vld [vmem:[#allocation54_spill] sm:$0xff] }
 0x421   : > { %v5150_v41 = vpop.f32.mrf.mxu1  ;;  %v6323_v52 = vpop.f32.mrf.mxu0  ;;  %v4869_v25 = vadd.f32 %v4868_v24, %v8513_v1  ;;  %v8518_v2 = vld [vmem:[#allocation51_spill] sm:$0xff] }
 0x422   : > { %v5179_v61 = vadd.f32 %v5150_v41, %v4856_v62  ;;  %v5212_v10 = vadd.f32 %v5204_v42, %v5196_v43  ;;  %v5194_v22 = vadd.f32 %v5186_v21, %v5077_v34  ;;  %v5080_v32 = vadd.f32 %v6323_v52, %v4691_v15  ;;  %v8520_v21 = vld [vmem:[#allocation21_spill] sm:$0xff]  ;;  %v8521_v41 = vld [vmem:[#allocation79_spill] sm:$0xff]  ;;  %v8522_v42 = vld [vmem:[#allocation80_spill] sm:$0xff] }
 0x423   : > { %v6336_v19 = vpop.f32.mrf.mxu1  ;;  %v5205_v26 = vmul.f32 %v8514_v12, %v5181_v44  ;;  %v5049_v48 = vpop.f32.mrf.mxu0  ;;  %v4981_v56 = vadd.f32 %v8518_v2, %v8137_v53  ;;  %v8524_v52 = vld [vmem:[#allocation74_spill] sm:$0xff] }
 0x424   : > { %v5220_v54 = vmax.f32 %v5212_v10, 0.0  ;;  %v5210_v29 = vadd.f32 %v5202_v8, %v5194_v22  ;;  %v5197_v14 = vadd.f32 %v5189_v38, %v5080_v32  ;;  %v5078_v47 = vadd.f32 %v5049_v48, %v4683_v27 }
 0x425   : > { %v5163_v59 = vpop.f32.mrf.mxu1  ;;  %v5203_v57 = vmul.f32 %v8516_v31, %v5179_v61  ;;  %v5184_v15 = vadd.f32 %v6336_v19, %v4877_v5  ;;  %v6326_v9 = vpop.f32.mrf.mxu0  ;;  %v4872_v27 = vadd.f32 %v4871_v40, %v8519_v36  ;;  %v5191_v19 = vmul.f32 %v8524_v52, %v4981_v56 }
 0x426   : > { %v5182_v0 = vadd.f32 %v5163_v59, %v4869_v25  ;;  %v5228_v55 = vadd.f32 %v8517_v7, %v5220_v54  ;;  %v5218_v24 = vmax.f32 %v5210_v29, 0.0  ;;  %v5213_v11 = vadd.f32 %v5205_v26, %v5197_v14  ;;  %v8528_v26 = vld [vmem:[#allocation33_spill] sm:$0xff] }
 0x427   : > { %v6337_v51 = vpop.f32.mrf.mxu1  ;;  %v5195_v13 = vadd.f32 %v5187_v16, %v5078_v47  ;;  %v5083_v46 = vadd.f32 %v6326_v9, %v4704_v3  ;;  %v5062_v63 = vpop.f32.mrf.mxu0  ;;  %v5208_v38 = vmul.f32 %v8521_v41, %v5184_v15  ;;  %v8523_v3 = vld [vmem:[#allocation26_spill] sm:$0xff]  ;;  %v8529_v59 = vld [vmem:[#allocation29_spill] sm:$0xff] }
 0x428   : > { %v5185_v23 = vadd.f32 %v6337_v51, %v4880_v18  ;;  %5636 = vst.msk [vmem:[%s7843_s18 + $0xd0] sm:$0xff] %vm397_vm1, %v5228_v55  ;;  %v5226_v62 = vadd.f32 %v8520_v21, %v5218_v24  ;;  %v5221_v45 = vmax.f32 %v5213_v11, 0.0  ;;  %v5081_v60 = vadd.f32 %v5062_v63, %v8143_v6  ;;  %v8525_v6 = vld [vmem:[#allocation37_spill] sm:$0xff] }
 0x429   : > { %v5166_v30 = vpop.f32.mrf.mxu1  ;;  %v5211_v44 = vadd.f32 %v5203_v57, %v5195_v13  ;;  %v5206_v53 = vmul.f32 %v8522_v42, %v5182_v0  ;;  %v5200_v43 = vadd.f32 %v5192_v28, %v5083_v46  ;;  %v6327_v40 = vpop.f32.mrf.mxu0  ;;  %v8526_v28 = vld [vmem:[#allocation22_spill] sm:$0xff] }
 0x42a   : > { %v5183_v34 = vadd.f32 %v5166_v30, %v4872_v27  ;;  %5634 = vst.msk [vmem:[%s7843_s18 + $0xc0] sm:$0xff] %vm397_vm1, %v5226_v62  ;;  %v5229_v16 = vadd.f32 %v8523_v3, %v5221_v45  ;;  %v5198_v37 = vadd.f32 %v5190_v49, %v5081_v60  ;;  %v5084_v61 = vadd.f32 %v6327_v40, %v8145_v58 }
 0x42b   : > { %v5219_v17 = vmax.f32 %v5211_v44, 0.0  ;;  %v5216_v39 = vadd.f32 %v5208_v38, %v5200_v43  ;;  %v5209_v8 = vmul.f32 %v8525_v6, %v5185_v23  ;;  %v5065_v10 = vpop.f32.mrf.mxu0 }
 0x42c   : > { %5637 = vst.msk [vmem:[%s7843_s18 + $0xd8] sm:$0xff] %vm397_vm1, %v5229_v16  ;;  %v5214_v32 = vadd.f32 %v5206_v53, %v5198_v37  ;;  %v5201_v50 = vadd.f32 %v5193_v20, %v5084_v61  ;;  %v5082_v5 = vadd.f32 %v5065_v10, %v8149_v35  ;;  %v5207_v1 = vmul.f32 %v8527_v4, %v5183_v34  ;;  %v8530_v35 = vld [vmem:[#allocation34_spill] sm:$0xff] }
 0x42d   : > { %v5227_v22 = vadd.f32 %v8526_v28, %v5219_v17  ;;  %v5224_v49 = vmax.f32 %v5216_v39, 0.0 }
 0x42e   : > { %v5222_v58 = vmax.f32 %v5214_v32, 0.0  ;;  %v5217_v25 = vadd.f32 %v5209_v8, %v5201_v50  ;;  %v5199_v12 = vadd.f32 %v5191_v19, %v5082_v5 }
 0x42f   : > { %5635 = vst.msk [vmem:[%s7843_s18 + $0xc8] sm:$0xff] %vm397_vm1, %v5227_v22  ;;  %v5232_v48 = vadd.f32 %v8528_v26, %v5224_v49 }
 0x430   : > { %v5230_v54 = vadd.f32 %v8529_v59, %v5222_v58  ;;  %v5225_v29 = vmax.f32 %v5217_v25, 0.0  ;;  %v5215_v14 = vadd.f32 %v5207_v1, %v5199_v12 }
 0x431   : > { %5640 = vst.msk [vmem:[%s7843_s18 + $0xf0] sm:$0xff] %vm397_vm1, %v5232_v48 }
 0x432   : > { %5638 = vst.msk [vmem:[%s7843_s18 + $0xe0] sm:$0xff] %vm397_vm1, %v5230_v54  ;;  %v5233_v20 = vadd.f32 %v8530_v35, %v5225_v29  ;;  %v5223_v47 = vmax.f32 %v5215_v14, 0.0 }
 0x434   : > { %5641 = vst.msk [vmem:[%s7843_s18 + $0xf8] sm:$0xff] %vm397_vm1, %v5233_v20  ;;  %v5231_v18 = vadd.f32 %v8531_v33, %v5223_v47 }
 0x436   : > { %5639 = vst.msk [vmem:[%s7843_s18 + $0xe8] sm:$0xff] %vm397_vm1, %v5231_v18 }
 0x437 PF: > { %s19_s27 = sadd.s32 1, %s6400_s27  }
 0x438   : > { %p16_p4 = scmp.ge.s32.totalorder %s19_s27, 4  }
 0x43a   :  { %18 = sbr.rel (!%p16_p4) target bundleno = 1 (0x1), region = 116 }

</bundles_post_ra>
